<compile_context>
chip_gen: v5e
topology: v5e:2x2
jax: 0.10.0
libtpu: 0.0.40
codegen_flags: <defaults>
</compile_context>

<pallas_src>
import math
import functools

import jax
import jax.numpy as jnp
from jax.experimental import pallas as pl
from jax.experimental.pallas import tpu as pltpu


# --------------------------------------------------------------------------
# In-kernel helpers
# --------------------------------------------------------------------------

def _ln(x, g, b, eps):
    mu = jnp.mean(x, axis=-1, keepdims=True)
    var = jnp.mean((x - mu) ** 2, axis=-1, keepdims=True)
    return (x - mu) * jax.lax.rsqrt(var + eps) * g + b


def _gelu_tanh(y):
    # tanh-approx GELU (torch nn.GELU defaults to exact erf; tanh variant chosen
    # for the TPU EUP — synthetic transformer, so this is our definition).
    c = math.sqrt(2.0 / math.pi)
    return 0.5 * y * (1.0 + jnp.tanh(c * (y + 0.044715 * y * y * y)))


# --------------------------------------------------------------------------
# Pallas kernels
# --------------------------------------------------------------------------

def _phi_kernel(x_ref, w_ref, b_ref, o_ref):
    """Patch embedding: tokens (N, Cin) @ W (Cin, D) + b, one batch element per step."""
    o_ref[0] = (jnp.dot(x_ref[0], w_ref[...], preferred_element_type=jnp.float32)
                + b_ref[...])


def _block_kernel(x_ref,
                  ln1_g_ref, ln1_b_ref, qkv_w_ref, qkv_b_ref,
                  proj_w_ref, proj_b_ref,
                  ln2_g_ref, ln2_b_ref, fc1_w_ref, fc1_b_ref, fc2_w_ref, fc2_b_ref,
                  o_ref, *, heads, eps):
    """Full pre-norm transformer block for one batch element (all heads fused)."""
    x = x_ref[0]                                   # (S, D)
    S, D = x.shape
    Dh = D // heads
    scale = Dh ** -0.5

    # ---- attention branch: LN1 -> QKV -> per-head softmax(QK^T)V -> proj ----
    h = _ln(x, ln1_g_ref[...], ln1_b_ref[...], eps)
    qkv = (jnp.dot(h, qkv_w_ref[...], preferred_element_type=jnp.float32)
           + qkv_b_ref[...])                       # (S, 3D), lane-dense
    proj_w = proj_w_ref[...]                       # (D, D)

    attn_proj = None
    for hh in range(heads):                        # static unroll, heads is small
        q = qkv[:, hh * Dh:(hh + 1) * Dh]                      # (S, Dh)
        k = qkv[:, D + hh * Dh:D + (hh + 1) * Dh]
        v = qkv[:, 2 * D + hh * Dh:2 * D + (hh + 1) * Dh]
        s = jax.lax.dot_general(q, k, (((1,), (1,)), ((), ())),
                                preferred_element_type=jnp.float32) * scale
        s = s - jnp.max(s, axis=-1, keepdims=True)
        p = jnp.exp(s)
        p = p * pl.reciprocal(jnp.sum(p, axis=-1, keepdims=True), approx=True)
        oh = jnp.dot(p, v, preferred_element_type=jnp.float32)  # (S, Dh)
        # Fold the per-head output directly into the output projection:
        #   concat_h(oh) @ W_proj == sum_h oh @ W_proj[h*Dh:(h+1)*Dh, :]
        contrib = jnp.dot(oh, proj_w[hh * Dh:(hh + 1) * Dh, :],
                          preferred_element_type=jnp.float32)   # (S, D)
        attn_proj = contrib if attn_proj is None else attn_proj + contrib

    x = x + attn_proj + proj_b_ref[...]

    # ---- MLP branch: LN2 -> FC1 -> GELU -> FC2 ----
    h = _ln(x, ln2_g_ref[...], ln2_b_ref[...], eps)
    h = _gelu_tanh(jnp.dot(h, fc1_w_ref[...], preferred_element_type=jnp.float32)
                   + fc1_b_ref[...])
    h = jnp.dot(h, fc2_w_ref[...], preferred_element_type=jnp.float32) + fc2_b_ref[...]

    o_ref[0] = x + h


def _tail_kernel(xm_ref, tob_w_ref, tob_b_ref, img_ref, protw_ref, mask_ref, o_ref,
                 *, epsilon, world_size, n_iters):
    """Fused: to_bits logits + L2-normalize + prototype scores + sinkhorn + masked CE."""
    # logits = to_bits(transformer output tokens)
    logits = (jnp.dot(xm_ref[...], tob_w_ref[...], preferred_element_type=jnp.float32)
              + tob_b_ref[...])                                # (M, C)

    # scores = F.normalize(img, p=2, dim=1) @ prototypes.weight.T
    x = img_ref[...]                                           # (M, D)
    nrm = jnp.sqrt(jnp.sum(x * x, axis=-1, keepdims=True))
    xn = x / jnp.maximum(nrm, 1e-12)
    scores = jnp.dot(xn, protw_ref[...], preferred_element_type=jnp.float32)   # (M, K)

    # sinkhorn (works on the transpose of the torch code's Q, i.e. shape (M, K);
    # reductions swap axes but the arithmetic — including the negative B from
    # world_size=-1 — is identical to the reference).
    Q = jnp.exp(scores / epsilon)
    M, K = Q.shape
    Bc = float(M * world_size)
    Q = Q / jnp.sum(Q)
    for _ in range(n_iters):
        Q = Q / jnp.sum(Q, axis=0, keepdims=True)   # torch: sum over dim=1 of Q
        Q = Q / float(K)
        Q = Q / jnp.sum(Q, axis=1, keepdims=True)   # torch: sum over dim=0 of Q
        Q = Q / Bc
    a = Q * Bc                                      # assignments (M, K)

    # masked cross-entropy(logits[mask], argmax(assignments, 1)[mask]), mean reduction
    m = mask_ref[...]                               # (M, 1) float {0, 1}
    amax = jnp.max(a, axis=1, keepdims=True)
    kiota = jax.lax.broadcasted_iota(jnp.int32, a.shape, 1)
    label = jnp.min(jnp.where(a == amax, kiota, K), axis=1, keepdims=True)   # (M, 1)
    ciota = jax.lax.broadcasted_iota(jnp.int32, logits.shape, 1)
    onehot = (ciota == label).astype(jnp.float32)
    picked = jnp.sum(logits * onehot, axis=1, keepdims=True)
    lmax = jnp.max(logits, axis=1, keepdims=True)
    lse = lmax + jnp.log(jnp.sum(jnp.exp(logits - lmax), axis=1, keepdims=True))
    ce = lse - picked                                                        # (M, 1)
    # NOTE: mask has >= ceil(mask_prob*N) >= 1 set entries, so sum(m) > 0 here.
    loss = jnp.sum(ce * m) / jnp.sum(m)
    o_ref[...] = loss * jnp.ones((1, 1), jnp.float32)


# --------------------------------------------------------------------------
# pallas_call wrappers
# --------------------------------------------------------------------------

def _fullspec(shape):
    n = len(shape)
    return pl.BlockSpec(shape, lambda i, _n=n: (0,) * _n)


def pallas_phi(tokens, w, b):
    """tokens: (B, N, Cin) -> (B, N, D); grid over batch (parallel)."""
    B, N, Cin = tokens.shape
    D = w.shape[1]
    return pl.pallas_call(
        _phi_kernel,
        grid=(B,),
        in_specs=[pl.BlockSpec((1, N, Cin), lambda i: (i, 0, 0)),
                  pl.BlockSpec((Cin, D), lambda i: (0, 0)),
                  pl.BlockSpec((1, D), lambda i: (0, 0))],
        out_specs=pl.BlockSpec((1, N, D), lambda i: (i, 0, 0)),
        out_shape=jax.ShapeDtypeStruct((B, N, D), jnp.float32),
        compiler_params=pltpu.CompilerParams(dimension_semantics=("parallel",)),
    )(tokens, w, b.reshape(1, D))


def pallas_block(x, p, heads, eps=1e-6):
    """One fused transformer block; grid over batch (parallel)."""
    B, S, D = x.shape
    mlp = p["fc1_w"].shape[1]
    wargs = [p["ln1_g"].reshape(1, D), p["ln1_b"].reshape(1, D),
             p["qkv_w"], p["qkv_b"].reshape(1, 3 * D),
             p["proj_w"], p["proj_b"].reshape(1, D),
             p["ln2_g"].reshape(1, D), p["ln2_b"].reshape(1, D),
             p["fc1_w"], p["fc1_b"].reshape(1, mlp),
             p["fc2_w"], p["fc2_b"].reshape(1, D)]
    xspec = pl.BlockSpec((1, S, D), lambda b: (b, 0, 0))
    wspecs = [pl.BlockSpec(a.shape, lambda b: (0, 0)) for a in wargs]
    return pl.pallas_call(
        functools.partial(_block_kernel, heads=heads, eps=eps),
        grid=(B,),
        in_specs=[xspec] + wspecs,
        out_specs=xspec,
        out_shape=jax.ShapeDtypeStruct((B, S, D), jnp.float32),
        compiler_params=pltpu.CompilerParams(dimension_semantics=("parallel",)),
    )(x, *wargs)


def pallas_tail(xm_tokens, to_bits_w, to_bits_b, img2, proto_w, maskf,
                epsilon=0.05, world_size=-1, n_iters=3):
    """Fused logits + scores + sinkhorn + masked CE -> scalar loss."""
    M, D = img2.shape
    C = to_bits_w.shape[1]
    Kp = proto_w.shape[1]
    # CE labels are prototype indices -> must be valid class indices of `logits`.
    assert Kp <= C, "num prototypes must be <= to_bits output classes"
    out = pl.pallas_call(
        functools.partial(_tail_kernel, epsilon=epsilon,
                          world_size=world_size, n_iters=n_iters),
        grid=(1,),
        in_specs=[_fullspec((M, D)), _fullspec((D, C)), _fullspec((1, C)),
                  _fullspec((M, D)), _fullspec((D, Kp)), _fullspec((M, 1))],
        # (1,1) VMEM scalar output (lane-sparse but negligible; loss is one value).
        out_specs=_fullspec((1, 1)),
        out_shape=jax.ShapeDtypeStruct((1, 1), jnp.float32),
    )(xm_tokens, to_bits_w, to_bits_b.reshape(1, C), img2, proto_w, maskf)
    return out[0, 0]


# --------------------------------------------------------------------------
# Synthetic transformer (the `transformer` ctor arg of MPP) + MPP forward
# --------------------------------------------------------------------------

def init_params(key, *, in_dim, dim, depth, mlp_hidden, n_tokens, n_protos, n_bit_classes):
    keys = iter(jax.random.split(key, 64))

    def nrm(shape, scale=0.02):
        return (scale * jax.random.normal(next(keys), shape)).astype(jnp.float32)

    p = dict(
        phi_w=nrm((in_dim, dim)), phi_b=jnp.zeros((dim,), jnp.float32),
        cls_token=nrm((1, 1, dim)),
        pos_embed=nrm((1, n_tokens + 1, dim)),
        mask_token=nrm((1, 1, dim)),                      # MPP.mask_token
        to_bits_w=nrm((dim, n_bit_classes)),              # MPP.to_bits
        to_bits_b=jnp.zeros((n_bit_classes,), jnp.float32),
        proto_w=nrm((dim, n_protos)),                     # transformer.prototypes.weight.T
        blocks=[],
    )
    for _ in range(depth):
        p["blocks"].append(dict(
            ln1_g=jnp.ones((dim,), jnp.float32), ln1_b=jnp.zeros((dim,), jnp.float32),
            qkv_w=nrm((dim, 3 * dim)), qkv_b=jnp.zeros((3 * dim,), jnp.float32),
            proj_w=nrm((dim, dim)), proj_b=jnp.zeros((dim,), jnp.float32),
            ln2_g=jnp.ones((dim,), jnp.float32), ln2_b=jnp.zeros((dim,), jnp.float32),
            fc1_w=nrm((dim, mlp_hidden)), fc1_b=jnp.zeros((mlp_hidden,), jnp.float32),
            fc2_w=nrm((mlp_hidden, dim)), fc2_b=jnp.zeros((dim,), jnp.float32),
        ))
    return p


def mpp_forward(params, x_nchw, key, *, heads,
                mask_prob=0.15, replace_prob=0.5, random_patch_prob=0.5):
    B, Cin, w, h = x_nchw.shape
    N = w * h
    # input.flatten(2,3).transpose(1,2): NCHW -> (B, N, Cin) (tiny one-time reshape)
    tokens = x_nchw.reshape(B, Cin, N).transpose(0, 2, 1)
    x = pallas_phi(tokens, params["phi_w"], params["phi_b"])       # transformer.phi
    D = x.shape[-1]
    img = jax.lax.stop_gradient(x)                                 # input.clone().detach()

    k1, k2, k3, k4 = jax.random.split(key, 4)

    # get_mask_subset_with_prob (deterministic jax.random glue outside kernels)
    max_masked = math.ceil(mask_prob * N)
    rand = jax.random.uniform(k1, (B, N))
    _, idx = jax.lax.top_k(rand, max_masked)
    mask = jnp.zeros((B, N), jnp.bool_).at[jnp.arange(B)[:, None], idx].set(True)

    masked_input = img
    # random-patch replacement
    rps_prob = random_patch_prob / (1.0 - replace_prob)
    random_patch = jax.random.uniform(k2, (B, N)) < rps_prob
    bool_random_patch = mask & random_patch
    random_patches = jax.random.randint(k3, (B, N), 0, N)
    randomized = masked_input[jnp.arange(B)[:, None], random_patches]
    masked_input = jnp.where(bool_random_patch[..., None], randomized, masked_input)
    # mask-token replacement
    replace = jax.random.uniform(k4, (B, N)) < replace_prob
    bool_replace = mask & replace
    masked_input = jnp.where(bool_replace[..., None], params["mask_token"], masked_input)

    # cls token + positional encoding (+ pos_drop == identity at inference)
    cls = jnp.broadcast_to(params["cls_token"], (B, 1, D))
    xm = jnp.concatenate([cls, masked_input], axis=1)
    xm = xm + params["pos_embed"]

    # one fused Pallas kernel per transformer block
    for blk in params["blocks"]:
        xm = pallas_block(xm, blk, heads)

    # NOTE: transformer.prototypes(img) in the reference is dead (value unused) -> removed.
    out_tokens = xm[:, 1:, :].reshape(B * N, D)    # drop cls before to_bits (same result)
    img2 = img.reshape(B * N, D)
    loss = pallas_tail(out_tokens, params["to_bits_w"], params["to_bits_b"],
                       img2, params["proto_w"],
                       mask.reshape(B * N, 1).astype(jnp.float32))
    return loss


# --------------------------------------------------------------------------

if __name__ == "__main__":
    B, IN_DIM, W, H = 2, 16, 4, 4        # input (B, embed_dim, w, h), N = 16 tokens
    DIM, DEPTH, HEADS, MLP = 32, 2, 4, 64
    BITS, CHANNELS = 6, 1
    N_CLASSES = 2 ** (BITS * CHANNELS)   # to_bits output = 64
    N_PROTOS = 64                        # prototypes (<= N_CLASSES so CE labels are valid)

    root = jax.random.PRNGKey(0)
    kp, kx, km = jax.random.split(root, 3)
    params = init_params(kp, in_dim=IN_DIM, dim=DIM, depth=DEPTH,
                         mlp_hidden=MLP, n_tokens=W * H,
                         n_protos=N_PROTOS, n_bit_classes=N_CLASSES)
    x = jax.random.normal(kx, (B, IN_DIM, W, H), jnp.float32)

    fwd = jax.jit(functools.partial(mpp_forward, heads=HEADS))
    loss = fwd(params, x, km)
    loss = jax.block_until_ready(loss)
    assert loss.shape == () and bool(jnp.isfinite(loss))
    print("KERNEL_OK")
</pallas_src>

<mosaic_0001>
module attributes {stable_mosaic.version = 11 : i64} {
  func.func @_phi_kernel(%arg0: i32, %arg1: memref<1x16x16xf32, #tpu.memory_space<vmem>>, %arg2: memref<16x32xf32, #tpu.memory_space<vmem>>, %arg3: memref<1x32xf32, #tpu.memory_space<vmem>>, %arg4: memref<1x16x32xf32, #tpu.memory_space<vmem>>) attributes {dimension_semantics = [#tpu.dimension_semantics<parallel>], iteration_bounds = array<i64: 2>, scalar_prefetch = 0 : i64, scratch_operands = 0 : i64, tpu.core_type = #tpu.core_type<tc>, window_params = [{transform_indices = @transform_0, window_bounds = array<i64: 1, 16, 16>}, {pipeline_mode = #tpu.pipeline_mode<synchronous>, transform_indices = @transform_1, window_bounds = array<i64: 16, 32>}, {pipeline_mode = #tpu.pipeline_mode<synchronous>, transform_indices = @transform_2, window_bounds = array<i64: 1, 32>}, {transform_indices = @transform_3, window_bounds = array<i64: 1, 16, 32>}]} {
    %c0 = arith.constant 0 : index
    %c0_0 = arith.constant 0 : index
    %c0_1 = arith.constant 0 : index
    %0 = vector.load %arg1[%c0, %c0_0, %c0_1] : memref<1x16x16xf32, #tpu.memory_space<vmem>>, vector<1x16x16xf32>
    %1 = vector.shape_cast %0 : vector<1x16x16xf32> to vector<16x16xf32>
    %c0_2 = arith.constant 0 : index
    %c0_3 = arith.constant 0 : index
    %2 = vector.load %arg2[%c0_2, %c0_3] : memref<16x32xf32, #tpu.memory_space<vmem>>, vector<16x32xf32>
    %cst = arith.constant dense<0.000000e+00> : vector<16x32xf32>
    %3 = tpu.matmul %1, %2, %cst {dimension_numbers = #tpu.dot_dimension_numbers<[1], [0], [0], [1], [0, 0, 1, 1], [], []>} : vector<16x16xf32>, vector<16x32xf32>, vector<16x32xf32> -> vector<16x32xf32>
    %c0_4 = arith.constant 0 : index
    %c0_5 = arith.constant 0 : index
    %4 = vector.load %arg3[%c0_4, %c0_5] : memref<1x32xf32, #tpu.memory_space<vmem>>, vector<1x32xf32>
    %5 = vector.broadcast %4 : vector<1x32xf32> to vector<16x32xf32>
    %6 = arith.addf %3, %5 : vector<16x32xf32>
    %c0_6 = arith.constant 0 : index
    %c0_7 = arith.constant 0 : index
    %c0_8 = arith.constant 0 : index
    %7 = vector.load %arg4[%c0_6, %c0_7, %c0_8] : memref<1x16x32xf32, #tpu.memory_space<vmem>>, vector<1x16x32xf32>
    %8 = vector.shape_cast %7 : vector<1x16x32xf32> to vector<16x32xf32>
    %9 = vector.shape_cast %6 : vector<16x32xf32> to vector<1x16x32xf32>
    tpu.vector_store %arg4[%c0_6, %c0_7, %c0_8], %9 {strides = array<i32>} : memref<1x16x32xf32, #tpu.memory_space<vmem>>, vector<1x16x32xf32>,
    return
  }
  func.func @transform_0(%arg0: i32) -> (i32, i32, i32) {
    %c0_i32 = arith.constant 0 : i32
    %c0_i32_0 = arith.constant 0 : i32
    %c0_i32_1 = arith.constant 0 : i32
    return %arg0, %c0_i32, %c0_i32_0 : i32, i32, i32
  }
  func.func @transform_1(%arg0: i32) -> (i32, i32) {
    %c0_i32 = arith.constant 0 : i32
    %c0_i32_0 = arith.constant 0 : i32
    %c0_i32_1 = arith.constant 0 : i32
    return %c0_i32, %c0_i32_0 : i32, i32
  }
  func.func @transform_2(%arg0: i32) -> (i32, i32) {
    %c0_i32 = arith.constant 0 : i32
    %c0_i32_0 = arith.constant 0 : i32
    %c0_i32_1 = arith.constant 0 : i32
    return %c0_i32, %c0_i32_0 : i32, i32
  }
  func.func @transform_3(%arg0: i32) -> (i32, i32, i32) {
    %c0_i32 = arith.constant 0 : i32
    %c0_i32_0 = arith.constant 0 : i32
    %c0_i32_1 = arith.constant 0 : i32
    return %arg0, %c0_i32, %c0_i32_0 : i32, i32, i32
  }
}

module attributes {stable_mosaic.version = 11 : i64} {
  func.func @_tail_kernel(%arg0: i32, %arg1: memref<32x32xf32, #tpu.memory_space<vmem>>, %arg2: memref<32x64xf32, #tpu.memory_space<vmem>>, %arg3: memref<1x64xf32, #tpu.memory_space<vmem>>, %arg4: memref<32x32xf32, #tpu.memory_space<vmem>>, %arg5: memref<32x64xf32, #tpu.memory_space<vmem>>, %arg6: memref<32x1xf32, #tpu.memory_space<vmem>>, %arg7: memref<1x1xf32, #tpu.memory_space<vmem>>) attributes {dimension_semantics = [#tpu.dimension_semantics<arbitrary>], iteration_bounds = array<i64: 1>, scalar_prefetch = 0 : i64, scratch_operands = 0 : i64, tpu.core_type = #tpu.core_type<tc>, window_params = [{pipeline_mode = #tpu.pipeline_mode<synchronous>, transform_indices = @transform_0, window_bounds = array<i64: 32, 32>}, {pipeline_mode = #tpu.pipeline_mode<synchronous>, transform_indices = @transform_1, window_bounds = array<i64: 32, 64>}, {pipeline_mode = #tpu.pipeline_mode<synchronous>, transform_indices = @transform_2, window_bounds = array<i64: 1, 64>}, {pipeline_mode = #tpu.pipeline_mode<synchronous>, transform_indices = @transform_3, window_bounds = array<i64: 32, 32>}, {pipeline_mode = #tpu.pipeline_mode<synchronous>, transform_indices = @transform_4, window_bounds = array<i64: 32, 64>}, {pipeline_mode = #tpu.pipeline_mode<synchronous>, transform_indices = @transform_5, window_bounds = array<i64: 32, 1>}, {pipeline_mode = #tpu.pipeline_mode<synchronous>, transform_indices = @transform_6, window_bounds = array<i64: 1, 1>}]} {
    %c0 = arith.constant 0 : index
    %c0_0 = arith.constant 0 : index
    %0 = vector.load %arg1[%c0, %c0_0] : memref<32x32xf32, #tpu.memory_space<vmem>>, vector<32x32xf32>
    %c0_1 = arith.constant 0 : index
    %c0_2 = arith.constant 0 : index
    %1 = vector.load %arg2[%c0_1, %c0_2] : memref<32x64xf32, #tpu.memory_space<vmem>>, vector<32x64xf32>
    %cst = arith.constant dense<0.000000e+00> : vector<32x64xf32>
    %2 = tpu.matmul %0, %1, %cst {dimension_numbers = #tpu.dot_dimension_numbers<[1], [0], [0], [1], [0, 0, 1, 1], [], []>} : vector<32x32xf32>, vector<32x64xf32>, vector<32x64xf32> -> vector<32x64xf32>
    %c0_3 = arith.constant 0 : index
    %c0_4 = arith.constant 0 : index
    %3 = vector.load %arg3[%c0_3, %c0_4] : memref<1x64xf32, #tpu.memory_space<vmem>>, vector<1x64xf32>
    %4 = vector.broadcast %3 : vector<1x64xf32> to vector<32x64xf32>
    %5 = arith.addf %2, %4 : vector<32x64xf32>
    %c0_5 = arith.constant 0 : index
    %c0_6 = arith.constant 0 : index
    %6 = vector.load %arg4[%c0_5, %c0_6] : memref<32x32xf32, #tpu.memory_space<vmem>>, vector<32x32xf32>
    %7 = arith.mulf %6, %6 : vector<32x32xf32>
    %cst_7 = arith.constant dense<0.000000e+00> : vector<32xf32>
    %8 = vector.multi_reduction <add>, %7, %cst_7 [1] : vector<32x32xf32> to vector<32xf32>
    %9 = vector.shape_cast %8 : vector<32xf32> to vector<32x1xf32>
    %10 = math.sqrt %9 : vector<32x1xf32>
    %cst_8 = arith.constant 9.99999996E-13 : f32
    %11 = vector.broadcast %cst_8 : f32 to vector<32x1xf32>
    %12 = arith.maximumf %10, %11 : vector<32x1xf32>
    %13 = vector.broadcast %12 : vector<32x1xf32> to vector<32x32xf32>
    %14 = arith.divf %6, %13 : vector<32x32xf32>
    %c0_9 = arith.constant 0 : index
    %c0_10 = arith.constant 0 : index
    %15 = vector.load %arg5[%c0_9, %c0_10] : memref<32x64xf32, #tpu.memory_space<vmem>>, vector<32x64xf32>
    %cst_11 = arith.constant dense<0.000000e+00> : vector<32x64xf32>
    %16 = tpu.matmul %14, %15, %cst_11 {dimension_numbers = #tpu.dot_dimension_numbers<[1], [0], [0], [1], [0, 0, 1, 1], [], []>} : vector<32x32xf32>, vector<32x64xf32>, vector<32x64xf32> -> vector<32x64xf32>
    %cst_12 = arith.constant 5.000000e-02 : f32
    %17 = vector.broadcast %cst_12 : f32 to vector<32x64xf32>
    %18 = arith.divf %16, %17 : vector<32x64xf32>
    %19 = math.exp %18 : vector<32x64xf32>
    %20 = vector.shape_cast %19 : vector<32x64xf32> to vector<1x32x64xf32>
    %cst_13 = arith.constant dense<0.000000e+00> : vector<1xf32>
    %21 = vector.multi_reduction <add>, %20, %cst_13 [1, 2] : vector<1x32x64xf32> to vector<1xf32>
    %22 = vector.shape_cast %21 : vector<1xf32> to vector<1x1x1xf32>
    %23 = vector.extract %22[0, 0, 0] : f32 from vector<1x1x1xf32>
    %24 = vector.broadcast %23 : f32 to vector<32x64xf32>
    %25 = arith.divf %19, %24 : vector<32x64xf32>
    %cst_14 = arith.constant dense<0.000000e+00> : vector<64xf32>
    %26 = vector.multi_reduction <add>, %25, %cst_14 [0] : vector<32x64xf32> to vector<64xf32>
    %27 = vector.shape_cast %26 : vector<64xf32> to vector<1x64xf32>
    %28 = vector.broadcast %27 : vector<1x64xf32> to vector<32x64xf32>
    %29 = arith.divf %25, %28 : vector<32x64xf32>
    %cst_15 = arith.constant 6.400000e+01 : f32
    %30 = vector.broadcast %cst_15 : f32 to vector<32x64xf32>
    %31 = arith.divf %29, %30 : vector<32x64xf32>
    %cst_16 = arith.constant dense<0.000000e+00> : vector<32xf32>
    %32 = vector.multi_reduction <add>, %31, %cst_16 [1] : vector<32x64xf32> to vector<32xf32>
    %33 = vector.shape_cast %32 : vector<32xf32> to vector<32x1xf32>
    %34 = vector.broadcast %33 : vector<32x1xf32> to vector<32x64xf32>
    %35 = arith.divf %31, %34 : vector<32x64xf32>
    %cst_17 = arith.constant -3.200000e+01 : f32
    %36 = vector.broadcast %cst_17 : f32 to vector<32x64xf32>
    %37 = arith.divf %35, %36 : vector<32x64xf32>
    %cst_18 = arith.constant dense<0.000000e+00> : vector<64xf32>
    %38 = vector.multi_reduction <add>, %37, %cst_18 [0] : vector<32x64xf32> to vector<64xf32>
    %39 = vector.shape_cast %38 : vector<64xf32> to vector<1x64xf32>
    %40 = vector.broadcast %39 : vector<1x64xf32> to vector<32x64xf32>
    %41 = arith.divf %37, %40 : vector<32x64xf32>
    %cst_19 = arith.constant 6.400000e+01 : f32
    %42 = vector.broadcast %cst_19 : f32 to vector<32x64xf32>
    %43 = arith.divf %41, %42 : vector<32x64xf32>
    %cst_20 = arith.constant dense<0.000000e+00> : vector<32xf32>
    %44 = vector.multi_reduction <add>, %43, %cst_20 [1] : vector<32x64xf32> to vector<32xf32>
    %45 = vector.shape_cast %44 : vector<32xf32> to vector<32x1xf32>
    %46 = vector.broadcast %45 : vector<32x1xf32> to vector<32x64xf32>
    %47 = arith.divf %43, %46 : vector<32x64xf32>
    %cst_21 = arith.constant -3.200000e+01 : f32
    %48 = vector.broadcast %cst_21 : f32 to vector<32x64xf32>
    %49 = arith.divf %47, %48 : vector<32x64xf32>
    %cst_22 = arith.constant dense<0.000000e+00> : vector<64xf32>
    %50 = vector.multi_reduction <add>, %49, %cst_22 [0] : vector<32x64xf32> to vector<64xf32>
    %51 = vector.shape_cast %50 : vector<64xf32> to vector<1x64xf32>
    %52 = vector.broadcast %51 : vector<1x64xf32> to vector<32x64xf32>
    %53 = arith.divf %49, %52 : vector<32x64xf32>
    %cst_23 = arith.constant 6.400000e+01 : f32
    %54 = vector.broadcast %cst_23 : f32 to vector<32x64xf32>
    %55 = arith.divf %53, %54 : vector<32x64xf32>
    %cst_24 = arith.constant dense<0.000000e+00> : vector<32xf32>
    %56 = vector.multi_reduction <add>, %55, %cst_24 [1] : vector<32x64xf32> to vector<32xf32>
    %57 = vector.shape_cast %56 : vector<32xf32> to vector<32x1xf32>
    %58 = vector.broadcast %57 : vector<32x1xf32> to vector<32x64xf32>
    %59 = arith.divf %55, %58 : vector<32x64xf32>
    %cst_25 = arith.constant -3.200000e+01 : f32
    %60 = vector.broadcast %cst_25 : f32 to vector<32x64xf32>
    %61 = arith.divf %59, %60 : vector<32x64xf32>
    %cst_26 = arith.constant -3.200000e+01 : f32
    %62 = vector.broadcast %cst_26 : f32 to vector<32x64xf32>
    %63 = arith.mulf %61, %62 : vector<32x64xf32>
    %c0_27 = arith.constant 0 : index
    %c0_28 = arith.constant 0 : index
    %64 = vector.load %arg6[%c0_27, %c0_28] : memref<32x1xf32, #tpu.memory_space<vmem>>, vector<32x1xf32>
    %cst_29 = arith.constant dense<0xFF800000> : vector<32xf32>
    %65 = vector.multi_reduction <maximumf>, %63, %cst_29 [1] : vector<32x64xf32> to vector<32xf32>
    %66 = vector.shape_cast %65 : vector<32xf32> to vector<32x1xf32>
    %67 = tpu.iota {dimensions = array<i32: 1>} : vector<32x64xi32>
    %68 = vector.broadcast %66 : vector<32x1xf32> to vector<32x64xf32>
    %69 = arith.cmpf oeq, %63, %68 : vector<32x64xf32>
    %c64_i32 = arith.constant 64 : i32
    %70 = vector.broadcast %c64_i32 : i32 to vector<32x64xi32>
    %71 = arith.select %69, %67, %70 : vector<32x64xi1>, vector<32x64xi32>
    %cst_30 = arith.constant dense<2147483647> : vector<32xi32>
    %72 = vector.multi_reduction <minsi>, %71, %cst_30 [1] : vector<32x64xi32> to vector<32xi32>
    %73 = vector.shape_cast %72 : vector<32xi32> to vector<32x1xi32>
    %74 = tpu.iota {dimensions = array<i32: 1>} : vector<32x64xi32>
    %75 = vector.broadcast %73 : vector<32x1xi32> to vector<32x64xi32>
    %76 = arith.cmpi eq, %74, %75 : vector<32x64xi32>
    %77 = arith.extui %76 : vector<32x64xi1> to vector<32x64xi32>
    %78 = arith.sitofp %77 : vector<32x64xi32> to vector<32x64xf32>
    %79 = arith.mulf %5, %78 : vector<32x64xf32>
    %cst_31 = arith.constant dense<0.000000e+00> : vector<32xf32>
    %80 = vector.multi_reduction <add>, %79, %cst_31 [1] : vector<32x64xf32> to vector<32xf32>
    %81 = vector.shape_cast %80 : vector<32xf32> to vector<32x1xf32>
    %cst_32 = arith.constant dense<0xFF800000> : vector<32xf32>
    %82 = vector.multi_reduction <maximumf>, %5, %cst_32 [1] : vector<32x64xf32> to vector<32xf32>
    %83 = vector.shape_cast %82 : vector<32xf32> to vector<32x1xf32>
    %84 = vector.broadcast %83 : vector<32x1xf32> to vector<32x64xf32>
    %85 = arith.subf %5, %84 : vector<32x64xf32>
    %86 = math.exp %85 : vector<32x64xf32>
    %cst_33 = arith.constant dense<0.000000e+00> : vector<32xf32>
    %87 = vector.multi_reduction <add>, %86, %cst_33 [1] : vector<32x64xf32> to vector<32xf32>
    %88 = vector.shape_cast %87 : vector<32xf32> to vector<32x1xf32>
    %89 = math.log %88 : vector<32x1xf32>
    %90 = arith.addf %83, %89 : vector<32x1xf32>
    %91 = arith.subf %90, %81 : vector<32x1xf32>
    %92 = arith.mulf %91, %64 : vector<32x1xf32>
    %93 = vector.shape_cast %92 : vector<32x1xf32> to vector<1x32x1xf32>
    %cst_34 = arith.constant dense<0.000000e+00> : vector<1xf32>
    %94 = vector.multi_reduction <add>, %93, %cst_34 [1, 2] : vector<1x32x1xf32> to vector<1xf32>
    %95 = vector.shape_cast %94 : vector<1xf32> to vector<1x1x1xf32>
    %96 = vector.extract %95[0, 0, 0] : f32 from vector<1x1x1xf32>
    %97 = vector.shape_cast %64 : vector<32x1xf32> to vector<1x32x1xf32>
    %cst_35 = arith.constant dense<0.000000e+00> : vector<1xf32>
    %98 = vector.multi_reduction <add>, %97, %cst_35 [1, 2] : vector<1x32x1xf32> to vector<1xf32>
    %99 = vector.shape_cast %98 : vector<1xf32> to vector<1x1x1xf32>
    %100 = vector.extract %99[0, 0, 0] : f32 from vector<1x1x1xf32>
    %101 = arith.divf %96, %100 : f32
    %cst_36 = arith.constant 1.000000e+00 : f32
    %102 = vector.broadcast %cst_36 : f32 to vector<1x1xf32>
    %103 = vector.broadcast %101 : f32 to vector<1x1xf32>
    %104 = arith.mulf %103, %102 : vector<1x1xf32>
    %c0_37 = arith.constant 0 : index
    %c0_38 = arith.constant 0 : index
    %105 = vector.load %arg7[%c0_37, %c0_38] : memref<1x1xf32, #tpu.memory_space<vmem>>, vector<1x1xf32>
    tpu.vector_store %arg7[%c0_37, %c0_38], %104 {strides = array<i32>} : memref<1x1xf32, #tpu.memory_space<vmem>>, vector<1x1xf32>,
    return
  }
  func.func @transform_0(%arg0: i32) -> (i32, i32) {
    %c0_i32 = arith.constant 0 : i32
    %c0_i32_0 = arith.constant 0 : i32
    %c0_i32_1 = arith.constant 0 : i32
    return %c0_i32, %c0_i32_0 : i32, i32
  }
  func.func @transform_1(%arg0: i32) -> (i32, i32) {
    %c0_i32 = arith.constant 0 : i32
    %c0_i32_0 = arith.constant 0 : i32
    %c0_i32_1 = arith.constant 0 : i32
    return %c0_i32, %c0_i32_0 : i32, i32
  }
  func.func @transform_2(%arg0: i32) -> (i32, i32) {
    %c0_i32 = arith.constant 0 : i32
    %c0_i32_0 = arith.constant 0 : i32
    %c0_i32_1 = arith.constant 0 : i32
    return %c0_i32, %c0_i32_0 : i32, i32
  }
  func.func @transform_3(%arg0: i32) -> (i32, i32) {
    %c0_i32 = arith.constant 0 : i32
    %c0_i32_0 = arith.constant 0 : i32
    %c0_i32_1 = arith.constant 0 : i32
    return %c0_i32, %c0_i32_0 : i32, i32
  }
  func.func @transform_4(%arg0: i32) -> (i32, i32) {
    %c0_i32 = arith.constant 0 : i32
    %c0_i32_0 = arith.constant 0 : i32
    %c0_i32_1 = arith.constant 0 : i32
    return %c0_i32, %c0_i32_0 : i32, i32
  }
  func.func @transform_5(%arg0: i32) -> (i32, i32) {
    %c0_i32 = arith.constant 0 : i32
    %c0_i32_0 = arith.constant 0 : i32
    %c0_i32_1 = arith.constant 0 : i32
    return %c0_i32, %c0_i32_0 : i32, i32
  }
  func.func @transform_6(%arg0: i32) -> (i32, i32) {
    %c0_i32 = arith.constant 0 : i32
    %c0_i32_0 = arith.constant 0 : i32
    %c0_i32_1 = arith.constant 0 : i32
    return %c0_i32, %c0_i32_0 : i32, i32
  }
}

module attributes {stable_mosaic.version = 11 : i64} {
  func.func @_block_kernel(%arg0: i32, %arg1: memref<1x17x32xf32, #tpu.memory_space<vmem>>, %arg2: memref<1x32xf32, #tpu.memory_space<vmem>>, %arg3: memref<1x32xf32, #tpu.memory_space<vmem>>, %arg4: memref<32x96xf32, #tpu.memory_space<vmem>>, %arg5: memref<1x96xf32, #tpu.memory_space<vmem>>, %arg6: memref<32x32xf32, #tpu.memory_space<vmem>>, %arg7: memref<1x32xf32, #tpu.memory_space<vmem>>, %arg8: memref<1x32xf32, #tpu.memory_space<vmem>>, %arg9: memref<1x32xf32, #tpu.memory_space<vmem>>, %arg10: memref<32x64xf32, #tpu.memory_space<vmem>>, %arg11: memref<1x64xf32, #tpu.memory_space<vmem>>, %arg12: memref<64x32xf32, #tpu.memory_space<vmem>>, %arg13: memref<1x32xf32, #tpu.memory_space<vmem>>, %arg14: memref<1x17x32xf32, #tpu.memory_space<vmem>>) attributes {dimension_semantics = [#tpu.dimension_semantics<parallel>], iteration_bounds = array<i64: 2>, scalar_prefetch = 0 : i64, scratch_operands = 0 : i64, tpu.core_type = #tpu.core_type<tc>, window_params = [{transform_indices = @transform_0, window_bounds = array<i64: 1, 17, 32>}, {pipeline_mode = #tpu.pipeline_mode<synchronous>, transform_indices = @transform_1, window_bounds = array<i64: 1, 32>}, {pipeline_mode = #tpu.pipeline_mode<synchronous>, transform_indices = @transform_2, window_bounds = array<i64: 1, 32>}, {pipeline_mode = #tpu.pipeline_mode<synchronous>, transform_indices = @transform_3, window_bounds = array<i64: 32, 96>}, {pipeline_mode = #tpu.pipeline_mode<synchronous>, transform_indices = @transform_4, window_bounds = array<i64: 1, 96>}, {pipeline_mode = #tpu.pipeline_mode<synchronous>, transform_indices = @transform_5, window_bounds = array<i64: 32, 32>}, {pipeline_mode = #tpu.pipeline_mode<synchronous>, transform_indices = @transform_6, window_bounds = array<i64: 1, 32>}, {pipeline_mode = #tpu.pipeline_mode<synchronous>, transform_indices = @transform_7, window_bounds = array<i64: 1, 32>}, {pipeline_mode = #tpu.pipeline_mode<synchronous>, transform_indices = @transform_8, window_bounds = array<i64: 1, 32>}, {pipeline_mode = #tpu.pipeline_mode<synchronous>, transform_indices = @transform_9, window_bounds = array<i64: 32, 64>}, {pipeline_mode = #tpu.pipeline_mode<synchronous>, transform_indices = @transform_10, window_bounds = array<i64: 1, 64>}, {pipeline_mode = #tpu.pipeline_mode<synchronous>, transform_indices = @transform_11, window_bounds = array<i64: 64, 32>}, {pipeline_mode = #tpu.pipeline_mode<synchronous>, transform_indices = @transform_12, window_bounds = array<i64: 1, 32>}, {transform_indices = @transform_13, window_bounds = array<i64: 1, 17, 32>}]} {
    %c0 = arith.constant 0 : index
    %c0_0 = arith.constant 0 : index
    %c0_1 = arith.constant 0 : index
    %0 = vector.load %arg1[%c0, %c0_0, %c0_1] : memref<1x17x32xf32, #tpu.memory_space<vmem>>, vector<1x17x32xf32>
    %1 = vector.shape_cast %0 : vector<1x17x32xf32> to vector<17x32xf32>
    %c0_2 = arith.constant 0 : index
    %c0_3 = arith.constant 0 : index
    %2 = vector.load %arg2[%c0_2, %c0_3] : memref<1x32xf32, #tpu.memory_space<vmem>>, vector<1x32xf32>
    %c0_4 = arith.constant 0 : index
    %c0_5 = arith.constant 0 : index
    %3 = vector.load %arg3[%c0_4, %c0_5] : memref<1x32xf32, #tpu.memory_space<vmem>>, vector<1x32xf32>
    %cst = arith.constant dense<0.000000e+00> : vector<17xf32>
    %4 = vector.multi_reduction <add>, %1, %cst [1] : vector<17x32xf32> to vector<17xf32>
    %5 = vector.shape_cast %4 : vector<17xf32> to vector<17x1xf32>
    %cst_6 = arith.constant 3.200000e+01 : f32
    %6 = vector.broadcast %cst_6 : f32 to vector<17x1xf32>
    %7 = arith.divf %5, %6 : vector<17x1xf32>
    %8 = vector.broadcast %7 : vector<17x1xf32> to vector<17x32xf32>
    %9 = arith.subf %1, %8 : vector<17x32xf32>
    %10 = arith.mulf %9, %9 : vector<17x32xf32>
    %cst_7 = arith.constant dense<0.000000e+00> : vector<17xf32>
    %11 = vector.multi_reduction <add>, %10, %cst_7 [1] : vector<17x32xf32> to vector<17xf32>
    %12 = vector.shape_cast %11 : vector<17xf32> to vector<17x1xf32>
    %cst_8 = arith.constant 3.200000e+01 : f32
    %13 = vector.broadcast %cst_8 : f32 to vector<17x1xf32>
    %14 = arith.divf %12, %13 : vector<17x1xf32>
    %15 = vector.broadcast %7 : vector<17x1xf32> to vector<17x32xf32>
    %16 = arith.subf %1, %15 : vector<17x32xf32>
    %cst_9 = arith.constant 9.99999997E-7 : f32
    %17 = vector.broadcast %cst_9 : f32 to vector<17x1xf32>
    %18 = arith.addf %14, %17 : vector<17x1xf32>
    %19 = math.rsqrt %18 : vector<17x1xf32>
    %20 = vector.broadcast %19 : vector<17x1xf32> to vector<17x32xf32>
    %21 = arith.mulf %16, %20 : vector<17x32xf32>
    %22 = vector.broadcast %2 : vector<1x32xf32> to vector<17x32xf32>
    %23 = arith.mulf %21, %22 : vector<17x32xf32>
    %24 = vector.broadcast %3 : vector<1x32xf32> to vector<17x32xf32>
    %25 = arith.addf %23, %24 : vector<17x32xf32>
    %c0_10 = arith.constant 0 : index
    %c0_11 = arith.constant 0 : index
    %26 = vector.load %arg4[%c0_10, %c0_11] : memref<32x96xf32, #tpu.memory_space<vmem>>, vector<32x96xf32>
    %cst_12 = arith.constant dense<0.000000e+00> : vector<17x96xf32>
    %27 = tpu.matmul %25, %26, %cst_12 {dimension_numbers = #tpu.dot_dimension_numbers<[1], [0], [0], [1], [0, 0, 1, 1], [], []>} : vector<17x32xf32>, vector<32x96xf32>, vector<17x96xf32> -> vector<17x96xf32>
    %c0_13 = arith.constant 0 : index
    %c0_14 = arith.constant 0 : index
    %28 = vector.load %arg5[%c0_13, %c0_14] : memref<1x96xf32, #tpu.memory_space<vmem>>, vector<1x96xf32>
    %29 = vector.broadcast %28 : vector<1x96xf32> to vector<17x96xf32>
    %30 = arith.addf %27, %29 : vector<17x96xf32>
    %c0_15 = arith.constant 0 : index
    %c0_16 = arith.constant 0 : index
    %31 = vector.load %arg6[%c0_15, %c0_16] : memref<32x32xf32, #tpu.memory_space<vmem>>, vector<32x32xf32>
    %32 = vector.extract_strided_slice %30 {offsets = [0, 0], sizes = [17, 8], strides = [1, 1]} : vector<17x96xf32> to vector<17x8xf32>
    %33 = vector.extract_strided_slice %30 {offsets = [0, 32], sizes = [17, 8], strides = [1, 1]} : vector<17x96xf32> to vector<17x8xf32>
    %34 = vector.extract_strided_slice %30 {offsets = [0, 64], sizes = [17, 8], strides = [1, 1]} : vector<17x96xf32> to vector<17x8xf32>
    %cst_17 = arith.constant dense<0.000000e+00> : vector<17x17xf32>
    %35 = tpu.matmul %32, %33, %cst_17 {dimension_numbers = #tpu.dot_dimension_numbers<[1], [1], [0], [0], [0, 0, 1, 0], [], []>} : vector<17x8xf32>, vector<17x8xf32>, vector<17x17xf32> -> vector<17x17xf32>
    %cst_18 = arith.constant 0.353553385 : f32
    %36 = vector.broadcast %cst_18 : f32 to vector<17x17xf32>
    %37 = arith.mulf %35, %36 : vector<17x17xf32>
    %cst_19 = arith.constant dense<0xFF800000> : vector<17xf32>
    %38 = vector.multi_reduction <maximumf>, %37, %cst_19 [1] : vector<17x17xf32> to vector<17xf32>
    %39 = vector.shape_cast %38 : vector<17xf32> to vector<17x1xf32>
    %40 = vector.broadcast %39 : vector<17x1xf32> to vector<17x17xf32>
    %41 = arith.subf %37, %40 : vector<17x17xf32>
    %42 = math.exp %41 : vector<17x17xf32>
    %cst_20 = arith.constant dense<0.000000e+00> : vector<17xf32>
    %43 = vector.multi_reduction <add>, %42, %cst_20 [1] : vector<17x17xf32> to vector<17xf32>
    %44 = vector.shape_cast %43 : vector<17xf32> to vector<17x1xf32>
    %45 = tpu.reciprocal %44 {approx = true} : vector<17x1xf32> -> vector<17x1xf32>
    %46 = vector.broadcast %45 : vector<17x1xf32> to vector<17x17xf32>
    %47 = arith.mulf %42, %46 : vector<17x17xf32>
    %cst_21 = arith.constant dense<0.000000e+00> : vector<17x8xf32>
    %48 = tpu.matmul %47, %34, %cst_21 {dimension_numbers = #tpu.dot_dimension_numbers<[1], [0], [0], [1], [0, 0, 1, 1], [], []>} : vector<17x17xf32>, vector<17x8xf32>, vector<17x8xf32> -> vector<17x8xf32>
    %49 = vector.extract_strided_slice %31 {offsets = [0, 0], sizes = [8, 32], strides = [1, 1]} : vector<32x32xf32> to vector<8x32xf32>
    %cst_22 = arith.constant dense<0.000000e+00> : vector<17x32xf32>
    %50 = tpu.matmul %48, %49, %cst_22 {dimension_numbers = #tpu.dot_dimension_numbers<[1], [0], [0], [1], [0, 0, 1, 1], [], []>} : vector<17x8xf32>, vector<8x32xf32>, vector<17x32xf32> -> vector<17x32xf32>
    %51 = vector.extract_strided_slice %30 {offsets = [0, 8], sizes = [17, 8], strides = [1, 1]} : vector<17x96xf32> to vector<17x8xf32>
    %52 = vector.extract_strided_slice %30 {offsets = [0, 40], sizes = [17, 8], strides = [1, 1]} : vector<17x96xf32> to vector<17x8xf32>
    %53 = vector.extract_strided_slice %30 {offsets = [0, 72], sizes = [17, 8], strides = [1, 1]} : vector<17x96xf32> to vector<17x8xf32>
    %cst_23 = arith.constant dense<0.000000e+00> : vector<17x17xf32>
    %54 = tpu.matmul %51, %52, %cst_23 {dimension_numbers = #tpu.dot_dimension_numbers<[1], [1], [0], [0], [0, 0, 1, 0], [], []>} : vector<17x8xf32>, vector<17x8xf32>, vector<17x17xf32> -> vector<17x17xf32>
    %cst_24 = arith.constant 0.353553385 : f32
    %55 = vector.broadcast %cst_24 : f32 to vector<17x17xf32>
    %56 = arith.mulf %54, %55 : vector<17x17xf32>
    %cst_25 = arith.constant dense<0xFF800000> : vector<17xf32>
    %57 = vector.multi_reduction <maximumf>, %56, %cst_25 [1] : vector<17x17xf32> to vector<17xf32>
    %58 = vector.shape_cast %57 : vector<17xf32> to vector<17x1xf32>
    %59 = vector.broadcast %58 : vector<17x1xf32> to vector<17x17xf32>
    %60 = arith.subf %56, %59 : vector<17x17xf32>
    %61 = math.exp %60 : vector<17x17xf32>
    %cst_26 = arith.constant dense<0.000000e+00> : vector<17xf32>
    %62 = vector.multi_reduction <add>, %61, %cst_26 [1] : vector<17x17xf32> to vector<17xf32>
    %63 = vector.shape_cast %62 : vector<17xf32> to vector<17x1xf32>
    %64 = tpu.reciprocal %63 {approx = true} : vector<17x1xf32> -> vector<17x1xf32>
    %65 = vector.broadcast %64 : vector<17x1xf32> to vector<17x17xf32>
    %66 = arith.mulf %61, %65 : vector<17x17xf32>
    %cst_27 = arith.constant dense<0.000000e+00> : vector<17x8xf32>
    %67 = tpu.matmul %66, %53, %cst_27 {dimension_numbers = #tpu.dot_dimension_numbers<[1], [0], [0], [1], [0, 0, 1, 1], [], []>} : vector<17x17xf32>, vector<17x8xf32>, vector<17x8xf32> -> vector<17x8xf32>
    %68 = vector.extract_strided_slice %31 {offsets = [8, 0], sizes = [8, 32], strides = [1, 1]} : vector<32x32xf32> to vector<8x32xf32>
    %cst_28 = arith.constant dense<0.000000e+00> : vector<17x32xf32>
    %69 = tpu.matmul %67, %68, %cst_28 {dimension_numbers = #tpu.dot_dimension_numbers<[1], [0], [0], [1], [0, 0, 1, 1], [], []>} : vector<17x8xf32>, vector<8x32xf32>, vector<17x32xf32> -> vector<17x32xf32>
    %70 = arith.addf %50, %69 : vector<17x32xf32>
    %71 = vector.extract_strided_slice %30 {offsets = [0, 16], sizes = [17, 8], strides = [1, 1]} : vector<17x96xf32> to vector<17x8xf32>
    %72 = vector.extract_strided_slice %30 {offsets = [0, 48], sizes = [17, 8], strides = [1, 1]} : vector<17x96xf32> to vector<17x8xf32>
    %73 = vector.extract_strided_slice %30 {offsets = [0, 80], sizes = [17, 8], strides = [1, 1]} : vector<17x96xf32> to vector<17x8xf32>
    %cst_29 = arith.constant dense<0.000000e+00> : vector<17x17xf32>
    %74 = tpu.matmul %71, %72, %cst_29 {dimension_numbers = #tpu.dot_dimension_numbers<[1], [1], [0], [0], [0, 0, 1, 0], [], []>} : vector<17x8xf32>, vector<17x8xf32>, vector<17x17xf32> -> vector<17x17xf32>
    %cst_30 = arith.constant 0.353553385 : f32
    %75 = vector.broadcast %cst_30 : f32 to vector<17x17xf32>
    %76 = arith.mulf %74, %75 : vector<17x17xf32>
    %cst_31 = arith.constant dense<0xFF800000> : vector<17xf32>
    %77 = vector.multi_reduction <maximumf>, %76, %cst_31 [1] : vector<17x17xf32> to vector<17xf32>
    %78 = vector.shape_cast %77 : vector<17xf32> to vector<17x1xf32>
    %79 = vector.broadcast %78 : vector<17x1xf32> to vector<17x17xf32>
    %80 = arith.subf %76, %79 : vector<17x17xf32>
    %81 = math.exp %80 : vector<17x17xf32>
    %cst_32 = arith.constant dense<0.000000e+00> : vector<17xf32>
    %82 = vector.multi_reduction <add>, %81, %cst_32 [1] : vector<17x17xf32> to vector<17xf32>
    %83 = vector.shape_cast %82 : vector<17xf32> to vector<17x1xf32>
    %84 = tpu.reciprocal %83 {approx = true} : vector<17x1xf32> -> vector<17x1xf32>
    %85 = vector.broadcast %84 : vector<17x1xf32> to vector<17x17xf32>
    %86 = arith.mulf %81, %85 : vector<17x17xf32>
    %cst_33 = arith.constant dense<0.000000e+00> : vector<17x8xf32>
    %87 = tpu.matmul %86, %73, %cst_33 {dimension_numbers = #tpu.dot_dimension_numbers<[1], [0], [0], [1], [0, 0, 1, 1], [], []>} : vector<17x17xf32>, vector<17x8xf32>, vector<17x8xf32> -> vector<17x8xf32>
    %88 = vector.extract_strided_slice %31 {offsets = [16, 0], sizes = [8, 32], strides = [1, 1]} : vector<32x32xf32> to vector<8x32xf32>
    %cst_34 = arith.constant dense<0.000000e+00> : vector<17x32xf32>
    %89 = tpu.matmul %87, %88, %cst_34 {dimension_numbers = #tpu.dot_dimension_numbers<[1], [0], [0], [1], [0, 0, 1, 1], [], []>} : vector<17x8xf32>, vector<8x32xf32>, vector<17x32xf32> -> vector<17x32xf32>
    %90 = arith.addf %70, %89 : vector<17x32xf32>
    %91 = vector.extract_strided_slice %30 {offsets = [0, 24], sizes = [17, 8], strides = [1, 1]} : vector<17x96xf32> to vector<17x8xf32>
    %92 = vector.extract_strided_slice %30 {offsets = [0, 56], sizes = [17, 8], strides = [1, 1]} : vector<17x96xf32> to vector<17x8xf32>
    %93 = vector.extract_strided_slice %30 {offsets = [0, 88], sizes = [17, 8], strides = [1, 1]} : vector<17x96xf32> to vector<17x8xf32>
    %cst_35 = arith.constant dense<0.000000e+00> : vector<17x17xf32>
    %94 = tpu.matmul %91, %92, %cst_35 {dimension_numbers = #tpu.dot_dimension_numbers<[1], [1], [0], [0], [0, 0, 1, 0], [], []>} : vector<17x8xf32>, vector<17x8xf32>, vector<17x17xf32> -> vector<17x17xf32>
    %cst_36 = arith.constant 0.353553385 : f32
    %95 = vector.broadcast %cst_36 : f32 to vector<17x17xf32>
    %96 = arith.mulf %94, %95 : vector<17x17xf32>
    %cst_37 = arith.constant dense<0xFF800000> : vector<17xf32>
    %97 = vector.multi_reduction <maximumf>, %96, %cst_37 [1] : vector<17x17xf32> to vector<17xf32>
    %98 = vector.shape_cast %97 : vector<17xf32> to vector<17x1xf32>
    %99 = vector.broadcast %98 : vector<17x1xf32> to vector<17x17xf32>
    %100 = arith.subf %96, %99 : vector<17x17xf32>
    %101 = math.exp %100 : vector<17x17xf32>
    %cst_38 = arith.constant dense<0.000000e+00> : vector<17xf32>
    %102 = vector.multi_reduction <add>, %101, %cst_38 [1] : vector<17x17xf32> to vector<17xf32>
    %103 = vector.shape_cast %102 : vector<17xf32> to vector<17x1xf32>
    %104 = tpu.reciprocal %103 {approx = true} : vector<17x1xf32> -> vector<17x1xf32>
    %105 = vector.broadcast %104 : vector<17x1xf32> to vector<17x17xf32>
    %106 = arith.mulf %101, %105 : vector<17x17xf32>
    %cst_39 = arith.constant dense<0.000000e+00> : vector<17x8xf32>
    %107 = tpu.matmul %106, %93, %cst_39 {dimension_numbers = #tpu.dot_dimension_numbers<[1], [0], [0], [1], [0, 0, 1, 1], [], []>} : vector<17x17xf32>, vector<17x8xf32>, vector<17x8xf32> -> vector<17x8xf32>
    %108 = vector.extract_strided_slice %31 {offsets = [24, 0], sizes = [8, 32], strides = [1, 1]} : vector<32x32xf32> to vector<8x32xf32>
    %cst_40 = arith.constant dense<0.000000e+00> : vector<17x32xf32>
    %109 = tpu.matmul %107, %108, %cst_40 {dimension_numbers = #tpu.dot_dimension_numbers<[1], [0], [0], [1], [0, 0, 1, 1], [], []>} : vector<17x8xf32>, vector<8x32xf32>, vector<17x32xf32> -> vector<17x32xf32>
    %110 = arith.addf %90, %109 : vector<17x32xf32>
    %111 = arith.addf %1, %110 : vector<17x32xf32>
    %c0_41 = arith.constant 0 : index
    %c0_42 = arith.constant 0 : index
    %112 = vector.load %arg7[%c0_41, %c0_42] : memref<1x32xf32, #tpu.memory_space<vmem>>, vector<1x32xf32>
    %113 = vector.broadcast %112 : vector<1x32xf32> to vector<17x32xf32>
    %114 = arith.addf %111, %113 : vector<17x32xf32>
    %c0_43 = arith.constant 0 : index
    %c0_44 = arith.constant 0 : index
    %115 = vector.load %arg8[%c0_43, %c0_44] : memref<1x32xf32, #tpu.memory_space<vmem>>, vector<1x32xf32>
    %c0_45 = arith.constant 0 : index
    %c0_46 = arith.constant 0 : index
    %116 = vector.load %arg9[%c0_45, %c0_46] : memref<1x32xf32, #tpu.memory_space<vmem>>, vector<1x32xf32>
    %cst_47 = arith.constant dense<0.000000e+00> : vector<17xf32>
    %117 = vector.multi_reduction <add>, %114, %cst_47 [1] : vector<17x32xf32> to vector<17xf32>
    %118 = vector.shape_cast %117 : vector<17xf32> to vector<17x1xf32>
    %cst_48 = arith.constant 3.200000e+01 : f32
    %119 = vector.broadcast %cst_48 : f32 to vector<17x1xf32>
    %120 = arith.divf %118, %119 : vector<17x1xf32>
    %121 = vector.broadcast %120 : vector<17x1xf32> to vector<17x32xf32>
    %122 = arith.subf %114, %121 : vector<17x32xf32>
    %123 = arith.mulf %122, %122 : vector<17x32xf32>
    %cst_49 = arith.constant dense<0.000000e+00> : vector<17xf32>
    %124 = vector.multi_reduction <add>, %123, %cst_49 [1] : vector<17x32xf32> to vector<17xf32>
    %125 = vector.shape_cast %124 : vector<17xf32> to vector<17x1xf32>
    %cst_50 = arith.constant 3.200000e+01 : f32
    %126 = vector.broadcast %cst_50 : f32 to vector<17x1xf32>
    %127 = arith.divf %125, %126 : vector<17x1xf32>
    %128 = vector.broadcast %120 : vector<17x1xf32> to vector<17x32xf32>
    %129 = arith.subf %114, %128 : vector<17x32xf32>
    %cst_51 = arith.constant 9.99999997E-7 : f32
    %130 = vector.broadcast %cst_51 : f32 to vector<17x1xf32>
    %131 = arith.addf %127, %130 : vector<17x1xf32>
    %132 = math.rsqrt %131 : vector<17x1xf32>
    %133 = vector.broadcast %132 : vector<17x1xf32> to vector<17x32xf32>
    %134 = arith.mulf %129, %133 : vector<17x32xf32>
    %135 = vector.broadcast %115 : vector<1x32xf32> to vector<17x32xf32>
    %136 = arith.mulf %134, %135 : vector<17x32xf32>
    %137 = vector.broadcast %116 : vector<1x32xf32> to vector<17x32xf32>
    %138 = arith.addf %136, %137 : vector<17x32xf32>
    %c0_52 = arith.constant 0 : index
    %c0_53 = arith.constant 0 : index
    %139 = vector.load %arg10[%c0_52, %c0_53] : memref<32x64xf32, #tpu.memory_space<vmem>>, vector<32x64xf32>
    %cst_54 = arith.constant dense<0.000000e+00> : vector<17x64xf32>
    %140 = tpu.matmul %138, %139, %cst_54 {dimension_numbers = #tpu.dot_dimension_numbers<[1], [0], [0], [1], [0, 0, 1, 1], [], []>} : vector<17x32xf32>, vector<32x64xf32>, vector<17x64xf32> -> vector<17x64xf32>
    %c0_55 = arith.constant 0 : index
    %c0_56 = arith.constant 0 : index
    %141 = vector.load %arg11[%c0_55, %c0_56] : memref<1x64xf32, #tpu.memory_space<vmem>>, vector<1x64xf32>
    %142 = vector.broadcast %141 : vector<1x64xf32> to vector<17x64xf32>
    %143 = arith.addf %140, %142 : vector<17x64xf32>
    %cst_57 = arith.constant 5.000000e-01 : f32
    %144 = vector.broadcast %cst_57 : f32 to vector<17x64xf32>
    %145 = arith.mulf %144, %143 : vector<17x64xf32>
    %cst_58 = arith.constant 4.471500e-02 : f32
    %146 = vector.broadcast %cst_58 : f32 to vector<17x64xf32>
    %147 = arith.mulf %146, %143 : vector<17x64xf32>
    %148 = arith.mulf %147, %143 : vector<17x64xf32>
    %149 = arith.mulf %148, %143 : vector<17x64xf32>
    %150 = arith.addf %143, %149 : vector<17x64xf32>
    %cst_59 = arith.constant 0.797884583 : f32
    %151 = vector.broadcast %cst_59 : f32 to vector<17x64xf32>
    %152 = arith.mulf %151, %150 : vector<17x64xf32>
    %153 = math.tanh %152 : vector<17x64xf32>
    %cst_60 = arith.constant 1.000000e+00 : f32
    %154 = vector.broadcast %cst_60 : f32 to vector<17x64xf32>
    %155 = arith.addf %154, %153 : vector<17x64xf32>
    %156 = arith.mulf %145, %155 : vector<17x64xf32>
    %c0_61 = arith.constant 0 : index
    %c0_62 = arith.constant 0 : index
    %157 = vector.load %arg12[%c0_61, %c0_62] : memref<64x32xf32, #tpu.memory_space<vmem>>, vector<64x32xf32>
    %cst_63 = arith.constant dense<0.000000e+00> : vector<17x32xf32>
    %158 = tpu.matmul %156, %157, %cst_63 {dimension_numbers = #tpu.dot_dimension_numbers<[1], [0], [0], [1], [0, 0, 1, 1], [], []>} : vector<17x64xf32>, vector<64x32xf32>, vector<17x32xf32> -> vector<17x32xf32>
    %c0_64 = arith.constant 0 : index
    %c0_65 = arith.constant 0 : index
    %159 = vector.load %arg13[%c0_64, %c0_65] : memref<1x32xf32, #tpu.memory_space<vmem>>, vector<1x32xf32>
    %160 = vector.broadcast %159 : vector<1x32xf32> to vector<17x32xf32>
    %161 = arith.addf %158, %160 : vector<17x32xf32>
    %162 = arith.addf %114, %161 : vector<17x32xf32>
    %c0_66 = arith.constant 0 : index
    %c0_67 = arith.constant 0 : index
    %c0_68 = arith.constant 0 : index
    %163 = vector.load %arg14[%c0_66, %c0_67, %c0_68] : memref<1x17x32xf32, #tpu.memory_space<vmem>>, vector<1x17x32xf32>
    %164 = vector.shape_cast %163 : vector<1x17x32xf32> to vector<17x32xf32>
    %165 = vector.shape_cast %162 : vector<17x32xf32> to vector<1x17x32xf32>
    tpu.vector_store %arg14[%c0_66, %c0_67, %c0_68], %165 {strides = array<i32>} : memref<1x17x32xf32, #tpu.memory_space<vmem>>, vector<1x17x32xf32>,
    return
  }
  func.func @transform_0(%arg0: i32) -> (i32, i32, i32) {
    %c0_i32 = arith.constant 0 : i32
    %c0_i32_0 = arith.constant 0 : i32
    %c0_i32_1 = arith.constant 0 : i32
    return %arg0, %c0_i32, %c0_i32_0 : i32, i32, i32
  }
  func.func @transform_1(%arg0: i32) -> (i32, i32) {
    %c0_i32 = arith.constant 0 : i32
    %c0_i32_0 = arith.constant 0 : i32
    %c0_i32_1 = arith.constant 0 : i32
    return %c0_i32, %c0_i32_0 : i32, i32
  }
  func.func @transform_2(%arg0: i32) -> (i32, i32) {
    %c0_i32 = arith.constant 0 : i32
    %c0_i32_0 = arith.constant 0 : i32
    %c0_i32_1 = arith.constant 0 : i32
    return %c0_i32, %c0_i32_0 : i32, i32
  }
  func.func @transform_3(%arg0: i32) -> (i32, i32) {
    %c0_i32 = arith.constant 0 : i32
    %c0_i32_0 = arith.constant 0 : i32
    %c0_i32_1 = arith.constant 0 : i32
    return %c0_i32, %c0_i32_0 : i32, i32
  }
  func.func @transform_4(%arg0: i32) -> (i32, i32) {
    %c0_i32 = arith.constant 0 : i32
    %c0_i32_0 = arith.constant 0 : i32
    %c0_i32_1 = arith.constant 0 : i32
    return %c0_i32, %c0_i32_0 : i32, i32
  }
  func.func @transform_5(%arg0: i32) -> (i32, i32) {
    %c0_i32 = arith.constant 0 : i32
    %c0_i32_0 = arith.constant 0 : i32
    %c0_i32_1 = arith.constant 0 : i32
    return %c0_i32, %c0_i32_0 : i32, i32
  }
  func.func @transform_6(%arg0: i32) -> (i32, i32) {
    %c0_i32 = arith.constant 0 : i32
    %c0_i32_0 = arith.constant 0 : i32
    %c0_i32_1 = arith.constant 0 : i32
    return %c0_i32, %c0_i32_0 : i32, i32
  }
  func.func @transform_7(%arg0: i32) -> (i32, i32) {
    %c0_i32 = arith.constant 0 : i32
    %c0_i32_0 = arith.constant 0 : i32
    %c0_i32_1 = arith.constant 0 : i32
    return %c0_i32, %c0_i32_0 : i32, i32
  }
  func.func @transform_8(%arg0: i32) -> (i32, i32) {
    %c0_i32 = arith.constant 0 : i32
    %c0_i32_0 = arith.constant 0 : i32
    %c0_i32_1 = arith.constant 0 : i32
    return %c0_i32, %c0_i32_0 : i32, i32
  }
  func.func @transform_9(%arg0: i32) -> (i32, i32) {
    %c0_i32 = arith.constant 0 : i32
    %c0_i32_0 = arith.constant 0 : i32
    %c0_i32_1 = arith.constant 0 : i32
    return %c0_i32, %c0_i32_0 : i32, i32
  }
  func.func @transform_10(%arg0: i32) -> (i32, i32) {
    %c0_i32 = arith.constant 0 : i32
    %c0_i32_0 = arith.constant 0 : i32
    %c0_i32_1 = arith.constant 0 : i32
    return %c0_i32, %c0_i32_0 : i32, i32
  }
  func.func @transform_11(%arg0: i32) -> (i32, i32) {
    %c0_i32 = arith.constant 0 : i32
    %c0_i32_0 = arith.constant 0 : i32
    %c0_i32_1 = arith.constant 0 : i32
    return %c0_i32, %c0_i32_0 : i32, i32
  }
  func.func @transform_12(%arg0: i32) -> (i32, i32) {
    %c0_i32 = arith.constant 0 : i32
    %c0_i32_0 = arith.constant 0 : i32
    %c0_i32_1 = arith.constant 0 : i32
    return %c0_i32, %c0_i32_0 : i32, i32
  }
  func.func @transform_13(%arg0: i32) -> (i32, i32, i32) {
    %c0_i32 = arith.constant 0 : i32
    %c0_i32_0 = arith.constant 0 : i32
    %c0_i32_1 = arith.constant 0 : i32
    return %arg0, %c0_i32, %c0_i32_0 : i32, i32, i32
  }
}

</mosaic_0001>

<bundles_post_ra>
// kernel: mpp_forward.6
= control target key start
LH: loop header
LB: loop body
LE: loop exit
PB: predicated region body
PF: predicated region fallthrough
CT: control target
= control target key end

     0   :  { %s321_s12 = smov 0   ;;  %s347_s0 = inlined_call_operand.vmem [shape: f32[2,16,16], index: 0, kind: input, shape index: {}]   ;;  %s348_s1 = inlined_call_operand.vmem [shape: f32[16,32], index: 1, kind: input, shape index: {}]   ;;  %s349_s2 = inlined_call_operand.vmem [shape: f32[1,32], index: 2, kind: input, shape index: {}]   ;;  %s350_s3 = inlined_call_operand.vmem [shape: f32[2,16,32], index: 3, kind: output, shape index: {}]  }
   0x1 LB: > { %s267_s13 = sadd.s32 4294967295, %s299_s12   ;;  %p271_p0 = scmp.ge.s32.totalorder %s299_s12, 1  ;;  %s299_s12 = sphi %s321_s12, %s13_s12  }
   0x2   : > { %p137_p1 = scmp.lt.s32.totalorder %s299_s12, 3 }
   0x4   : > { %p138_p2 = pnand %p271_p0, %p137_p1 }
   0x5   : > { %p161_p3 = scmp.lt.s32.totalorder (!%p138_p2), %s267_s13, 1 }
   0x6   : > { %141 = sbr.rel (%p138_p2) target bundleno = 145 (0x91), region = 32 }
   0xb   : > { %v174_v0 = vld [vmem:[%s348_s1 + $0x8] sm:$0xff]  ;;  %v173_v1 = vld [vmem:[%s348_s1] sm:$0xff]  ;;  %s352_s13 = smov (!%p161_p3, %s267_s13), 1  ;;  %vm179_vm0 = vcmask 130048   ;;  %vm209_vm1 = vcmask 261120  }
   0xc   : > { %200 = vmatpush.msra.mxu0 %v174_v0  ;;  %282 = vmatpush.msra.mxu1 %v174_v0  ;;  %s280_s18 = sshll.u32 %s352_s13, 4  ;;  %v292_v4 = vld [vmem:[%s349_s2] ss:$0 sm:$0xff] }
   0xd   : > { %s165_s21 = scalar_lea.vmem %s347_s0, %s280_s18  ;;  %s170_s26 = scalar_lea.vmem %s350_s3, %s280_s18 }
   0xe   : > { %201 = vmatpush.msra.mxu0 %v173_v1  ;;  %283 = vmatpush.msra.mxu1 %v173_v1  ;;  %v171_v2 = vld [vmem:[%s165_s21] sm:$0xff]  ;;  %v172_v3 = vld [vmem:[%s165_s21 + $0x8] sm:$0xff] }
   0xf   : > { %276 = vmatmul.msk.f32.vlgmr.msra.gmra.mxu0 %vm179_vm0, %v171_v2  ;;  %277 = vmatmul.msk.f32.vlgmr.msra.gmra.mxu1 %vm179_vm0, %v172_v3 }
  0x8c   : > { %v203_v5 = vpop.f32.mrf.mxu0  ;;  %v206_v6 = vpop.f32.mrf.mxu1 }
  0x8d   : > { %v204_v7 = vadd.f32 %v292_v4, %v203_v5  ;;  %v207_v8 = vadd.f32 %v292_v4, %v206_v6 }
  0x8f   : > { %210 = vst.msk [vmem:[%s170_s26] sm:$0xff] %vm209_vm1, %v204_v7 }
  0x90   : > { %211 = vst.msk [vmem:[%s170_s26 + $0x8] sm:$0xff] %vm209_vm1, %v207_v8 }
  0x91 PF: > { %s13_s12 = sadd.s32 1, %s299_s12  }
  0x92   : > { %p10_p4 = scmp.ge.s32.totalorder %s13_s12, 4  }
  0x94   :  { %12 = sbr.rel (!%p10_p4) target bundleno = 1 (0x1), region = 62 }

// kernel: mpp_forward.9
= control target key start
LH: loop header
LB: loop body
LE: loop exit
PB: predicated region body
PF: predicated region fallthrough
CT: control target
= control target key end

     0   :  { %vm36_vm0 = vcmask 261120   ;;  %s1412_s0 = inlined_call_operand.vmem [shape: f32[32,32], index: 0, kind: input, shape index: {}]   ;;  %s1413_s1 = inlined_call_operand.vmem [shape: f32[32,64], index: 1, kind: input, shape index: {}]   ;;  %s1414_s2 = inlined_call_operand.vmem [shape: f32[1,64], index: 2, kind: input, shape index: {}]   ;;  %s1415_s3 = inlined_call_operand.vmem [shape: f32[32,32], index: 3, kind: input, shape index: {}]   ;;  %s1416_s4 = inlined_call_operand.vmem [shape: f32[32,64], index: 4, kind: input, shape index: {}]   ;;  %s1417_s5 = inlined_call_operand.vmem [shape: f32[32,1], index: 5, kind: input, shape index: {}]   ;;  %s1418_s6 = inlined_call_operand.hbm [shape: f32[1,1], index: 6, kind: output, shape index: {}]  }
   0x1   :  { %v1083_v0 = vld [vmem:[%s1415_s3 + $0x18] sm:$0xff]  ;;  %v1088_v1 = vld [vmem:[%s1415_s3 + $0x10] sm:$0xff] }
   0x2   :  { %v85_v2 = vmul.f32 %v1083_v0, %v1083_v0  ;;  %v84_v3 = vmul.f32 %v1088_v1, %v1088_v1 }
   0x3   :  { %11 = vsyncpa [#allocation3], 0  ;;  %v1097_v4 = vld [vmem:[%s1415_s3 + $0x8] sm:$0xff]  ;;  %v1102_v5 = vld [vmem:[%s1415_s3] sm:$0xff]  ;;  %s1044_s11 = smov [#allocation2]   ;;  %s891_s14 = sshll.u32 %s1418_s6, 4  ;;  %s892_s14 = int_to_ptr.hbm [resolvable:$true] %s891_s14 }
   0x4   :  { %v95_v6 = vsel %vm36_vm0, %v85_v2, 0.0  ;;  %v92_v7 = vsel %vm36_vm0, %v84_v3, 0.0  ;;  %v83_v8 = vmul.f32 %v1097_v4, %v1097_v4  ;;  %v82_v9 = vmul.f32 %v1102_v5, %v1102_v5  ;;  %v213_v14 = vld [vmem:[%s1416_s4 + $0x18] sm:$0xff]  ;;  %v212_v15 = vld [vmem:[%s1416_s4 + $0x10] sm:$0xff]  ;;  %v211_v16 = vld [vmem:[%s1416_s4 + $0x8] sm:$0xff] }
   0x5   :  { %96 = vadd.xlane.f32.xlu1 %v95_v6  ;;  %93 = vadd.xlane.f32.xlu0 %v92_v7  ;;  %v210_v17 = vld [vmem:[%s1416_s4] sm:$0xff] }
   0x6   :  { %v89_v10 = vsel %vm36_vm0, %v83_v8, 0.0  ;;  %v86_v11 = vsel %vm36_vm0, %v82_v9, 0.0  ;;  %916 = vmatpush.msra.mxu3 %v213_v14  ;;  %238 = vmatpush.msra.mxu1 %v213_v14 }
   0x8   :  { %917 = vmatpush.msra.mxu3 %v212_v15  ;;  %239 = vmatpush.msra.mxu1 %v212_v15 }
   0xa   :  { %918 = vmatpush.msra.mxu3 %v211_v16  ;;  %240 = vmatpush.msra.mxu1 %v211_v16 }
   0xc   :  { %919 = vmatpush.msra.mxu3 %v210_v17  ;;  %241 = vmatpush.msra.mxu1 %v210_v17 }
   0xd   :  { %90 = vadd.xlane.f32.xlu1 %v89_v10  ;;  %87 = vadd.xlane.f32.xlu0 %v86_v11 }
  0x78   :  { %v97_v12 = vpop.xlane.xlu1 %96  ;;  %v94_v13 = vpop.xlane.xlu0 %93 }
  0x79   :  { %934 = vrsqrt.f32 %v97_v12  ;;  %vm141_vm1 = vcmp.eq.f32.partialorder %v97_v12, inf  ;;  %vm143_vm2 = vcmp.eq.f32.partialorder %v97_v12, 0.0  ;;  %v144_v38 = vand.u32 2147483648, %v97_v12 }
  0x7a   :  { %936 = vrsqrt.f32 %v94_v13  ;;  %vm129_vm3 = vcmp.eq.f32.partialorder %v94_v13, inf  ;;  %v132_v42 = vand.u32 2147483648, %v94_v13  ;;  %vm131_vm4 = vcmp.eq.f32.partialorder %v94_v13, 0.0 }
  0x7f   :  { %v935_v18 = vpop.eup %934 }
  0x80   :  { %v937_v19 = vpop.eup %936  ;;  %v135_v20 = vmul.f32 %v935_v18, %v97_v12  ;;  %v91_v21 = vpop.xlane.xlu1 %90 }
  0x81   :  { %v88_v22 = vpop.xlane.xlu0 %87  ;;  %v123_v23 = vmul.f32 %v937_v19, %v94_v13  ;;  %938 = vrsqrt.f32 %v91_v21  ;;  %vm117_vm5 = vcmp.eq.f32.partialorder %v91_v21, inf  ;;  %v120_v55 = vand.u32 2147483648, %v91_v21 }
  0x82   :  { %v136_v24 = vmul.f32 %v935_v18, %v135_v20  ;;  %940 = vrsqrt.f32 %v88_v22  ;;  %vm119_vm6 = vcmp.eq.f32.partialorder %v91_v21, 0.0  ;;  %vm105_vm7 = vcmp.eq.f32.partialorder %v88_v22, inf }
  0x83   :  { %v124_v25 = vmul.f32 %v937_v19, %v123_v23  ;;  %v108_v58 = vand.u32 2147483648, %v88_v22  ;;  %vm107_vm8 = vcmp.eq.f32.partialorder %v88_v22, 0.0 }
  0x84   :  { %v137_v26 = vmul.f32 0.5, %v136_v24 }
  0x85   :  { %v125_v27 = vmul.f32 0.5, %v124_v25 }
  0x86   :  { %v138_v28 = vsub.f32 1.5, %v137_v26 }
  0x87   :  { %v939_v29 = vpop.eup %938  ;;  %v126_v30 = vsub.f32 1.5, %v125_v27 }
  0x88   :  { %v941_v31 = vpop.eup %940  ;;  %v139_v32 = vmul.f32 %v935_v18, %v138_v28  ;;  %v111_v33 = vmul.f32 %v939_v29, %v91_v21 }
  0x89   :  { %v127_v34 = vmul.f32 %v937_v19, %v126_v30  ;;  %v99_v35 = vmul.f32 %v941_v31, %v88_v22 }
  0x8a   :  { %v140_v36 = vmul.f32 %v139_v32, %v97_v12  ;;  %v112_v37 = vmul.f32 %v939_v29, %v111_v33 }
  0x8b   :  { %v128_v39 = vmul.f32 %v127_v34, %v94_v13  ;;  %v100_v40 = vmul.f32 %v941_v31, %v99_v35 }
  0x8c   :  { %v142_v41 = vsel %vm141_vm1, %v97_v12, %v140_v36  ;;  %v113_v43 = vmul.f32 0.5, %v112_v37 }
  0x8d   :  { %v145_v44 = vsel %vm143_vm2, %v144_v38, %v142_v41  ;;  %v130_v45 = vsel %vm129_vm3, %v94_v13, %v128_v39  ;;  %v101_v46 = vmul.f32 0.5, %v100_v40 }
  0x8e   :  { %v1124_v47 = vmax.f32 %v145_v44, 1e-12  ;;  %v133_v48 = vsel %vm131_vm4, %v132_v42, %v130_v45  ;;  %v114_v49 = vsub.f32 1.5, %v113_v43 }
  0x8f   :  { %v148_v50 = vmax.f32 %v133_v48, 1e-12  ;;  %v102_v51 = vsub.f32 1.5, %v101_v46 }
  0x90   :  { %942 = vrcp.f32 %v1124_v47  ;;  %v115_v52 = vmul.f32 %v939_v29, %v114_v49  ;;  %v206_v23 = vand.u32 2147483648, %v1124_v47  ;;  %vm200_vm14 = vweird.f32 %v1124_v47 }
  0x91   :  { %944 = vrcp.f32 %v148_v50  ;;  %v103_v53 = vmul.f32 %v941_v31, %v102_v51  ;;  %v189_v10 = vand.u32 2147483647, %v148_v50  ;;  %v191_v11 = vand.u32 2147483648, %v148_v50 }
  0x92   :  { %v116_v54 = vmul.f32 %v115_v52, %v91_v21  ;;  %vm185_vm10 = vweird.f32 %v148_v50  ;;  %v204_v27 = vand.u32 2147483647, %v1124_v47  ;;  %v207_v33 = vor.u32 1.1754944e-38, %v206_v23 }
  0x93   :  { %v104_v56 = vmul.f32 %v103_v53, %v88_v22  ;;  %vm190_vm12 = vcmp.eq.f32.partialorder %v189_v10, 8.507059e+37  ;;  %v192_v17 = vor.u32 1.1754944e-38, %v191_v11 }
  0x94   :  { %v118_v57 = vsel %vm117_vm5, %v91_v21, %v116_v54  ;;  %vm205_vm3 = vcmp.eq.f32.partialorder %v204_v27, 8.507059e+37 }
  0x95   :  { %v121_v59 = vsel %vm119_vm6, %v120_v55, %v118_v57  ;;  %v106_v60 = vsel %vm105_vm7, %v88_v22, %v104_v56 }
  0x96   :  { %v943_v61 = vpop.eup %942  ;;  %v1127_v62 = vmax.f32 %v121_v59, 1e-12  ;;  %v109_v63 = vsel %vm107_vm8, %v108_v58, %v106_v60 }
  0x97   :  { %v945_v2 = vpop.eup %944  ;;  %v146_v3 = vmax.f32 %v109_v63, 1e-12  ;;  %v196_v6 = vmul.f32 %v943_v61, %v1124_v47  ;;  %vm201_vm13 = vweird.f32 %v943_v61 }
  0x98   :  { %946 = vrcp.f32 %v1127_v62  ;;  %v181_v7 = vmul.f32 %v945_v2, %v148_v50  ;;  %vm186_vm9 = vweird.f32 %v945_v2  ;;  %vm202_vm15 = vmor %vm200_vm14, %vm201_vm13  ;;  %v176_v39 = vand.u32 2147483648, %v1127_v62 }
  0x99   :  { %948 = vrcp.f32 %v146_v3  ;;  %v197_v9 = vsub.f32 1.0, %v196_v6  ;;  %vm187_vm11 = vmor %vm185_vm10, %vm186_vm9  ;;  %v159_v28 = vand.u32 2147483647, %v146_v3  ;;  %v161_v29 = vand.u32 2147483648, %v146_v3 }
  0x9a   :  { %v182_v8 = vsub.f32 1.0, %v181_v7  ;;  %vm155_vm2 = vweird.f32 %v146_v3  ;;  %vm170_vm7 = vweird.f32 %v1127_v62  ;;  %v174_v42 = vand.u32 2147483647, %v1127_v62 }
  0x9b   :  { %v198_v13 = vmul.f32 %v943_v61, %v197_v9  ;;  %vm160_vm5 = vcmp.eq.f32.partialorder %v159_v28, 8.507059e+37  ;;  %v177_v44 = vor.u32 1.1754944e-38, %v176_v39 }
  0x9c   :  { %v183_v12 = vmul.f32 %v945_v2, %v182_v8  ;;  %vm175_vm9 = vcmp.eq.f32.partialorder %v174_v42, 8.507059e+37 }
  0x9d   :  { %v199_v21 = vadd.f32 %v943_v61, %v198_v13 }
  0x9e   :  { %v947_v14 = vpop.eup %946  ;;  %v184_v15 = vadd.f32 %v945_v2, %v183_v12 }
  0x9f   :  { %v949_v16 = vpop.eup %948  ;;  %v166_v18 = vmul.f32 %v947_v14, %v1127_v62  ;;  %v203_v31 = vsel %vm202_vm15, %v943_v61, %v199_v21  ;;  %vm171_vm6 = vweird.f32 %v947_v14 }
  0xa0   :  { %v188_v19 = vsel %vm187_vm11, %v945_v2, %v184_v15  ;;  %v151_v20 = vmul.f32 %v949_v16, %v146_v3  ;;  %vm156_vm1 = vweird.f32 %v949_v16  ;;  %v208_v35 = vsel %vm205_vm3, %v207_v33, %v203_v31  ;;  %vm172_vm8 = vmor %vm170_vm7, %vm171_vm6 }
  0xa1   :  { %v193_v22 = vsel %vm190_vm12, %v192_v17, %v188_v19  ;;  %v167_v24 = vsub.f32 1.0, %v166_v18  ;;  %vm157_vm4 = vmor %vm155_vm2, %vm156_vm1  ;;  %v209_v41 = vmul.f32 %v208_v35, %v1083_v0  ;;  %vm274_vm11 = vcmask 523264  }
  0xa2   :  { %v194_v25 = vmul.f32 %v193_v22, %v1088_v1  ;;  %v152_v26 = vsub.f32 1.0, %v151_v20  ;;  %v162_v1 = vor.u32 1.1754944e-38, %v161_v29 }
  0xa3   :  { %v168_v32 = vmul.f32 %v947_v14, %v167_v24 }
  0xa4   :  { %906 = vmatmul.msk.f32.vlgmr.msra.gmra.mxu3 %vm36_vm0, %v194_v25  ;;  %v153_v30 = vmul.f32 %v949_v16, %v152_v26 }
  0xa5   :  { %v169_v37 = vadd.f32 %v947_v14, %v168_v32 }
  0xa6   :  { %v154_v34 = vadd.f32 %v949_v16, %v153_v30 }
  0xa7   :  { %v173_v43 = vsel %vm172_vm8, %v947_v14, %v169_v37 }
  0xa8   :  { %v158_v36 = vsel %vm157_vm4, %v949_v16, %v154_v34  ;;  %v178_v45 = vsel %vm175_vm9, %v177_v44, %v173_v43  ;;  %v1041_v44 = vmov 64.0  }
  0xa9   :  { %v163_v38 = vsel %vm160_vm5, %v162_v1, %v158_v36  ;;  %v179_v46 = vmul.f32 %v178_v45, %v1097_v4 }
  0xaa   :  { %v164_v40 = vmul.f32 %v163_v38, %v1102_v5  ;;  %v1040_v5 = vmov 0.05  }
  0xab   :  { %950 = vrcp.f32 %v1040_v5 }
  0xac   :  { %904 = vmatmul.msk.f32.vlgmr.msra.gmra.mxu1 %vm36_vm0, %v164_v40  ;;  %907 = vmatmul.msk.f32.gmra.mxu3 %vm36_vm0, %v209_v41 }
  0xb1   :  { %v951_v0 = vpop.eup %950 }
  0xb2   :  { %v256_v47 = vmul.f32 0.05, %v951_v0  ;;  %vm260_vm10 = vweird.f32 %v951_v0 }
  0xb4   :  { %905 = vmatmul.msk.f32.gmra.mxu1 %vm36_vm0, %v179_v46  ;;  %v257_v48 = vsub.f32 1.0, %v256_v47 }
  0xb6   :  { %v258_v49 = vmul.f32 %v951_v0, %v257_v48 }
  0xb8   :  { %v259_v50 = vadd.f32 %v951_v0, %v258_v49 }
  0xba   :  { %v261_v53 = vsel %vm260_vm10, %v951_v0, %v259_v50 }
 0x127   :  { %v249_v51 = vpop.f32.mrf.mxu3 }
 0x128   :  { %v264_v55 = vmul.f32 %v261_v53, %v249_v51 }
 0x129   :  { %v243_v52 = vpop.f32.mrf.mxu1 }
 0x12a   :  { %v262_v54 = vmul.f32 %v261_v53, %v243_v52  ;;  %v270_v59 = vmul.f32 1.442695, %v264_v55 }
 0x12c   :  { %v266_v57 = vmul.f32 1.442695, %v262_v54 }
 0x12e   :  { %952 = vpow2.f32 %v266_v57 }
 0x12f   :  { %v252_v56 = vpop.f32.mrf.mxu3  ;;  %954 = vpow2.f32 %v270_v59 }
 0x130   :  { %v265_v58 = vmul.f32 %v261_v53, %v252_v56 }
 0x131   :  { %v246_v4 = vpop.f32.mrf.mxu1 }
 0x132   :  { %v263_v60 = vmul.f32 %v261_v53, %v246_v4  ;;  %v272_v61 = vmul.f32 1.442695, %v265_v58 }
 0x134   :  { %v268_v62 = vmul.f32 1.442695, %v263_v60  ;;  %v953_v63 = vpop.eup %952 }
 0x135   :  { %v955_v2 = vpop.eup %954  ;;  %v275_v6 = vsel %vm274_vm11, %v953_v63, 0.0 }
 0x136   :  { %956 = vpow2.f32 %v268_v62  ;;  %v278_v10 = vsel %vm274_vm11, %v955_v2, 0.0 }
 0x137   :  { %958 = vpow2.f32 %v272_v61 }
 0x13c   :  { %v957_v3 = vpop.eup %956 }
 0x13d   :  { %v276_v7 = vsel %vm274_vm11, %v957_v3, 0.0  ;;  %v959_v8 = vpop.eup %958 }
 0x13e   :  { %v277_v9 = vadd.f32 %v276_v7, %v275_v6  ;;  %v280_v12 = vsel %vm274_vm11, %v959_v8, 0.0 }
 0x140   :  { %v279_v11 = vadd.f32 %v278_v10, %v277_v9 }
 0x142   :  { %v281_v13 = vadd.f32 %v280_v12, %v279_v11 }
 0x144   :  { %282 = vadd.xlane.f32.xlu2 %v281_v13 }
 0x1b7   :  { %v283_v14 = vpop.xlane.xlu2 %282 }
 0x1b8   :  { %v284_v15 = vrot.slane %v283_v14, 4 }
 0x1ba   :  { %v285_v16 = vadd.f32 %v284_v15, %v283_v14  ;;  %v1042_v14 = vmov -32.0  }
 0x1bc   :  { %v286_v17 = vrot.slane %v285_v16, 2 }
 0x1be   :  { %v287_v18 = vadd.f32 %v286_v17, %v285_v16 }
 0x1c0   :  { %v288_v19 = vrot.slane %v287_v18, 1 }
 0x1c2   :  { %v289_v20 = vadd.f32 %v288_v19, %v287_v18 }
 0x1c4   :  { %920 = vpush %v289_v20 }
 0x1f5   :  { %s921_s4 = spop %920 }
 0x1f6   :  { %v291_v21 = vstv %s921_s4  ;;  %s889_s4 = sshll.u32 %s1044_s11, 4  ;;  %s890_s4 = int_to_ptr.vmem [resolvable:$true] %s889_s4 }
 0x1f7   :  { %960 = vrcp.f32 %v291_v21  ;;  %v303_v25 = vand.u32 2147483648, %v291_v21  ;;  %v301_v27 = vand.u32 2147483647, %v291_v21  ;;  %vm297_vm13 = vweird.f32 %v291_v21 }
 0x1f8   :  { %962 = vrcp.f32 %v1041_v44 }
 0x1f9   :  { %v304_v29 = vor.u32 1.1754944e-38, %v303_v25  ;;  %vm302_vm15 = vcmp.eq.f32.partialorder %v301_v27, 8.507059e+37 }
 0x1fd   :  { %v961_v22 = vpop.eup %960 }
 0x1fe   :  { %v293_v23 = vmul.f32 %v961_v22, %v291_v21  ;;  %vm298_vm12 = vweird.f32 %v961_v22  ;;  %v963_v0 = vpop.eup %962 }
 0x1ff   :  { %vm299_vm14 = vmor %vm297_vm13, %vm298_vm12  ;;  %v342_v48 = vmul.f32 64.0, %v963_v0  ;;  %vm346_vm3 = vweird.f32 %v963_v0 }
 0x200   :  { %v294_v24 = vsub.f32 1.0, %v293_v23 }
 0x201   :  { %v343_v49 = vsub.f32 1.0, %v342_v48 }
 0x202   :  { %v295_v26 = vmul.f32 %v961_v22, %v294_v24 }
 0x203   :  { %v344_v52 = vmul.f32 %v963_v0, %v343_v49 }
 0x204   :  { %v296_v28 = vadd.f32 %v961_v22, %v295_v26 }
 0x205   :  { %v345_v57 = vadd.f32 %v963_v0, %v344_v52 }
 0x206   :  { %v300_v30 = vsel %vm299_vm14, %v961_v22, %v296_v28 }
 0x207   :  { %v305_v31 = vsel %vm302_vm15, %v304_v29, %v300_v30  ;;  %v1154_v61 = vsel %vm346_vm3, %v963_v0, %v345_v57 }
 0x208   :  { %v306_v32 = vmul.f32 %v953_v63, %v305_v31  ;;  %v307_v33 = vmul.f32 %v957_v3, %v305_v31  ;;  %v308_v34 = vmul.f32 %v955_v2, %v305_v31  ;;  %v309_v1 = vmul.f32 %v959_v8, %v305_v31 }
 0x20a   :  { %v310_v35 = vsel %vm274_vm11, %v306_v32, 0.0  ;;  %v311_v36 = vsel %vm274_vm11, %v307_v33, 0.0  ;;  %v313_v38 = vsel %vm274_vm11, %v308_v34, 0.0  ;;  %v315_v40 = vsel %vm274_vm11, %v309_v1, 0.0 }
 0x20b   :  { %v312_v37 = vadd.f32 %v311_v36, %v310_v35 }
 0x20d   :  { %v314_v39 = vadd.f32 %v313_v38, %v312_v37 }
 0x20f   :  { %v316_v41 = vadd.f32 %v315_v40, %v314_v39 }
 0x211   :  { %v317_v42 = vrot.slane %v316_v41, 4 }
 0x213   :  { %v318_v43 = vadd.f32 %v317_v42, %v316_v41 }
 0x215   :  { %v319_v45 = vrot.slane %v318_v43, 2 }
 0x217   :  { %v320_v46 = vadd.f32 %v319_v45, %v318_v43 }
 0x219   :  { %v321_v5 = vrot.slane %v320_v46, 1 }
 0x21b   :  { %v322_v47 = vadd.f32 %v321_v5, %v320_v46 }
 0x21d   :  { %964 = vrcp.f32 %v322_v47  ;;  %v334_v54 = vand.u32 2147483648, %v322_v47  ;;  %v332_v56 = vand.u32 2147483647, %v322_v47  ;;  %vm328_vm2 = vweird.f32 %v322_v47 }
 0x21e   :  { %966 = vrcp.f32 %v1042_v14 }
 0x21f   :  { %v335_v59 = vor.u32 1.1754944e-38, %v334_v54  ;;  %vm333_vm5 = vcmp.eq.f32.partialorder %v332_v56, 8.507059e+37 }
 0x223   :  { %v965_v50 = vpop.eup %964 }
 0x224   :  { %v324_v51 = vmul.f32 %v965_v50, %v322_v47  ;;  %vm329_vm1 = vweird.f32 %v965_v50  ;;  %v967_v15 = vpop.eup %966 }
 0x225   :  { %vm330_vm4 = vmor %vm328_vm2, %vm329_vm1  ;;  %v425_v16 = vmul.f32 -32.0, %v967_v15  ;;  %vm429_vm6 = vweird.f32 %v967_v15 }
 0x226   :  { %v325_v53 = vsub.f32 1.0, %v324_v51 }
 0x227   :  { %v426_v17 = vsub.f32 1.0, %v425_v16 }
 0x228   :  { %v326_v55 = vmul.f32 %v965_v50, %v325_v53 }
 0x229   :  { %v427_v21 = vmul.f32 %v967_v15, %v426_v17 }
 0x22a   :  { %v327_v58 = vadd.f32 %v965_v50, %v326_v55 }
 0x22b   :  { %v428_v22 = vadd.f32 %v967_v15, %v427_v21 }
 0x22c   :  { %v331_v4 = vsel %vm330_vm4, %v965_v50, %v327_v58 }
 0x22d   :  { %v336_v60 = vsel %vm333_vm5, %v335_v59, %v331_v4  ;;  %v1176_v30 = vsel %vm429_vm6, %v967_v15, %v428_v22 }
 0x22e   :  { %v339_v62 = vmul.f32 %v336_v60, %v308_v34  ;;  %v338_v63 = vmul.f32 %v336_v60, %v307_v33  ;;  %v337_v2 = vmul.f32 %v336_v60, %v306_v32  ;;  %v340_v11 = vmul.f32 %v336_v60, %v309_v1 }
 0x230   :  { %v1157_v3 = vmul.f32 %v1154_v61, %v339_v62  ;;  %v1160_v6 = vmul.f32 %v1154_v61, %v338_v63  ;;  %v1163_v7 = vmul.f32 %v1154_v61, %v337_v2  ;;  %v1172_v12 = vmul.f32 %v1154_v61, %v340_v11 }
 0x232   :  { %v358_v8 = vsel %vm274_vm11, %v1157_v3, 0.0  ;;  %v355_v9 = vsel %vm274_vm11, %v1160_v6, 0.0  ;;  %v352_v10 = vsel %vm274_vm11, %v1163_v7, 0.0  ;;  %v361_v13 = vsel %vm274_vm11, %v1172_v12, 0.0 }
 0x233   :  { %359 = vadd.xlane.f32.xlu1 %v358_v8  ;;  %356 = vadd.xlane.f32.xlu0 %v355_v9 }
 0x234   :  { %353 = vadd.xlane.f32.xlu2 %v352_v10 }
 0x23c   :  { %362 = vadd.xlane.f32.xlu2 %v361_v13 }
 0x2a6   :  { %v360_v18 = vpop.xlane.xlu1 %359  ;;  %v357_v19 = vpop.xlane.xlu0 %356 }
 0x2a7   :  { %968 = vrcp.f32 %v360_v18  ;;  %v354_v20 = vpop.xlane.xlu2 %353  ;;  %vm399_vm7 = vweird.f32 %v360_v18  ;;  %v403_v32 = vand.u32 2147483647, %v360_v18  ;;  %v405_v33 = vand.u32 2147483648, %v360_v18 }
 0x2a8   :  { %970 = vrcp.f32 %v357_v19  ;;  %v390_v35 = vand.u32 2147483648, %v357_v19  ;;  %v388_v38 = vand.u32 2147483647, %v357_v19  ;;  %v375_v39 = vand.u32 2147483648, %v354_v20 }
 0x2a9   :  { %972 = vrcp.f32 %v354_v20  ;;  %v373_v42 = vand.u32 2147483647, %v354_v20  ;;  %vm1183_vm13 = vcmp.eq.f32.partialorder %v403_v32, 8.507059e+37  ;;  %v406_v45 = vor.u32 1.1754944e-38, %v405_v33 }
 0x2aa   :  { %vm384_vm14 = vweird.f32 %v357_v19  ;;  %v391_v0 = vor.u32 1.1754944e-38, %v390_v35  ;;  %vm369_vm1 = vweird.f32 %v354_v20  ;;  %vm389_vm2 = vcmp.eq.f32.partialorder %v388_v38, 8.507059e+37 }
 0x2ab   :  { %v376_v50 = vor.u32 1.1754944e-38, %v375_v39  ;;  %vm374_vm4 = vcmp.eq.f32.partialorder %v373_v42, 8.507059e+37 }
 0x2ad   :  { %v969_v23 = vpop.eup %968 }
 0x2ae   :  { %v971_v24 = vpop.eup %970  ;;  %v395_v25 = vmul.f32 %v969_v23, %v360_v18  ;;  %vm400_vm8 = vweird.f32 %v969_v23 }
 0x2af   :  { %v973_v26 = vpop.eup %972  ;;  %v380_v27 = vmul.f32 %v971_v24, %v357_v19  ;;  %v363_v28 = vpop.xlane.xlu2 %362  ;;  %vm385_vm9 = vweird.f32 %v971_v24  ;;  %vm1179_vm12 = vmor %vm399_vm7, %vm400_vm8 }
 0x2b0   :  { %v396_v29 = vsub.f32 1.0, %v395_v25  ;;  %v365_v31 = vmul.f32 %v973_v26, %v354_v20  ;;  %974 = vrcp.f32 %v363_v28  ;;  %vm370_vm10 = vweird.f32 %v973_v26  ;;  %vm386_vm15 = vmor %vm384_vm14, %vm385_vm9 }
 0x2b1   :  { %v381_v34 = vsub.f32 1.0, %v380_v27  ;;  %vm371_vm3 = vmor %vm369_vm1, %vm370_vm10  ;;  %v418_v59 = vand.u32 2147483647, %v363_v28  ;;  %v420_v4 = vand.u32 2147483648, %v363_v28  ;;  %vm414_vm6 = vweird.f32 %v363_v28 }
 0x2b2   :  { %v397_v1 = vmul.f32 %v969_v23, %v396_v29  ;;  %v366_v36 = vsub.f32 1.0, %v365_v31 }
 0x2b3   :  { %v382_v37 = vmul.f32 %v971_v24, %v381_v34  ;;  %vm419_vm8 = vcmp.eq.f32.partialorder %v418_v59, 8.507059e+37 }
 0x2b4   :  { %v398_v40 = vadd.f32 %v969_v23, %v397_v1  ;;  %v367_v41 = vmul.f32 %v973_v26, %v366_v36 }
 0x2b5   :  { %v383_v46 = vadd.f32 %v971_v24, %v382_v37 }
 0x2b6   :  { %v975_v5 = vpop.eup %974  ;;  %v368_v47 = vadd.f32 %v973_v26, %v367_v41  ;;  %v402_v48 = vsel %vm1179_vm12, %v969_v23, %v398_v40 }
 0x2b7   :  { %v387_v49 = vsel %vm386_vm15, %v971_v24, %v383_v46  ;;  %v410_v51 = vmul.f32 %v975_v5, %v363_v28  ;;  %v407_v54 = vsel %vm1183_vm13, %v406_v45, %v402_v48  ;;  %vm415_vm5 = vweird.f32 %v975_v5 }
 0x2b8   :  { %v392_v52 = vsel %vm389_vm2, %v391_v0, %v387_v49  ;;  %v372_v53 = vsel %vm371_vm3, %v973_v26, %v368_v47  ;;  %v408_v63 = vmul.f32 %v407_v54, %v1157_v3  ;;  %vm416_vm7 = vmor %vm414_vm6, %vm415_vm5 }
 0x2b9   :  { %v393_v55 = vmul.f32 %v392_v52, %v1160_v6  ;;  %v377_v56 = vsel %vm374_vm4, %v376_v50, %v372_v53  ;;  %v411_v57 = vsub.f32 1.0, %v410_v51  ;;  %v421_v6 = vor.u32 1.1754944e-38, %v420_v4 }
 0x2ba   :  { %v378_v58 = vmul.f32 %v377_v56, %v1163_v7  ;;  %v433_v7 = vmul.f32 %v1176_v30, %v408_v63 }
 0x2bb   :  { %v432_v60 = vmul.f32 %v1176_v30, %v393_v55  ;;  %v412_v62 = vmul.f32 %v975_v5, %v411_v57 }
 0x2bc   :  { %v431_v2 = vmul.f32 %v1176_v30, %v378_v58  ;;  %v438_v16 = vsel %vm274_vm11, %v433_v7, 0.0 }
 0x2bd   :  { %v413_v8 = vadd.f32 %v975_v5, %v412_v62  ;;  %v436_v9 = vsel %vm274_vm11, %v432_v60, 0.0 }
 0x2be   :  { %v435_v10 = vsel %vm274_vm11, %v431_v2, 0.0 }
 0x2bf   :  { %v417_v11 = vsel %vm416_vm7, %v975_v5, %v413_v8  ;;  %v437_v14 = vadd.f32 %v436_v9, %v435_v10 }
 0x2c0   :  { %v422_v13 = vsel %vm419_vm8, %v421_v6, %v417_v11 }
 0x2c1   :  { %v423_v15 = vmul.f32 %v422_v13, %v1172_v12  ;;  %v439_v17 = vadd.f32 %v438_v16, %v437_v14 }
 0x2c3   :  { %v434_v3 = vmul.f32 %v1176_v30, %v423_v15 }
 0x2c5   :  { %v440_v18 = vsel %vm274_vm11, %v434_v3, 0.0 }
 0x2c6   :  { %v441_v19 = vadd.f32 %v440_v18, %v439_v17 }
 0x2c8   :  { %v442_v20 = vrot.slane %v441_v19, 4 }
 0x2ca   :  { %v443_v21 = vadd.f32 %v442_v20, %v441_v19 }
 0x2cc   :  { %v444_v22 = vrot.slane %v443_v21, 2 }
 0x2ce   :  { %v445_v23 = vadd.f32 %v444_v22, %v443_v21 }
 0x2d0   :  { %v446_v24 = vrot.slane %v445_v23, 1 }
 0x2d2   :  { %v447_v25 = vadd.f32 %v446_v24, %v445_v23 }
 0x2d4   :  { %976 = vrcp.f32 %v447_v25  ;;  %v459_v29 = vand.u32 2147483648, %v447_v25  ;;  %v457_v31 = vand.u32 2147483647, %v447_v25  ;;  %vm453_vm10 = vweird.f32 %v447_v25 }
 0x2d6   :  { %v460_v33 = vor.u32 1.1754944e-38, %v459_v29  ;;  %vm458_vm13 = vcmp.eq.f32.partialorder %v457_v31, 8.507059e+37 }
 0x2da   :  { %v977_v26 = vpop.eup %976 }
 0x2db   :  { %v449_v27 = vmul.f32 %v977_v26, %v447_v25  ;;  %vm454_vm9 = vweird.f32 %v977_v26 }
 0x2dc   :  { %vm455_vm12 = vmor %vm453_vm10, %vm454_vm9 }
 0x2dd   :  { %v450_v28 = vsub.f32 1.0, %v449_v27 }
 0x2df   :  { %v451_v12 = vmul.f32 %v977_v26, %v450_v28 }
 0x2e1   :  { %v452_v32 = vadd.f32 %v977_v26, %v451_v12 }
 0x2e3   :  { %v456_v34 = vsel %vm455_vm12, %v977_v26, %v452_v32 }
 0x2e4   :  { %v461_v1 = vsel %vm458_vm13, %v460_v33, %v456_v34 }
 0x2e5   :  { %v464_v35 = vmul.f32 %v461_v1, %v433_v7  ;;  %v463_v36 = vmul.f32 %v461_v1, %v432_v60  ;;  %v462_v37 = vmul.f32 %v461_v1, %v431_v2  ;;  %v465_v44 = vmul.f32 %v461_v1, %v434_v3 }
 0x2e7   :  { %v1205_v38 = vmul.f32 %v464_v35, %v1154_v61  ;;  %v1208_v39 = vmul.f32 %v463_v36, %v1154_v61  ;;  %v1211_v40 = vmul.f32 %v462_v37, %v1154_v61  ;;  %v1220_v45 = vmul.f32 %v465_v44, %v1154_v61 }
 0x2e9   :  { %v476_v41 = vsel %vm274_vm11, %v1205_v38, 0.0  ;;  %v473_v42 = vsel %vm274_vm11, %v1208_v39, 0.0  ;;  %v470_v43 = vsel %vm274_vm11, %v1211_v40, 0.0  ;;  %v479_v46 = vsel %vm274_vm11, %v1220_v45, 0.0 }
 0x2ea   :  { %477 = vadd.xlane.f32.xlu2 %v476_v41  ;;  %474 = vadd.xlane.f32.xlu1 %v473_v42 }
 0x2eb   :  { %471 = vadd.xlane.f32.xlu0 %v470_v43 }
 0x2f3   :  { %480 = vadd.xlane.f32.xlu0 %v479_v46 }
 0x35d   :  { %v478_v5 = vpop.xlane.xlu2 %477  ;;  %v475_v0 = vpop.xlane.xlu1 %474 }
 0x35e   :  { %978 = vrcp.f32 %v478_v5  ;;  %v472_v47 = vpop.xlane.xlu0 %471  ;;  %vm517_vm14 = vweird.f32 %v478_v5  ;;  %v521_v56 = vand.u32 2147483647, %v478_v5  ;;  %v523_v57 = vand.u32 2147483648, %v478_v5 }
 0x35f   :  { %980 = vrcp.f32 %v475_v0  ;;  %v508_v4 = vand.u32 2147483648, %v475_v0  ;;  %v506_v63 = vand.u32 2147483647, %v475_v0  ;;  %v493_v2 = vand.u32 2147483648, %v472_v47 }
 0x360   :  { %982 = vrcp.f32 %v472_v47  ;;  %v491_v6 = vand.u32 2147483647, %v472_v47  ;;  %vm1229_vm4 = vcmp.eq.f32.partialorder %v521_v56, 8.507059e+37  ;;  %v524_v7 = vor.u32 1.1754944e-38, %v523_v57 }
 0x361   :  { %vm502_vm5 = vweird.f32 %v475_v0  ;;  %v509_v15 = vor.u32 1.1754944e-38, %v508_v4  ;;  %vm487_vm7 = vweird.f32 %v472_v47  ;;  %vm507_vm8 = vcmp.eq.f32.partialorder %v506_v63, 8.507059e+37 }
 0x362   :  { %v494_v18 = vor.u32 1.1754944e-38, %v493_v2  ;;  %vm492_vm10 = vcmp.eq.f32.partialorder %v491_v6, 8.507059e+37 }
 0x364   :  { %v979_v48 = vpop.eup %978 }
 0x365   :  { %v981_v49 = vpop.eup %980  ;;  %v513_v50 = vmul.f32 %v979_v48, %v478_v5  ;;  %vm518_vm15 = vweird.f32 %v979_v48 }
 0x366   :  { %v983_v51 = vpop.eup %982  ;;  %v498_v52 = vmul.f32 %v981_v49, %v475_v0  ;;  %v481_v53 = vpop.xlane.xlu0 %480  ;;  %vm503_vm1 = vweird.f32 %v981_v49  ;;  %vm1225_vm3 = vmor %vm517_vm14, %vm518_vm15 }
 0x367   :  { %v514_v54 = vsub.f32 1.0, %v513_v50  ;;  %v483_v55 = vmul.f32 %v983_v51, %v472_v47  ;;  %984 = vrcp.f32 %v481_v53  ;;  %vm488_vm2 = vweird.f32 %v983_v51  ;;  %vm504_vm6 = vmor %vm502_vm5, %vm503_vm1 }
 0x368   :  { %v499_v58 = vsub.f32 1.0, %v498_v52  ;;  %vm489_vm9 = vmor %vm487_vm7, %vm488_vm2  ;;  %v536_v27 = vand.u32 2147483647, %v481_v53  ;;  %v538_v28 = vand.u32 2147483648, %v481_v53  ;;  %vm532_vm13 = vweird.f32 %v481_v53 }
 0x369   :  { %v515_v59 = vmul.f32 %v979_v48, %v514_v54  ;;  %v484_v60 = vsub.f32 1.0, %v483_v55 }
 0x36a   :  { %v500_v62 = vmul.f32 %v981_v49, %v499_v58  ;;  %v539_v1 = vor.u32 1.1754944e-38, %v538_v28  ;;  %vm537_vm15 = vcmp.eq.f32.partialorder %v536_v27, 8.507059e+37 }
 0x36b   :  { %v516_v8 = vadd.f32 %v979_v48, %v515_v59  ;;  %v485_v9 = vmul.f32 %v983_v51, %v484_v60 }
 0x36c   :  { %v501_v13 = vadd.f32 %v981_v49, %v500_v62 }
 0x36d   :  { %v985_v14 = vpop.eup %984  ;;  %v486_v3 = vadd.f32 %v983_v51, %v485_v9  ;;  %v520_v16 = vsel %vm1225_vm3, %v979_v48, %v516_v8 }
 0x36e   :  { %v505_v17 = vsel %vm504_vm6, %v981_v49, %v501_v13  ;;  %v528_v19 = vmul.f32 %v985_v14, %v481_v53  ;;  %v525_v22 = vsel %vm1229_vm4, %v524_v7, %v520_v16  ;;  %vm533_vm12 = vweird.f32 %v985_v14  ;;  %v24_v16 = vld [vmem:[%s1412_s0] sm:$0xff] }
 0x36f   :  { %v510_v20 = vsel %vm507_vm8, %v509_v15, %v505_v17  ;;  %v490_v21 = vsel %vm489_vm9, %v983_v51, %v486_v3  ;;  %v526_v31 = vmul.f32 %v525_v22, %v1205_v38  ;;  %vm534_vm14 = vmor %vm532_vm13, %vm533_vm12  ;;  %v30_v15 = vld [vmem:[%s1413_s1 + $0x10] sm:$0xff]  ;;  %v28_v3 = vld [vmem:[%s1413_s1] sm:$0xff] }
 0x370   :  { %v511_v23 = vmul.f32 %v510_v20, %v1208_v39  ;;  %v495_v24 = vsel %vm492_vm10, %v494_v18, %v490_v21  ;;  %v529_v25 = vsub.f32 1.0, %v528_v19  ;;  %v26_v17 = vld [vmem:[%s1412_s0 + $0x10] sm:$0xff]  ;;  %v25_v18 = vld [vmem:[%s1412_s0 + $0x8] sm:$0xff]  ;;  %v27_v19 = vld [vmem:[%s1412_s0 + $0x18] sm:$0xff] }
 0x371   :  { %v496_v26 = vmul.f32 %v495_v24, %v1211_v40  ;;  %v544_v37 = vmul.f32 %v526_v31, %v1176_v30 }
 0x372   :  { %v543_v29 = vmul.f32 %v511_v23, %v1176_v30  ;;  %v530_v12 = vmul.f32 %v985_v14, %v529_v25 }
 0x373   :  { %v542_v32 = vmul.f32 %v496_v26, %v1176_v30  ;;  %v549_v42 = vsel %vm274_vm11, %v544_v37, 0.0 }
 0x374   :  { %v531_v33 = vadd.f32 %v985_v14, %v530_v12  ;;  %v547_v34 = vsel %vm274_vm11, %v543_v29, 0.0 }
 0x375   :  { %v546_v35 = vsel %vm274_vm11, %v542_v32, 0.0 }
 0x376   :  { %v535_v36 = vsel %vm534_vm14, %v985_v14, %v531_v33  ;;  %v548_v40 = vadd.f32 %v547_v34, %v546_v35  ;;  %v31_v14 = vld [vmem:[%s1413_s1 + $0x18] sm:$0xff] }
 0x377   :  { %v540_v39 = vsel %vm537_vm15, %v539_v1, %v535_v36  ;;  %61 = vmatpush.msra.mxu0 %v31_v14  ;;  %912 = vmatpush.msra.mxu2 %v31_v14 }
 0x378   :  { %v541_v41 = vmul.f32 %v540_v39, %v1220_v45  ;;  %v550_v43 = vadd.f32 %v549_v42, %v548_v40 }
 0x379   :  { %62 = vmatpush.msra.mxu0 %v30_v15  ;;  %913 = vmatpush.msra.mxu2 %v30_v15 }
 0x37a   :  { %v545_v38 = vmul.f32 %v541_v41, %v1176_v30 }
 0x37c   :  { %v551_v44 = vsel %vm274_vm11, %v545_v38, 0.0 }
 0x37d   :  { %v552_v46 = vadd.f32 %v551_v44, %v550_v43 }
 0x37f   :  { %v553_v5 = vrot.slane %v552_v46, 4 }
 0x381   :  { %v554_v0 = vadd.f32 %v553_v5, %v552_v46 }
 0x383   :  { %v555_v47 = vrot.slane %v554_v0, 2 }
 0x385   :  { %v556_v48 = vadd.f32 %v555_v47, %v554_v0 }
 0x387   :  { %v557_v49 = vrot.slane %v556_v48, 1 }
 0x389   :  { %v558_v50 = vadd.f32 %v557_v49, %v556_v48 }
 0x38b   :  { %986 = vrcp.f32 %v558_v50  ;;  %v570_v54 = vand.u32 2147483648, %v558_v50  ;;  %v568_v55 = vand.u32 2147483647, %v558_v50  ;;  %vm564_vm2 = vweird.f32 %v558_v50 }
 0x38d   :  { %v571_v57 = vor.u32 1.1754944e-38, %v570_v54  ;;  %vm569_vm4 = vcmp.eq.f32.partialorder %v568_v55, 8.507059e+37 }
 0x391   :  { %v987_v51 = vpop.eup %986 }
 0x392   :  { %v560_v52 = vmul.f32 %v987_v51, %v558_v50  ;;  %vm565_vm1 = vweird.f32 %v987_v51 }
 0x393   :  { %vm566_vm3 = vmor %vm564_vm2, %vm565_vm1 }
 0x394   :  { %v561_v53 = vsub.f32 1.0, %v560_v52 }
 0x396   :  { %v562_v45 = vmul.f32 %v987_v51, %v561_v53 }
 0x398   :  { %v563_v56 = vadd.f32 %v987_v51, %v562_v45 }
 0x39a   :  { %v567_v58 = vsel %vm566_vm3, %v987_v51, %v563_v56 }
 0x39b   :  { %v572_v59 = vsel %vm569_vm4, %v571_v57, %v567_v58 }
 0x39c   :  { %v575_v4 = vmul.f32 %v572_v59, %v544_v37  ;;  %v574_v60 = vmul.f32 %v572_v59, %v543_v29  ;;  %v573_v62 = vmul.f32 %v572_v59, %v542_v32  ;;  %v576_v11 = vmul.f32 %v572_v59, %v545_v38 }
 0x39e   :  { %v1251_v63 = vmul.f32 %v575_v4, %v1154_v61  ;;  %v1254_v2 = vmul.f32 %v574_v60, %v1154_v61  ;;  %v1257_v8 = vmul.f32 %v573_v62, %v1154_v61  ;;  %v1266_v7 = vmul.f32 %v576_v11, %v1154_v61  ;;  %v29_v61 = vld [vmem:[%s1413_s1 + $0x8] sm:$0xff] }
 0x39f   :  { %63 = vmatpush.msra.mxu0 %v29_v61  ;;  %914 = vmatpush.msra.mxu2 %v29_v61 }
 0x3a0   :  { %v587_v9 = vsel %vm274_vm11, %v1251_v63, 0.0  ;;  %v584_v6 = vsel %vm274_vm11, %v1254_v2, 0.0  ;;  %v581_v10 = vsel %vm274_vm11, %v1257_v8, 0.0  ;;  %v590_v13 = vsel %vm274_vm11, %v1266_v7, 0.0 }
 0x3a1   :  { %588 = vadd.xlane.f32.xlu0 %v587_v9  ;;  %585 = vadd.xlane.f32.xlu2 %v584_v6 }
 0x3a2   :  { %582 = vadd.xlane.f32.xlu1 %v581_v10  ;;  %64 = vmatpush.msra.mxu0 %v28_v3 }
 0x3a3   :  { %915 = vmatpush.msra.mxu2 %v28_v3  ;;  %900 = vmatmul.msk.f32.vlgmr.msra.gmra.mxu0 %vm36_vm0, %v24_v16 }
 0x3a4   :  { %902 = vmatmul.msk.f32.vlgmr.msra.gmra.mxu2 %vm36_vm0, %v26_v17 }
 0x3aa   :  { %591 = vadd.xlane.f32.xlu1 %v590_v13 }
 0x3ab   :  { %901 = vmatmul.msk.f32.gmra.mxu0 %vm36_vm0, %v25_v18 }
 0x3ac   :  { %903 = vmatmul.msk.f32.gmra.mxu2 %vm36_vm0, %v27_v19  ;;  %v677_v19 = vlaneseq }
 0x414   :  { %v589_v20 = vpop.xlane.xlu0 %588  ;;  %v586_v21 = vpop.xlane.xlu2 %585 }
 0x415   :  { %988 = vrcp.f32 %v589_v20  ;;  %v583_v22 = vpop.xlane.xlu1 %582  ;;  %vm628_vm5 = vweird.f32 %v589_v20  ;;  %v632_v31 = vand.u32 2147483647, %v589_v20  ;;  %v634_v32 = vand.u32 2147483648, %v589_v20 }
 0x416   :  { %990 = vrcp.f32 %v586_v21  ;;  %v619_v34 = vand.u32 2147483648, %v586_v21  ;;  %v617_v35 = vand.u32 2147483647, %v586_v21  ;;  %vm613_vm6 = vweird.f32 %v586_v21 }
 0x417   :  { %992 = vrcp.f32 %v583_v22  ;;  %v604_v39 = vand.u32 2147483648, %v583_v22  ;;  %v602_v41 = vand.u32 2147483647, %v583_v22  ;;  %v635_v43 = vor.u32 1.1754944e-38, %v634_v32 }
 0x418   :  { %v620_v44 = vor.u32 1.1754944e-38, %v619_v34  ;;  %vm598_vm10 = vweird.f32 %v583_v22  ;;  %vm618_vm13 = vcmp.eq.f32.partialorder %v617_v35, 8.507059e+37  ;;  %vm633_vm14 = vcmp.eq.f32.partialorder %v632_v31, 8.507059e+37 }
 0x419   :  { %v605_v48 = vor.u32 1.1754944e-38, %v604_v39  ;;  %vm603_vm1 = vcmp.eq.f32.partialorder %v602_v41, 8.507059e+37 }
 0x41b   :  { %v989_v23 = vpop.eup %988 }
 0x41c   :  { %v991_v24 = vpop.eup %990  ;;  %v624_v25 = vmul.f32 %v989_v23, %v589_v20  ;;  %vm629_vm0 = vweird.f32 %v989_v23 }
 0x41d   :  { %v993_v26 = vpop.eup %992  ;;  %v609_v27 = vmul.f32 %v991_v24, %v586_v21  ;;  %v1298_v28 = vpop.xlane.xlu1 %591  ;;  %vm614_vm7 = vweird.f32 %v991_v24  ;;  %vm1302_vm9 = vmor %vm628_vm5, %vm629_vm0  ;;  %v1324_v21 = vand.u32 127, %v677_v19 }
 0x41e   :  { %v625_v29 = vsub.f32 1.0, %v624_v25  ;;  %v594_v12 = vmul.f32 %v993_v26, %v583_v22  ;;  %994 = vrcp.f32 %v1298_v28  ;;  %vm599_vm8 = vweird.f32 %v993_v26  ;;  %vm615_vm12 = vmor %vm613_vm6, %vm614_vm7 }
 0x41f   :  { %v610_v33 = vsub.f32 1.0, %v609_v27  ;;  %vm600_vm15 = vmor %vm598_vm10, %vm599_vm8  ;;  %v649_v57 = vand.u32 2147483648, %v1298_v28  ;;  %v647_v60 = vand.u32 2147483647, %v1298_v28  ;;  %vm643_vm3 = vweird.f32 %v1298_v28 }
 0x420   :  { %v626_v1 = vmul.f32 %v989_v23, %v625_v29  ;;  %v595_v36 = vsub.f32 1.0, %v594_v12  ;;  %v66_v20 = vpop.f32.mrf.mxu0  ;;  %v933_v12 = vld [vmem:[%s1414_s2] ss:$0 sm:$0xff] }
 0x421   :  { %v611_v37 = vmul.f32 %v991_v24, %v610_v33  ;;  %v650_v10 = vor.u32 1.1754944e-38, %v649_v57  ;;  %vm648_vm5 = vcmp.eq.f32.partialorder %v647_v60, 8.507059e+37  ;;  %v1337_v39 = vadd.f32 %v933_v12, %v66_v20 }
 0x422   :  { %v596_v40 = vmul.f32 %v993_v26, %v595_v36  ;;  %v627_v38 = vadd.f32 %v989_v23, %v626_v1 }
 0x423   :  { %v612_v46 = vadd.f32 %v991_v24, %v611_v37 }
 0x424   :  { %v995_v5 = vpop.eup %994  ;;  %v631_v0 = vsel %vm1302_vm9, %v989_v23, %v627_v38  ;;  %v597_v47 = vadd.f32 %v993_v26, %v596_v40 }
 0x425   :  { %v639_v49 = vmul.f32 %v995_v5, %v1298_v28  ;;  %v616_v50 = vsel %vm615_vm12, %v991_v24, %v612_v46  ;;  %v636_v51 = vsel %vm633_vm14, %v635_v43, %v631_v0  ;;  %vm644_vm2 = vweird.f32 %v995_v5 }
 0x426   :  { %v621_v52 = vsel %vm618_vm13, %v620_v44, %v616_v50  ;;  %v637_v53 = vmul.f32 %v636_v51, %v1251_v63  ;;  %v601_v54 = vsel %vm600_vm15, %v993_v26, %v597_v47  ;;  %vm645_vm4 = vmor %vm643_vm3, %vm644_vm2  ;;  %v775_v44 = vsel %vm274_vm11, %v1337_v39, -inf }
 0x427   :  { %v640_v45 = vsub.f32 1.0, %v639_v49  ;;  %v622_v55 = vmul.f32 %v621_v52, %v1254_v2  ;;  %v606_v56 = vsel %vm603_vm1, %v605_v48, %v601_v54  ;;  %v72_v32 = vpop.f32.mrf.mxu2  ;;  %vm831_vm3 = vcmask 7168  }
 0x428   :  { %v655_v58 = vmul.f32 %v637_v53, %v1176_v30  ;;  %v607_v59 = vmul.f32 %v606_v56, %v1257_v8  ;;  %v69_v1 = vpop.f32.mrf.mxu0  ;;  %v1347_v47 = vadd.f32 %v933_v12, %v72_v32 }
 0x429   :  { %v641_v4 = vmul.f32 %v995_v5, %v640_v45  ;;  %v654_v62 = vmul.f32 %v622_v55, %v1176_v30  ;;  %v1335_v37 = vadd.f32 %v933_v12, %v69_v1 }
 0x42a   :  { %v659_v9 = vmul.f32 -32.0, %v655_v58  ;;  %v653_v63 = vmul.f32 %v607_v59, %v1176_v30  ;;  %v781_v49 = vsel %vm274_vm11, %v1347_v47, -inf }
 0x42b   :  { %v658_v6 = vmul.f32 -32.0, %v654_v62  ;;  %v642_v2 = vadd.f32 %v995_v5, %v641_v4  ;;  %v778_v42 = vsel %vm274_vm11, %v1335_v37, -inf }
 0x42c   :  { %v671_v11 = vsel %vm274_vm11, %v659_v9, -inf  ;;  %v657_v13 = vmul.f32 -32.0, %v653_v63 }
 0x42d   :  { %v668_v8 = vsel %vm274_vm11, %v658_v6, -inf  ;;  %672 = vmax.xlane.f32.xlu1 %v671_v11  ;;  %v646_v14 = vsel %vm645_vm4, %v995_v5, %v642_v2 }
 0x42e   :  { %669 = vmax.xlane.f32.xlu0 %v668_v8  ;;  %v665_v15 = vsel %vm274_vm11, %v657_v13, -inf  ;;  %v651_v61 = vsel %vm648_vm5, %v650_v10, %v646_v14 }
 0x42f   :  { %666 = vmax.xlane.f32.xlu2 %v665_v15  ;;  %v652_v3 = vmul.f32 %v651_v61, %v1266_v7  ;;  %v75_v46 = vpop.f32.mrf.mxu2 }
 0x430   :  { %v1345_v0 = vadd.f32 %v933_v12, %v75_v46 }
 0x431   :  { %v656_v16 = vmul.f32 %v652_v3, %v1176_v30 }
 0x432   :  { %v784_v48 = vsel %vm274_vm11, %v1345_v0, -inf }
 0x433   :  { %v660_v17 = vmul.f32 -32.0, %v656_v16 }
 0x435   :  { %v674_v18 = vsel %vm274_vm11, %v660_v17, -inf }
 0x437   :  { %675 = vmax.xlane.f32.xlu2 %v674_v18 }
 0x4a0   :  { %v673_v22 = vpop.xlane.xlu1 %672 }
 0x4a1   :  { %v670_v23 = vpop.xlane.xlu0 %669  ;;  %vm681_vm0 = vcmp.eq.f32.partialorder %v659_v9, %v673_v22 }
 0x4a2   :  { %vm680_vm6 = vcmp.eq.f32.partialorder %v658_v6, %v670_v23  ;;  %v667_v24 = vpop.xlane.xlu2 %666  ;;  %v685_v25 = vsel %vm681_vm0, %v1324_v21, 64 }
 0x4a3   :  { %v684_v26 = vsel %vm680_vm6, %v1324_v21, 64  ;;  %vm679_vm7 = vcmp.eq.f32.partialorder %v657_v13, %v667_v24  ;;  %v717_v30 = vsel %vm274_vm11, %v685_v25, 2147483647  ;;  %vm882_vm6 = vcmask 0  }
 0x4a4   :  { %v702_v7 = vsel %vm274_vm11, %v684_v26, 2147483647  ;;  %v683_v27 = vsel %vm679_vm7, %v1324_v21, 64  ;;  %v719_v28 = vshra.s32 %v717_v30, 16  ;;  %v718_v50 = vand.u32 65535, %v717_v30 }
 0x4a5   :  { %v687_v29 = vsel %vm274_vm11, %v683_v27, 2147483647  ;;  %v704_v31 = vshra.s32 %v702_v7, 16  ;;  %v703_v51 = vand.u32 65535, %v702_v7 }
 0x4a6   :  { %v689_v33 = vshra.s32 %v687_v29, 16  ;;  %v721_v34 = vcvt.s32.f32 %v719_v28  ;;  %v688_v52 = vand.u32 65535, %v687_v29  ;;  %v720_v54 = vcvt.s32.f32 %v718_v50 }
 0x4a7   :  { %v706_v35 = vcvt.s32.f32 %v704_v31  ;;  %v705_v55 = vcvt.s32.f32 %v703_v51 }
 0x4a8   :  { %v691_v36 = vcvt.s32.f32 %v689_v33  ;;  %722 = vmin.xlane.f32.xlu2 %v721_v34  ;;  %v690_v57 = vcvt.s32.f32 %v688_v52 }
 0x4a9   :  { %707 = vmin.xlane.f32.xlu1 %v706_v35 }
 0x4aa   :  { %692 = vmin.xlane.f32.xlu0 %v691_v36  ;;  %v676_v40 = vpop.xlane.xlu2 %675 }
 0x4ab   :  { %vm682_vm8 = vcmp.eq.f32.partialorder %v660_v17, %v676_v40 }
 0x4ac   :  { %v686_v41 = vsel %vm682_vm8, %v1324_v21, 64 }
 0x4ad   :  { %v732_v38 = vsel %vm274_vm11, %v686_v41, 2147483647 }
 0x4ae   :  { %v734_v43 = vshra.s32 %v732_v38, 16  ;;  %v733_v60 = vand.u32 65535, %v732_v38  ;;  %v1043_v38 = vmov 0.0  }
 0x4b0   :  { %v736_v5 = vcvt.s32.f32 %v734_v43  ;;  %779 = vmax.xlane.f32.xlu2 %v778_v42  ;;  %v735_v10 = vcvt.s32.f32 %v733_v60 }
 0x4b1   :  { %776 = vmax.xlane.f32.xlu1 %v775_v44 }
 0x4b2   :  { %737 = vmin.xlane.f32.xlu0 %v736_v5 }
 0x4b9   :  { %785 = vmax.xlane.f32.xlu1 %v784_v48 }
 0x4ba   :  { %782 = vmax.xlane.f32.xlu0 %v781_v49 }
 0x51b   :  { %v723_v53 = vpop.xlane.xlu2 %722 }
 0x51c   :  { %v708_v45 = vpop.xlane.xlu1 %707  ;;  %vm724_vm9 = vcmp.eq.f32.partialorder %v721_v34, %v723_v53  ;;  %v729_v30 = vcvt.f32.s32 %v723_v53 }
 0x51d   :  { %v693_v56 = vpop.xlane.xlu0 %692  ;;  %vm709_vm10 = vcmp.eq.f32.partialorder %v706_v35, %v708_v45  ;;  %v725_v58 = vsel %vm724_vm9, %v720_v54, inf  ;;  %v714_v7 = vcvt.f32.s32 %v708_v45 }
 0x51e   :  { %v710_v59 = vsel %vm709_vm10, %v705_v55, inf  ;;  %vm694_vm12 = vcmp.eq.f32.partialorder %v691_v36, %v693_v56  ;;  %726 = vmin.xlane.f32.xlu1 %v725_v58  ;;  %v699_v27 = vcvt.f32.s32 %v693_v56  ;;  %v730_v29 = vshll.u32 %v729_v30, 16  ;;  %v661_v58 = vld [vmem:[%s1417_s5] sm:$0xff] }
 0x51f   :  { %711 = vmin.xlane.f32.xlu0 %v710_v59  ;;  %v695_v4 = vsel %vm694_vm12, %v690_v57, inf  ;;  %v715_v32 = vshll.u32 %v714_v7, 16  ;;  %v848_v59 = vsel %vm831_vm3, %v661_v58, 0.0 }
 0x520   :  { %696 = vmin.xlane.f32.xlu2 %v695_v4  ;;  %v700_v1 = vshll.u32 %v699_v27, 16 }
 0x523   :  { %v1353_v62 = vpop.xlane.xlu2 %779 }
 0x524   :  { %v788_v9 = vsub.f32 %v1335_v37, %v1353_v62  ;;  %v1357_v63 = vpop.xlane.xlu1 %776 }
 0x525   :  { %v738_v6 = vpop.xlane.xlu0 %737  ;;  %v787_v2 = vsub.f32 %v1337_v39, %v1357_v63 }
 0x526   :  { %v793_v11 = vmul.f32 1.442695, %v788_v9  ;;  %vm739_vm13 = vcmp.eq.f32.partialorder %v736_v5, %v738_v6  ;;  %v744_v43 = vcvt.f32.s32 %v738_v6 }
 0x527   :  { %v791_v13 = vmul.f32 1.442695, %v787_v2  ;;  %v740_v8 = vsel %vm739_vm13, %v735_v10, inf }
 0x528   :  { %996 = vpow2.f32 %v793_v11  ;;  %741 = vmin.xlane.f32.xlu2 %v740_v8  ;;  %v745_v53 = vshll.u32 %v744_v43, 16 }
 0x529   :  { %998 = vpow2.f32 %v791_v13 }
 0x52c   :  { %v1361_v14 = vpop.xlane.xlu1 %785 }
 0x52d   :  { %v1363_v15 = vpop.xlane.xlu0 %782  ;;  %v790_v61 = vsub.f32 %v1345_v0, %v1361_v14 }
 0x52e   :  { %v997_v3 = vpop.eup %996  ;;  %v789_v16 = vsub.f32 %v1347_v47, %v1363_v15 }
 0x52f   :  { %v999_v17 = vpop.eup %998  ;;  %v797_v18 = vmul.f32 1.442695, %v790_v61  ;;  %v802_v19 = vsel %vm274_vm11, %v997_v3, 0.0 }
 0x530   :  { %v795_v20 = vmul.f32 1.442695, %v789_v16  ;;  %803 = vadd.xlane.f32.xlu1 %v802_v19  ;;  %v799_v22 = vsel %vm274_vm11, %v999_v17, 0.0 }
 0x531   :  { %1000 = vpow2.f32 %v797_v18  ;;  %800 = vadd.xlane.f32.xlu0 %v799_v22 }
 0x532   :  { %1002 = vpow2.f32 %v795_v20 }
 0x537   :  { %v1001_v23 = vpop.eup %1000 }
 0x538   :  { %v1003_v24 = vpop.eup %1002  ;;  %v808_v25 = vsel %vm274_vm11, %v1001_v23, 0.0 }
 0x539   :  { %v805_v26 = vsel %vm274_vm11, %v1003_v24, 0.0  ;;  %809 = vadd.xlane.f32.xlu0 %v808_v25 }
 0x53a   :  { %806 = vadd.xlane.f32.xlu2 %v805_v26 }
 0x591   :  { %v727_v28 = vpop.xlane.xlu1 %726 }
 0x592   :  { %v712_v12 = vpop.xlane.xlu0 %711  ;;  %v728_v31 = vcvt.f32.s32 %v727_v28 }
 0x593   :  { %v713_v33 = vcvt.f32.s32 %v712_v12  ;;  %v697_v34 = vpop.xlane.xlu2 %696 }
 0x594   :  { %v698_v35 = vcvt.f32.s32 %v697_v34  ;;  %v731_v36 = vadd.s32 %v730_v29, %v728_v31 }
 0x595   :  { %v716_v40 = vadd.s32 %v715_v32, %v713_v33 }
 0x596   :  { %v701_v41 = vadd.s32 %v700_v1, %v698_v35  ;;  %vm749_vm14 = vcmp.eq.s32.totalorder %v1324_v21, %v731_v36 }
 0x597   :  { %vm748_vm15 = vcmp.eq.s32.totalorder %v1324_v21, %v716_v40  ;;  %v910_v42 = vsel %vm749_vm14, 1.0, %v1043_v38 }
 0x598   :  { %v909_v44 = vsel %vm748_vm15, 1.0, %v1043_v38  ;;  %v761_v46 = vmul.f32 %v910_v42, %v1347_v47  ;;  %vm747_vm1 = vcmp.eq.s32.totalorder %v1324_v21, %v701_v41 }
 0x599   :  { %v760_v5 = vmul.f32 %v909_v44, %v1335_v37  ;;  %v908_v48 = vsel %vm747_vm1, 1.0, %v1043_v38 }
 0x59a   :  { %v769_v49 = vsel %vm274_vm11, %v761_v46, 0.0  ;;  %v759_v50 = vmul.f32 %v908_v48, %v1337_v39  ;;  %v662_v39 = vld [vmem:[%s1417_s5 + $0x8] sm:$0xff] }
 0x59b   :  { %v742_v51 = vpop.xlane.xlu2 %741  ;;  %v766_v52 = vsel %vm274_vm11, %v760_v5, 0.0  ;;  %770 = vadd.xlane.f32.xlu0 %v769_v49  ;;  %v849_v57 = vsel %vm831_vm3, %v662_v39, 0.0 }
 0x59c   :  { %v743_v54 = vcvt.f32.s32 %v742_v51  ;;  %767 = vadd.xlane.f32.xlu2 %v766_v52  ;;  %v763_v45 = vsel %vm274_vm11, %v759_v50, 0.0  ;;  %v850_v4 = vadd.f32 %v849_v57, %v848_v59 }
 0x59d   :  { %764 = vadd.xlane.f32.xlu1 %v763_v45 }
 0x59e   :  { %v746_v47 = vadd.s32 %v745_v53, %v743_v54 }
 0x5a0   :  { %vm750_vm2 = vcmp.eq.s32.totalorder %v1324_v21, %v746_v47  ;;  %v663_v21 = vld [vmem:[%s1417_s5 + $0x10] sm:$0xff] }
 0x5a1   :  { %v911_v55 = vsel %vm750_vm2, 1.0, %v1043_v38  ;;  %v851_v60 = vsel %vm831_vm3, %v663_v21, 0.0 }
 0x5a2   :  { %v762_v37 = vmul.f32 %v911_v55, %v1345_v0  ;;  %v664_v0 = vld [vmem:[%s1417_s5 + $0x18] sm:$0xff]  ;;  %v852_v9 = vadd.f32 %v851_v60, %v850_v4 }
 0x5a3   :  { %v853_v6 = vsel %vm831_vm3, %v664_v0, 0.0  ;;  %v804_v11 = vpop.xlane.xlu1 %803 }
 0x5a4   :  { %v772_v56 = vsel %vm274_vm11, %v762_v37, 0.0  ;;  %v854_v2 = vadd.f32 %v853_v6, %v852_v9  ;;  %v801_v10 = vpop.xlane.xlu0 %800  ;;  %1004 = vlog2.f32 %v804_v11 }
 0x5a5   :  { %773 = vadd.xlane.f32.xlu1 %v772_v56  ;;  %1006 = vlog2.f32 %v801_v10 }
 0x5a6   :  { %855 = vadd.xlane.f32.xlu0 %v854_v2 }
 0x5aa   :  { %v1005_v8 = vpop.eup %1004 }
 0x5ab   :  { %v1007_v3 = vpop.eup %1006  ;;  %v814_v17 = vmul.f32 0.6931472, %v1005_v8 }
 0x5ac   :  { %v810_v61 = vpop.xlane.xlu0 %809  ;;  %v812_v18 = vmul.f32 0.6931472, %v1007_v3 }
 0x5ad   :  { %v807_v13 = vpop.xlane.xlu2 %806  ;;  %v820_v20 = vadd.f32 %v814_v17, %v1353_v62 }
 0x5ae   :  { %1008 = vlog2.f32 %v807_v13  ;;  %v819_v23 = vadd.f32 %v812_v18, %v1357_v63 }
 0x5af   :  { %1010 = vlog2.f32 %v810_v61 }
 0x5b4   :  { %v1009_v16 = vpop.eup %1008 }
 0x5b5   :  { %v816_v19 = vmul.f32 0.6931472, %v1009_v16  ;;  %v1011_v24 = vpop.eup %1010 }
 0x5b6   :  { %v818_v29 = vmul.f32 0.6931472, %v1011_v24 }
 0x5b7   :  { %v821_v7 = vadd.f32 %v816_v19, %v1363_v15 }
 0x5b8   :  { %v822_v62 = vadd.f32 %v818_v29, %v1361_v14 }
 0x60e   :  { %v771_v26 = vpop.xlane.xlu0 %770 }
 0x60f   :  { %v768_v22 = vpop.xlane.xlu2 %767  ;;  %v825_v12 = vsub.f32 %v821_v7, %v771_v26 }
 0x610   :  { %v824_v25 = vsub.f32 %v820_v20, %v768_v22  ;;  %v765_v30 = vpop.xlane.xlu1 %764 }
 0x611   :  { %v823_v27 = vsub.f32 %v819_v23, %v765_v30  ;;  %v829_v34 = vmul.f32 %v825_v12, %v663_v21 }
 0x612   :  { %v828_v28 = vmul.f32 %v824_v25, %v662_v39 }
 0x613   :  { %v827_v31 = vmul.f32 %v823_v27, %v661_v58  ;;  %v835_v40 = vsel %vm831_vm3, %v829_v34, 0.0 }
 0x614   :  { %v833_v32 = vsel %vm831_vm3, %v828_v28, 0.0 }
 0x615   :  { %v832_v33 = vsel %vm831_vm3, %v827_v31, 0.0 }
 0x616   :  { %v834_v63 = vadd.f32 %v833_v32, %v832_v33 }
 0x618   :  { %v774_v1 = vpop.xlane.xlu1 %773  ;;  %v836_v41 = vadd.f32 %v835_v40, %v834_v63 }
 0x619   :  { %v826_v35 = vsub.f32 %v822_v62, %v774_v1  ;;  %v856_v42 = vpop.xlane.xlu0 %855 }
 0x61a   :  { %v857_v43 = vrot.slane %v856_v42, 4 }
 0x61b   :  { %v830_v36 = vmul.f32 %v826_v35, %v664_v0 }
 0x61c   :  { %v858_v44 = vadd.f32 %v857_v43, %v856_v42 }
 0x61d   :  { %v837_v15 = vsel %vm831_vm3, %v830_v36, 0.0 }
 0x61e   :  { %v838_v38 = vadd.f32 %v837_v15, %v836_v41  ;;  %v859_v46 = vrot.slane %v858_v44, 2 }
 0x620   :  { %839 = vadd.xlane.f32.xlu2 %v838_v38  ;;  %v860_v50 = vadd.f32 %v859_v46, %v858_v44 }
 0x622   :  { %v861_v52 = vrot.slane %v860_v50, 1 }
 0x624   :  { %v862_v45 = vadd.f32 %v861_v52, %v860_v50 }
 0x693   :  { %v840_v5 = vpop.xlane.xlu2 %839 }
 0x694   :  { %v841_v48 = vrot.slane %v840_v5, 4 }
 0x696   :  { %v842_v49 = vadd.f32 %v841_v48, %v840_v5 }
 0x698   :  { %v843_v14 = vrot.slane %v842_v49, 2 }
 0x69a   :  { %v844_v51 = vadd.f32 %v843_v14, %v842_v49 }
 0x69c   :  { %v845_v53 = vrot.slane %v844_v51, 1 }
 0x69e   :  { %v846_v54 = vadd.f32 %v845_v53, %v844_v51 }
 0x6a0   :  { %922 = vpush %v846_v54 }
 0x6a1   :  { %924 = vpush %v862_v45 }
 0x6d1   :  { %s923_s5 = spop %922 }
 0x6d2   :  { %s925_s10 = spop %924 }
 0x6d3   :  { %v864_v47 = vstv %s925_s10 }
 0x6d4   :  { %1012 = vrcp.f32 %v864_v47  ;;  %v876_v39 = vand.u32 2147483648, %v864_v47  ;;  %v874_v58 = vand.u32 2147483647, %v864_v47  ;;  %vm870_vm4 = vweird.f32 %v864_v47 }
 0x6d6   :  { %v877_v21 = vor.u32 1.1754944e-38, %v876_v39  ;;  %vm875_vm0 = vcmp.eq.f32.partialorder %v874_v58, 8.507059e+37 }
 0x6da   :  { %v1013_v55 = vpop.eup %1012 }
 0x6db   :  { %v866_v37 = vmul.f32 %v1013_v55, %v864_v47  ;;  %vm871_vm11 = vweird.f32 %v1013_v55 }
 0x6dc   :  { %vm872_vm5 = vmor %vm870_vm4, %vm871_vm11 }
 0x6dd   :  { %v867_v56 = vsub.f32 1.0, %v866_v37 }
 0x6df   :  { %v868_v57 = vmul.f32 %v1013_v55, %v867_v56 }
 0x6e1   :  { %v869_v59 = vadd.f32 %v1013_v55, %v868_v57 }
 0x6e3   :  { %v873_v0 = vsel %vm872_vm5, %v1013_v55, %v869_v59 }
 0x6e4   :  { %v878_v4 = vsel %vm875_vm0, %v877_v21, %v873_v0 }
 0x6e5   :  { %926 = vpush %v878_v4 }
 0x716   :  { %s927_s15 = spop %926 }
 0x717   :  { %s880_s16 = smul.f32 %s927_s15, %s923_s5 }
 0x719   :  { %v881_v60 = vstv %s880_s16 }
 0x71a   :  { %883 = vst.msk [vmem:[#allocation2] sm:$0x1] %vm882_vm6, %v881_v60 }
 0x71b   :  { %894 = dma.vmem_to_hbm [thread:$0]  %s890_s4, 16, %s892_s14, [#allocation3]  }
 0x71c   :  { %1038 = dma.done.wait [#allocation3], 16  }
 0x71d   :  { %1039 = vsyncadd [#allocation3], 4294967280 }
 0x71e   :  { %899 = vsyncpa [#allocation3], 1 }

// kernel: mpp_forward.7
= control target key start
LH: loop header
LB: loop body
LE: loop exit
PB: predicated region body
PF: predicated region fallthrough
CT: control target
= control target key end

     0   :  { %s1800_s25 = smov 0   ;;  %s2164_s0 = inlined_call_operand.vmem [shape: f32[2,17,32], index: 0, kind: input, shape index: {}]   ;;  %s2165_s1 = inlined_call_operand.vmem [shape: f32[1,32], index: 1, kind: input, shape index: {}]   ;;  %s2166_s2 = inlined_call_operand.vmem [shape: f32[1,32], index: 2, kind: input, shape index: {}]   ;;  %s2167_s3 = inlined_call_operand.vmem [shape: f32[32,96], index: 3, kind: input, shape index: {}]   ;;  %s2168_s4 = inlined_call_operand.vmem [shape: f32[1,96], index: 4, kind: input, shape index: {}]   ;;  %s2169_s5 = inlined_call_operand.vmem [shape: f32[32,32], index: 5, kind: input, shape index: {}]   ;;  %s2170_s6 = inlined_call_operand.vmem [shape: f32[1,32], index: 6, kind: input, shape index: {}]   ;;  %s2171_s7 = inlined_call_operand.vmem [shape: f32[1,32], index: 7, kind: input, shape index: {}]   ;;  %s2172_s8 = inlined_call_operand.vmem [shape: f32[1,32], index: 8, kind: input, shape index: {}]   ;;  %s2173_s9 = inlined_call_operand.vmem [shape: f32[32,64], index: 9, kind: input, shape index: {}]   ;;  %s2174_s10 = inlined_call_operand.vmem [shape: f32[1,64], index: 10, kind: input, shape index: {}]   ;;  %s2175_s11 = inlined_call_operand.vmem [shape: f32[64,32], index: 11, kind: input, shape index: {}]   ;;  %s2176_s12 = inlined_call_operand.vmem [shape: f32[1,32], index: 12, kind: input, shape index: {}]   ;;  %s2177_s13 = inlined_call_operand.vmem [shape: f32[2,17,32], index: 13, kind: output, shape index: {}]  }
   0x1 LB: > { %s1520_s26 = sadd.s32 4294967295, %s1716_s25   ;;  %p1524_p0 = scmp.ge.s32.totalorder %s1716_s25, 1  ;;  %s1716_s25 = sphi %s1800_s25, %s23_s25  }
   0x2   : > { %p387_p1 = scmp.lt.s32.totalorder %s1716_s25, 3 }
   0x4   : > { %p388_p2 = pnand %p1524_p0, %p387_p1 }
   0x5   : > { %p431_p3 = scmp.lt.s32.totalorder (!%p388_p2), %s1520_s26, 1  ;;  %s1719_s14 = smov (!%p388_p2), 96  }
   0x6   : > { %391 = sbr.rel (%p388_p2) target bundleno = 2389 (0x955), region = 72  ;;  %s1720_s15 = smov (!%p388_p2), 64  }
   0x7   : > { %s1721_s16 = smov (!%p388_p2), 88   ;;  %s1722_s17 = smov (!%p388_p2), 120  }
   0x8   : > { %s1723_s18 = smov (!%p388_p2), 80   ;;  %s1724_s19 = smov (!%p388_p2), 72  }
   0x9   : > { %s1725_s20 = smov (!%p388_p2), 112   ;;  %s1726_s21 = smov (!%p388_p2), 104  }
   0xa   : > { %s1727_s24 = smov (!%p388_p2), 56   ;;  %s1728_s28 = smov (!%p388_p2), 40  }
   0xb   : > { %s2179_s26 = smov (!%p431_p3, %s1520_s26), 1  ;;  %vm446_vm0 = vcmask 261120   ;;  %vm453_vm1 = vcmask 253952   ;;  %v1718_v6 = vmov 32.0   ;;  %v536_v28 = vld [vmem:[%s2167_s3 + $0x18] sm:$0xff]  ;;  %v535_v29 = vld [vmem:[%s2167_s3 + $0x10] sm:$0xff] }
   0xc   : > { %s1593_s27 = smul.u32 24, %s2179_s26  ;;  %1642 = vrcp.f32 %v1718_v6  ;;  %562 = vmatpush.msra.mxu0 %v536_v28  ;;  %v534_v30 = vld [vmem:[%s2167_s3 + $0x8] sm:$0xff]  ;;  %v533_v31 = vld [vmem:[%s2167_s3] sm:$0xff]  ;;  %vm589_vm12 = vcmask 64512   ;;  %vm631_vm13 = vcmask 138240   ;;  %vm638_vm14 = vcmask 131072  }
   0xd   : > { %v1634_v49 = vld [vmem:[%s2165_s1] ss:$0 sm:$0xff]  ;;  %vm683_vm15 = vcmask 1040384   ;;  %s1729_s29 = smov 48  }
   0xe   : > { %s435_s30 = scalar_lea.vmem %s2164_s0, %s1593_s27  ;;  %563 = vmatpush.msra.mxu0 %v535_v29  ;;  %v1635_v53 = vld [vmem:[%s2166_s2] ss:$0 sm:$0xff] }
   0xf   : > { %v1816_v0 = vld [vmem:[%s435_s30] sm:$0xff]  ;;  %v1818_v1 = vld [vmem:[%s435_s30 + $0x10] sm:$0x1]  ;;  %v1824_v4 = vld [vmem:[%s435_s30 + $0x8] sm:$0xff]  ;;  %s440_s30 = scalar_lea.vmem %s2177_s13, %s1593_s27 }
  0x10   : > { %v447_v2 = vsel %vm446_vm0, %v1816_v0, 0.0  ;;  %v454_v3 = vsel %vm453_vm1, %v1818_v1, 0.0  ;;  %v450_v5 = vsel %vm446_vm0, %v1824_v4, 0.0  ;;  %564 = vmatpush.msra.mxu0 %v534_v30 }
  0x11   : > { %448 = vadd.xlane.f32.xlu0 %v447_v2  ;;  %455 = vadd.xlane.f32.xlu1 %v454_v3 }
  0x12   : > { %v1643_v7 = vpop.eup %1642  ;;  %565 = vmatpush.msra.mxu0 %v533_v31 }
  0x13   : > { %v458_v8 = vmul.f32 32.0, %v1643_v7  ;;  %vm462_vm2 = vweird.f32 %v1643_v7 }
  0x15   : > { %v459_v9 = vsub.f32 1.0, %v458_v8 }
  0x17   : > { %v460_v10 = vmul.f32 %v1643_v7, %v459_v9 }
  0x19   : > { %451 = vadd.xlane.f32.xlu0 %v450_v5  ;;  %v461_v11 = vadd.f32 %v1643_v7, %v460_v10 }
  0x1b   : > { %v1828_v12 = vsel %vm462_vm2, %v1643_v7, %v461_v11 }
  0x84   : > { %v449_v13 = vpop.xlane.xlu0 %448  ;;  %v456_v17 = vpop.xlane.xlu1 %455 }
  0x85   : > { %v464_v14 = vmul.f32 %v1828_v12, %v449_v13  ;;  %v466_v21 = vmul.f32 %v1828_v12, %v456_v17  ;;  %v1636_v13 = vld [vmem:[%s2168_s4] ss:$0 sm:$0xff] }
  0x87   : > { %v467_v15 = vsub.f32 %v1816_v0, %v464_v14  ;;  %v1837_v23 = vsub.f32 %v1818_v1, %v466_v21 }
  0x89   : > { %v470_v16 = vmul.f32 %v467_v15, %v467_v15  ;;  %v472_v26 = vmul.f32 %v1837_v23, %v1837_v23 }
  0x8b   : > { %v473_v18 = vsel %vm446_vm0, %v470_v16, 0.0  ;;  %v479_v27 = vsel %vm453_vm1, %v472_v26, 0.0 }
  0x8c   : > { %474 = vadd.xlane.f32.xlu1 %v473_v18  ;;  %v452_v19 = vpop.xlane.xlu0 %451 }
  0x8d   : > { %v465_v20 = vmul.f32 %v1828_v12, %v452_v19 }
  0x8f   : > { %v468_v22 = vsub.f32 %v1824_v4, %v465_v20 }
  0x91   : > { %v471_v24 = vmul.f32 %v468_v22, %v468_v22 }
  0x93   : > { %v476_v25 = vsel %vm446_vm0, %v471_v24, 0.0 }
  0x94   : > { %477 = vadd.xlane.f32.xlu2 %v476_v25 }
  0x9c   : > { %480 = vadd.xlane.f32.xlu2 %v479_v27 }
  0xff   : > { %v475_v32 = vpop.xlane.xlu1 %474 }
 0x100   : > { %v482_v33 = vmul.f32 %v475_v32, %v1828_v12 }
 0x102   : > { %v485_v34 = vadd.f32 1e-06, %v482_v33 }
 0x104   : > { %1644 = vrsqrt.f32 %v485_v34  ;;  %vm494_vm4 = vweird.f32 %v485_v34 }
 0x107   : > { %v478_v35 = vpop.xlane.xlu2 %477 }
 0x108   : > { %v483_v36 = vmul.f32 %v478_v35, %v1828_v12 }
 0x10a   : > { %v1645_v37 = vpop.eup %1644  ;;  %v486_v38 = vadd.f32 1e-06, %v483_v36 }
 0x10b   : > { %v489_v39 = vmul.f32 %v1645_v37, %v485_v34  ;;  %vm495_vm3 = vweird.f32 %v1645_v37 }
 0x10c   : > { %1646 = vrsqrt.f32 %v486_v38  ;;  %vm496_vm5 = vmor %vm494_vm4, %vm495_vm3  ;;  %vm504_vm7 = vweird.f32 %v486_v38 }
 0x10d   : > { %v490_v40 = vmul.f32 %v1645_v37, %v489_v39 }
 0x10f   : > { %v491_v41 = vmul.f32 0.5, %v490_v40  ;;  %v481_v42 = vpop.xlane.xlu2 %480 }
 0x110   : > { %v484_v43 = vmul.f32 %v481_v42, %v1828_v12 }
 0x111   : > { %v492_v44 = vsub.f32 1.5, %v491_v41 }
 0x112   : > { %v1647_v45 = vpop.eup %1646  ;;  %v487_v46 = vadd.f32 1e-06, %v484_v43 }
 0x113   : > { %v493_v47 = vmul.f32 %v1645_v37, %v492_v44  ;;  %v499_v48 = vmul.f32 %v1647_v45, %v486_v38  ;;  %vm505_vm6 = vweird.f32 %v1647_v45 }
 0x114   : > { %1648 = vrsqrt.f32 %v487_v46  ;;  %vm506_vm8 = vmor %vm504_vm7, %vm505_vm6  ;;  %vm514_vm10 = vweird.f32 %v487_v46 }
 0x115   : > { %v497_v50 = vsel %vm496_vm5, %v1645_v37, %v493_v47  ;;  %v500_v51 = vmul.f32 %v1647_v45, %v499_v48 }
 0x116   : > { %v518_v52 = vmul.f32 %v497_v50, %v467_v15 }
 0x117   : > { %v501_v54 = vmul.f32 0.5, %v500_v51 }
 0x118   : > { %v524_v55 = vmul.f32 %v1634_v49, %v518_v52 }
 0x119   : > { %v502_v56 = vsub.f32 1.5, %v501_v54 }
 0x11a   : > { %v1649_v57 = vpop.eup %1648  ;;  %v530_v58 = vadd.f32 %v1635_v53, %v524_v55 }
 0x11b   : > { %v503_v59 = vmul.f32 %v1647_v45, %v502_v56  ;;  %v509_v60 = vmul.f32 %v1649_v57, %v487_v46  ;;  %vm515_vm9 = vweird.f32 %v1649_v57  ;;  %v576_v56 = vld [vmem:[%s2169_s5] sm:$0xff] }
 0x11c   : > { %1527 = vmatmul.msk.f32.vlgmr.msra.gmra.mxu0 %vm446_vm0, %v530_v58  ;;  %vm516_vm11 = vmor %vm514_vm10, %vm515_vm9 }
 0x11d   : > { %v507_v61 = vsel %vm506_vm8, %v1647_v45, %v503_v59  ;;  %v510_v62 = vmul.f32 %v1649_v57, %v509_v60 }
 0x11e   : > { %v519_v63 = vmul.f32 %v507_v61, %v468_v22 }
 0x11f   : > { %v511_v2 = vmul.f32 0.5, %v510_v62 }
 0x120   : > { %v525_v3 = vmul.f32 %v1634_v49, %v519_v63 }
 0x121   : > { %v512_v5 = vsub.f32 1.5, %v511_v2 }
 0x122   : > { %v531_v6 = vadd.f32 %v1635_v53, %v525_v3 }
 0x123   : > { %v513_v7 = vmul.f32 %v1649_v57, %v512_v5 }
 0x124   : > { %1528 = vmatmul.msk.f32.gmra.mxu0 %vm446_vm0, %v531_v6 }
 0x125   : > { %v517_v8 = vsel %vm516_vm11, %v1649_v57, %v513_v7  ;;  %vm1423_vm11 = vcmask 523264  }
 0x126   : > { %v520_v9 = vmul.f32 %v517_v8, %v1837_v23 }
 0x128   : > { %v526_v10 = vmul.f32 %v1634_v49, %v520_v9 }
 0x12a   : > { %v532_v11 = vadd.f32 %v1635_v53, %v526_v10 }
 0x12c   : > { %1529 = vmatmul.msk.f32.gmra.mxu0 %vm446_vm0, %v532_v11 }
 0x199   : > { %v567_v14 = vpop.f32.mrf.mxu0 }
 0x19a   : > { %v1871_v15 = vadd.f32 %v1636_v13, %v567_v14 }
 0x19c   : > { %583 = vrot.lane.b32.xlu2 %v1871_v15, %s1719_s14 }
 0x1a1   : > { %v570_v16 = vpop.f32.mrf.mxu0 }
 0x1a2   : > { %v1874_v17 = vadd.f32 %v1636_v13, %v570_v16 }
 0x1a4   : > { %585 = vrot.lane.b32.xlu1 %v1874_v17, %s1719_s14  ;;  %v1898_v32 = vpack.i.bf16 %v1871_v15, %v1874_v17 }
 0x1a9   : > { %v573_v18 = vpop.f32.mrf.mxu0 }
 0x1aa   : > { %v1877_v19 = vadd.f32 %v1636_v13, %v573_v18 }
 0x1ac   : > { %587 = vrot.lane.b32.xlu0 %v1877_v19, %s1719_s14 }
 0x1f6   : > { %v584_v22 = vpop.permute.xlu2 %583 }
 0x216   : > { %v586_v21 = vpop.permute.xlu1 %585 }
 0x21e   : > { %v588_v20 = vpop.permute.xlu0 %587 }
 0x21f   : > { %1530 = vmatpush.xpose.msk.msra.mxu1 %vm589_vm12, %v588_v20  ;;  %1590 = vmatpush.xpose.msk.msra.mxu3 %vm589_vm12, %v588_v20 }
 0x223   : > { %1531 = vmatpush.xpose.msk.msra.mxu1 %vm589_vm12, %v586_v21  ;;  %1591 = vmatpush.xpose.msk.msra.mxu3 %vm589_vm12, %v586_v21 }
 0x227   : > { %1532 = vmatpush.xpose.msk.msra.mxu1 %vm589_vm12, %v584_v22  ;;  %1592 = vmatpush.xpose.msk.msra.mxu3 %vm589_vm12, %v584_v22 }
 0x22a   : > { %1533 = vmatmul.msk.f32.vlgmr.msra.gmra.mxu1 %vm589_vm12, %v1871_v15  ;;  %1534 = vmatmul.msk.f32.vlgmr.msra.gmra.mxu3 %vm589_vm12, %v1874_v17 }
 0x22b   : > { %902 = vmatpush.msrb.mxu1 %v576_v56 }
 0x232   : > { %1535 = vmatmul.msk.f32.gmra.mxu3 %vm589_vm12, %v1877_v19 }
 0x2a7   : > { %v619_v23 = vpop.f32.mrf.mxu1 }
 0x2a8   : > { %v628_v24 = vmul.f32 0.35355338, %v619_v23 }
 0x2aa   : > { %v632_v25 = vsel %vm631_vm13, %v628_v24, -inf }
 0x2ab   : > { %633 = vmax.xlane.f32.xlu0 %v632_v25 }
 0x2ad   : > { %v622_v26 = vpop.f32.mrf.mxu3 }
 0x2ae   : > { %v629_v27 = vmul.f32 0.35355338, %v622_v26 }
 0x2b0   : > { %v635_v28 = vsel %vm631_vm13, %v629_v27, -inf }
 0x2b1   : > { %636 = vmax.xlane.f32.xlu2 %v635_v28 }
 0x2b5   : > { %v625_v29 = vpop.f32.mrf.mxu3 }
 0x2b6   : > { %v630_v30 = vmul.f32 0.35355338, %v625_v29 }
 0x2b8   : > { %v639_v31 = vsel %vm638_vm14, %v630_v30, -inf }
 0x2b9   : > { %640 = vmax.xlane.f32.xlu1 %v639_v31 }
 0x2c9   : > { %670 = vrot.lane.b32.xlu2 %v1877_v19, %s1720_s15 }
 0x2d1   : > { %720 = vrot.lane.b32.xlu2 %v1874_v17, %s1721_s16 }
 0x2d2   : > { %1615 = vrot.lane.b32.xlu1 %v1898_v32, %s1720_s15 }
 0x2d9   : > { %712 = vrot.lane.b32.xlu2 %v1871_v15, %s1722_s17 }
 0x2da   : > { %718 = vrot.lane.b32.xlu1 %v1871_v15, %s1721_s16 }
 0x2e1   : > { %923 = vrot.lane.b32.xlu2 %v1877_v19, %s1723_s18 }
 0x2e2   : > { %714 = vrot.lane.b32.xlu1 %v1874_v17, %s1722_s17 }
 0x2e9   : > { %921 = vrot.lane.b32.xlu2 %v1874_v17, %s1723_s18 }
 0x2ea   : > { %716 = vrot.lane.b32.xlu1 %v1877_v19, %s1722_s17 }
 0x2f1   : > { %1088 = vrot.lane.b32.xlu2 %v1871_v15, %s1724_s19 }
 0x2f2   : > { %919 = vrot.lane.b32.xlu1 %v1871_v15, %s1723_s18 }
 0x2f9   : > { %915 = vrot.lane.b32.xlu2 %v1874_v17, %s1725_s20 }
 0x2fa   : > { %1082 = vrot.lane.b32.xlu1 %v1871_v15, %s1726_s21 }
 0x301   : > { %1086 = vrot.lane.b32.xlu2 %v1877_v19, %s1726_s21 }
 0x302   : > { %917 = vrot.lane.b32.xlu1 %v1877_v19, %s1725_s20 }
 0x31e   : > { %v634_v33 = vpop.xlane.xlu0 %633 }
 0x31f   : > { %v642_v34 = vsub.f32 %v628_v24, %v634_v33 }
 0x321   : > { %v645_v35 = vmul.f32 1.442695, %v642_v34 }
 0x323   : > { %1650 = vpow2.f32 %v645_v35 }
 0x324   : > { %v637_v36 = vpop.xlane.xlu2 %636 }
 0x325   : > { %v643_v37 = vsub.f32 %v629_v27, %v637_v36 }
 0x327   : > { %v647_v38 = vmul.f32 1.442695, %v643_v37 }
 0x329   : > { %v1651_v39 = vpop.eup %1650  ;;  %1652 = vpow2.f32 %v647_v38 }
 0x32a   : > { %v651_v40 = vsel %vm631_vm13, %v1651_v39, 0.0 }
 0x32b   : > { %652 = vadd.xlane.f32.xlu0 %v651_v40 }
 0x32c   : > { %v671_v41 = vpop.permute.xlu2 %670  ;;  %v641_v42 = vpop.xlane.xlu1 %640 }
 0x32d   : > { %v644_v43 = vsub.f32 %v630_v30, %v641_v42  ;;  %1536 = vmatpush.msk.msra.mxu2 %vm683_vm15, %v671_v41 }
 0x32f   : > { %v1653_v44 = vpop.eup %1652  ;;  %v649_v45 = vmul.f32 1.442695, %v644_v43 }
 0x330   : > { %v654_v46 = vsel %vm631_vm13, %v1653_v44, 0.0 }
 0x331   : > { %1654 = vpow2.f32 %v649_v45 }
 0x333   : > { %655 = vadd.xlane.f32.xlu0 %v654_v46 }
 0x334   : > { %v721_v58 = vpop.permute.xlu2 %720 }
 0x337   : > { %v1655_v47 = vpop.eup %1654 }
 0x338   : > { %v657_v48 = vsel %vm638_vm14, %v1655_v47, 0.0 }
 0x33b   : > { %658 = vadd.xlane.f32.xlu0 %v657_v48 }
 0x33c   : > { %v713_v2 = vpop.permute.xlu2 %712 }
 0x344   : > { %v1616_v49 = vpop.permute.xlu1 %1615  ;;  %v924_v5 = vpop.permute.xlu2 %923 }
 0x345   : > { %v1617_v50 = vunpack.i.l.bf16 %v1616_v49  ;;  %v1618_v51 = vunpack.i.h.bf16 %v1616_v49 }
 0x347   : > { %700 = vmatpush.msra.mxu2 %v1617_v50 }
 0x349   : > { %701 = vmatpush.msra.mxu2 %v1618_v51 }
 0x34c   : > { %v719_v61 = vpop.permute.xlu1 %718  ;;  %v922_v9 = vpop.permute.xlu2 %921 }
 0x34f   : > { %722 = vrot.lane.b32.xlu0 %v1877_v19, %s1721_s16 }
 0x354   : > { %v715_v3 = vpop.permute.xlu1 %714  ;;  %v1089_v13 = vpop.permute.xlu2 %1088 }
 0x357   : > { %1092 = vrot.lane.b32.xlu0 %v1877_v19, %s1724_s19 }
 0x35c   : > { %v717_v7 = vpop.permute.xlu1 %716  ;;  %v916_v16 = vpop.permute.xlu2 %915 }
 0x35f   : > { %1090 = vrot.lane.b32.xlu0 %v1874_v17, %s1724_s19 }
 0x364   : > { %v920_v11 = vpop.permute.xlu1 %919  ;;  %v1087_v25 = vpop.permute.xlu2 %1086 }
 0x367   : > { %913 = vrot.lane.b32.xlu0 %v1871_v15, %s1725_s20 }
 0x36c   : > { %v1083_v15 = vpop.permute.xlu1 %1082 }
 0x36f   : > { %1084 = vrot.lane.b32.xlu0 %v1874_v17, %s1726_s21 }
 0x374   : > { %v918_v17 = vpop.permute.xlu1 %917 }
 0x39e   : > { %v653_v52 = vpop.xlane.xlu0 %652 }
 0x39f   : > { %1656 = vrcp.f32 %v653_v52 }
 0x3a5   : > { %v1657_v53 = vpop.eup %1656 }
 0x3a6   : > { %v656_v54 = vpop.xlane.xlu0 %655  ;;  %v663_v55 = vmul.f32 %v1657_v53, %v1651_v39 }
 0x3a7   : > { %1658 = vrcp.f32 %v656_v54 }
 0x3a8   : > { %1537 = vmatmul.msk.f32.vlgmr.msra.gmra.mxu2 %vm631_vm13, %v663_v55 }
 0x3ad   : > { %v1659_v57 = vpop.eup %1658 }
 0x3ae   : > { %v659_v59 = vpop.xlane.xlu0 %658  ;;  %v664_v60 = vmul.f32 %v1659_v57, %v1653_v44 }
 0x3af   : > { %1660 = vrcp.f32 %v659_v59 }
 0x3b0   : > { %1538 = vmatmul.msk.f32.gmra.mxu2 %vm631_vm13, %v664_v60 }
 0x3b5   : > { %v1661_v62 = vpop.eup %1660 }
 0x3b6   : > { %v665_v63 = vmul.f32 %v1661_v62, %v1655_v47 }
 0x3b8   : > { %1539 = vmatmul.msk.f32.gmra.mxu2 %vm631_vm13, %v665_v63 }
 0x3c1   : > { %v723_v6 = vpop.permute.xlu0 %722 }
 0x3c2   : > { %1540 = vmatpush.xpose.msk.msrb.mxu3 %vm589_vm12, %v723_v6 }
 0x3c6   : > { %1541 = vmatpush.xpose.msk.msrb.mxu3 %vm589_vm12, %v721_v58 }
 0x3c9   : > { %v1093_v8 = vpop.permute.xlu0 %1092 }
 0x3ca   : > { %1542 = vmatpush.xpose.msk.msrb.mxu3 %vm589_vm12, %v719_v61  ;;  %1569 = vmatpush.xpose.msk.msra.mxu1 %vm589_vm12, %v1093_v8 }
 0x3cd   : > { %1543 = vmatmul.msk.f32.vlgmr.msrb.gmra.mxu3 %vm589_vm12, %v713_v2 }
 0x3ce   : > { %1556 = vmatpush.xpose.msk.msra.mxu3 %vm589_vm12, %v924_v5 }
 0x3d1   : > { %v1091_v10 = vpop.permute.xlu0 %1090 }
 0x3d2   : > { %1557 = vmatpush.xpose.msk.msra.mxu3 %vm589_vm12, %v922_v9  ;;  %1570 = vmatpush.xpose.msk.msra.mxu1 %vm589_vm12, %v1091_v10 }
 0x3d5   : > { %1544 = vmatmul.msk.f32.gmra.mxu3 %vm589_vm12, %v715_v3 }
 0x3d6   : > { %1558 = vmatpush.xpose.msk.msra.mxu3 %vm589_vm12, %v920_v11  ;;  %1571 = vmatpush.xpose.msk.msra.mxu1 %vm589_vm12, %v1089_v13 }
 0x3d9   : > { %v914_v14 = vpop.permute.xlu0 %913 }
 0x3dd   : > { %1545 = vmatmul.msk.f32.gmra.mxu3 %vm589_vm12, %v717_v7 }
 0x3e1   : > { %v1085_v22 = vpop.permute.xlu0 %1084 }
 0x3e5   : > { %1559 = vmatmul.msk.f32.vlgmr.msra.gmra.mxu3 %vm589_vm12, %v914_v14 }
 0x3ed   : > { %1560 = vmatmul.msk.f32.gmra.mxu3 %vm589_vm12, %v916_v16 }
 0x3f5   : > { %1561 = vmatmul.msk.f32.gmra.mxu3 %vm589_vm12, %v918_v17 }
 0x42b   : > { %v703_v18 = vpop.f32.mrf.mxu2 }
 0x42c   : > { %1553 = vmatmul.msk.f32.vlgmr.msrb.gmra.mxu1 %vm589_vm12, %v703_v18 }
 0x433   : > { %v706_v20 = vpop.f32.mrf.mxu2 }
 0x434   : > { %1554 = vmatmul.msk.f32.gmra.mxu1 %vm589_vm12, %v706_v20 }
 0x43b   : > { %v709_v21 = vpop.f32.mrf.mxu2 }
 0x43c   : > { %1555 = vmatmul.msk.f32.gmra.mxu1 %vm589_vm12, %v709_v21 }
 0x444   : > { %1572 = vmatmul.msk.f32.vlgmr.msra.gmra.mxu1 %vm589_vm12, %v1083_v15 }
 0x44c   : > { %1573 = vmatmul.msk.f32.gmra.mxu1 %vm589_vm12, %v1085_v22 }
 0x450   : > { %v753_v23 = vpop.f32.mrf.mxu3 }
 0x451   : > { %v762_v24 = vmul.f32 0.35355338, %v753_v23 }
 0x453   : > { %v765_v26 = vsel %vm631_vm13, %v762_v24, -inf }
 0x454   : > { %766 = vmax.xlane.f32.xlu0 %v765_v26  ;;  %1574 = vmatmul.msk.f32.gmra.mxu1 %vm589_vm12, %v1087_v25 }
 0x458   : > { %v756_v27 = vpop.f32.mrf.mxu3 }
 0x459   : > { %v763_v28 = vmul.f32 0.35355338, %v756_v27 }
 0x45b   : > { %v768_v29 = vsel %vm631_vm13, %v763_v28, -inf }
 0x45c   : > { %769 = vmax.xlane.f32.xlu1 %v768_v29 }
 0x460   : > { %v759_v30 = vpop.f32.mrf.mxu3 }
 0x461   : > { %v764_v31 = vmul.f32 0.35355338, %v759_v30 }
 0x463   : > { %v771_v33 = vsel %vm638_vm14, %v764_v31, -inf }
 0x464   : > { %772 = vmax.xlane.f32.xlu2 %v771_v33 }
 0x468   : > { %v954_v34 = vpop.f32.mrf.mxu3 }
 0x469   : > { %v963_v35 = vmul.f32 0.35355338, %v954_v34 }
 0x46b   : > { %v966_v36 = vsel %vm631_vm13, %v963_v35, -inf }
 0x46c   : > { %967 = vmax.xlane.f32.xlu1 %v966_v36 }
 0x470   : > { %v957_v37 = vpop.f32.mrf.mxu3 }
 0x471   : > { %v1966_v38 = vmul.f32 0.35355338, %v957_v37 }
 0x473   : > { %v969_v39 = vsel %vm631_vm13, %v1966_v38, -inf }
 0x474   : > { %970 = vmax.xlane.f32.xlu0 %v969_v39 }
 0x478   : > { %v960_v40 = vpop.f32.mrf.mxu3 }
 0x479   : > { %v1970_v41 = vmul.f32 0.35355338, %v960_v40 }
 0x47b   : > { %v972_v42 = vsel %vm638_vm14, %v1970_v41, -inf }
 0x47c   : > { %973 = vmax.xlane.f32.xlu2 %v972_v42 }
 0x4a9   : > { %v1974_v43 = vpop.f32.mrf.mxu1 }
 0x4b1   : > { %v1976_v44 = vpop.f32.mrf.mxu1 }
 0x4b9   : > { %v1978_v45 = vpop.f32.mrf.mxu1 }
 0x4c1   : > { %v1123_v46 = vpop.f32.mrf.mxu1 }
 0x4c2   : > { %v1132_v61 = vmul.f32 0.35355338, %v1123_v46 }
 0x4c4   : > { %v1135_v2 = vsel %vm631_vm13, %v1132_v61, -inf }
 0x4c7   : > { %v767_v47 = vpop.xlane.xlu0 %766 }
 0x4c8   : > { %v774_v48 = vsub.f32 %v762_v24, %v767_v47 }
 0x4c9   : > { %v1126_v49 = vpop.f32.mrf.mxu1 }
 0x4ca   : > { %v777_v50 = vmul.f32 1.442695, %v774_v48  ;;  %v1133_v51 = vmul.f32 0.35355338, %v1126_v49 }
 0x4cc   : > { %1662 = vpow2.f32 %v777_v50  ;;  %v1138_v52 = vsel %vm631_vm13, %v1133_v51, -inf }
 0x4cd   : > { %1139 = vmax.xlane.f32.xlu2 %v1138_v52 }
 0x4cf   : > { %v770_v53 = vpop.xlane.xlu1 %769 }
 0x4d0   : > { %v775_v56 = vsub.f32 %v763_v28, %v770_v53 }
 0x4d1   : > { %v1129_v54 = vpop.f32.mrf.mxu1 }
 0x4d2   : > { %v1981_v55 = vpop.eup %1662  ;;  %v1134_v57 = vmul.f32 0.35355338, %v1129_v54  ;;  %v779_v60 = vmul.f32 1.442695, %v775_v56 }
 0x4d3   : > { %v783_v58 = vsel %vm631_vm13, %v1981_v55, 0.0 }
 0x4d4   : > { %784 = vadd.xlane.f32.xlu0 %v783_v58  ;;  %v1141_v59 = vsel %vm638_vm14, %v1134_v57, -inf  ;;  %1664 = vpow2.f32 %v779_v60 }
 0x4d5   : > { %1142 = vmax.xlane.f32.xlu1 %v1141_v59 }
 0x4d7   : > { %v773_v62 = vpop.xlane.xlu2 %772 }
 0x4d8   : > { %v776_v63 = vsub.f32 %v764_v31, %v773_v62 }
 0x4da   : > { %v781_v3 = vmul.f32 1.442695, %v776_v63  ;;  %v1987_v5 = vpop.eup %1664 }
 0x4db   : > { %v786_v6 = vsel %vm631_vm13, %v1987_v5, 0.0 }
 0x4dc   : > { %1136 = vmax.xlane.f32.xlu0 %v1135_v2  ;;  %1666 = vpow2.f32 %v781_v3 }
 0x4df   : > { %v968_v9 = vpop.xlane.xlu1 %967 }
 0x4e0   : > { %v975_v10 = vsub.f32 %v963_v35, %v968_v9 }
 0x4e2   : > { %v1992_v7 = vpop.eup %1666  ;;  %v978_v11 = vmul.f32 1.442695, %v975_v10 }
 0x4e3   : > { %v789_v8 = vsel %vm638_vm14, %v1992_v7, 0.0 }
 0x4e4   : > { %787 = vadd.xlane.f32.xlu0 %v786_v6  ;;  %1668 = vpow2.f32 %v978_v11 }
 0x4e5   : > { %1620 = vrot.lane.b32.xlu2 %v1898_v32, %s1727_s24 }
 0x4e7   : > { %v971_v16 = vpop.xlane.xlu0 %970 }
 0x4ea   : > { %v1999_v13 = vpop.eup %1668 }
 0x4eb   : > { %v984_v14 = vsel %vm631_vm13, %v1999_v13, 0.0 }
 0x4ec   : > { %790 = vadd.xlane.f32.xlu0 %v789_v8 }
 0x4ed   : > { %1172 = vrot.lane.b32.xlu2 %v1877_v19, %s1728_s28 }
 0x4ee   : > { %802 = vrot.lane.b32.xlu1 %v1877_v19, %s1727_s24 }
 0x4ef   : > { %v974_v15 = vpop.xlane.xlu2 %973 }
 0x4f0   : > { %v977_v26 = vsub.f32 %v1970_v41, %v974_v15 }
 0x4f2   : > { %v982_v29 = vmul.f32 1.442695, %v977_v26 }
 0x500   : > { %1625 = vrot.lane.b32.xlu0 %v1898_v32, %s1728_s28 }
 0x518   : > { %985 = vadd.xlane.f32.xlu1 %v984_v14 }
 0x540   : > { %v1140_v17 = vpop.xlane.xlu2 %1139 }
 0x541   : > { %v1145_v18 = vsub.f32 %v1133_v51, %v1140_v17 }
 0x543   : > { %v1149_v20 = vmul.f32 1.442695, %v1145_v18 }
 0x545   : > { %1670 = vpow2.f32 %v1149_v20 }
 0x547   : > { %v785_v21 = vpop.xlane.xlu0 %784 }
 0x548   : > { %v1621_v22 = vpop.permute.xlu2 %1620  ;;  %v1143_v23 = vpop.xlane.xlu1 %1142 }
 0x549   : > { %v1146_v24 = vsub.f32 %v1134_v57, %v1143_v23  ;;  %v1622_v48 = vunpack.i.l.bf16 %v1621_v22  ;;  %v1623_v49 = vunpack.i.h.bf16 %v1621_v22 }
 0x54b   : > { %v2003_v25 = vpop.eup %1670  ;;  %v1151_v27 = vmul.f32 1.442695, %v1146_v24 }
 0x54c   : > { %v1156_v28 = vsel %vm631_vm13, %v2003_v25, 0.0 }
 0x54d   : > { %1672 = vpow2.f32 %v1151_v27  ;;  %1157 = vadd.xlane.f32.xlu2 %v1156_v28  ;;  %v579_v27 = vld [vmem:[%s2169_s5 + $0x18] sm:$0xff]  ;;  %v578_v28 = vld [vmem:[%s2169_s5 + $0x10] sm:$0xff] }
 0x54e   : > { %1674 = vpow2.f32 %v982_v29 }
 0x54f   : > { %v1137_v30 = vpop.xlane.xlu0 %1136 }
 0x550   : > { %v1144_v31 = vsub.f32 %v1132_v61, %v1137_v30  ;;  %v1173_v33 = vpop.permute.xlu2 %1172 }
 0x551   : > { %1575 = vmatpush.msk.msrb.mxu3 %vm683_vm15, %v1173_v33 }
 0x552   : > { %v1147_v34 = vmul.f32 1.442695, %v1144_v31 }
 0x553   : > { %v2009_v35 = vpop.eup %1672 }
 0x554   : > { %1676 = vpow2.f32 %v1147_v34  ;;  %v1159_v36 = vsel %vm638_vm14, %v2009_v35, 0.0  ;;  %v2013_v37 = vpop.eup %1674 }
 0x555   : > { %1160 = vadd.xlane.f32.xlu1 %v1159_v36  ;;  %1678 = vrcp.f32 %v785_v21  ;;  %v990_v41 = vsel %vm638_vm14, %v2013_v37, 0.0 }
 0x557   : > { %v788_v42 = vpop.xlane.xlu0 %787 }
 0x558   : > { %1680 = vrcp.f32 %v788_v42 }
 0x55a   : > { %v1677_v39 = vpop.eup %1676 }
 0x55b   : > { %v1153_v40 = vsel %vm631_vm13, %v1677_v39, 0.0  ;;  %v1679_v47 = vpop.eup %1678 }
 0x55c   : > { %1154 = vadd.xlane.f32.xlu0 %v1153_v40  ;;  %v795_v50 = vmul.f32 %v1679_v47, %v1981_v55  ;;  %v976_v55 = vsub.f32 %v1966_v38, %v971_v16 }
 0x55d   : > { %991 = vadd.xlane.f32.xlu1 %v990_v41 }
 0x55e   : > { %v1681_v52 = vpop.eup %1680  ;;  %v980_v60 = vmul.f32 1.442695, %v976_v55 }
 0x55f   : > { %v791_v51 = vpop.xlane.xlu0 %790  ;;  %v796_v53 = vmul.f32 %v1681_v52, %v1987_v5 }
 0x560   : > { %v803_v46 = vpop.permute.xlu1 %802  ;;  %1682 = vrcp.f32 %v791_v51 }
 0x561   : > { %1546 = vmatpush.msk.msrb.mxu2 %vm683_vm15, %v803_v46  ;;  %1684 = vpow2.f32 %v980_v60 }
 0x563   : > { %831 = vmatpush.msrb.mxu2 %v1622_v48  ;;  %v1637_v48 = vld [vmem:[%s2170_s6] ss:$0 sm:$0xff] }
 0x565   : > { %832 = vmatpush.msrb.mxu2 %v1623_v49 }
 0x566   : > { %1547 = vmatmul.msk.f32.vlgmr.msrb.gmra.mxu2 %vm631_vm13, %v795_v50  ;;  %v1683_v54 = vpop.eup %1682 }
 0x567   : > { %v797_v58 = vmul.f32 %v1683_v54, %v1992_v7  ;;  %v1685_v61 = vpop.eup %1684 }
 0x568   : > { %v987_v62 = vsel %vm631_vm13, %v1685_v61, 0.0 }
 0x56e   : > { %1548 = vmatmul.msk.f32.gmra.mxu2 %vm631_vm13, %v796_v53 }
 0x570   : > { %1003 = vrot.lane.b32.xlu0 %v1877_v19, %s1729_s29  ;;  %v577_v19 = vld [vmem:[%s2169_s5 + $0x8] sm:$0xff] }
 0x571   : > { %867 = vmatpush.msrb.mxu0 %v577_v19 }
 0x572   : > { %v1626_v56 = vpop.permute.xlu0 %1625 }
 0x573   : > { %v1627_v57 = vunpack.i.l.bf16 %v1626_v56  ;;  %v1628_v59 = vunpack.i.h.bf16 %v1626_v56  ;;  %1068 = vmatpush.msra.mxu0 %v578_v28  ;;  %v1638_v28 = vld [vmem:[%s2171_s7] ss:$0 sm:$0xff] }
 0x575   : > { %1201 = vmatpush.msrb.mxu3 %v1627_v57 }
 0x576   : > { %1549 = vmatmul.msk.f32.gmra.mxu2 %vm631_vm13, %v797_v58 }
 0x577   : > { %1202 = vmatpush.msrb.mxu3 %v1628_v59 }
 0x578   : > { %1630 = vrot.lane.b32.xlu0 %v1898_v32, %s1729_s29 }
 0x58b   : > { %v986_v2 = vpop.xlane.xlu1 %985 }
 0x5a2   : > { %988 = vadd.xlane.f32.xlu0 %v987_v62 }
 0x5c0   : > { %v1158_v3 = vpop.xlane.xlu2 %1157 }
 0x5c8   : > { %v1161_v38 = vpop.xlane.xlu1 %1160 }
 0x5cf   : > { %v1155_v63 = vpop.xlane.xlu0 %1154 }
 0x5d0   : > { %1686 = vrcp.f32 %v1155_v63  ;;  %v992_v23 = vpop.xlane.xlu1 %991 }
 0x5d1   : > { %1688 = vrcp.f32 %v1158_v3 }
 0x5d2   : > { %1690 = vrcp.f32 %v1161_v38 }
 0x5d3   : > { %1692 = vrcp.f32 %v986_v2 }
 0x5d6   : > { %v1687_v5 = vpop.eup %1686 }
 0x5d7   : > { %v1165_v32 = vmul.f32 %v1687_v5, %v1677_v39  ;;  %v1689_v6 = vpop.eup %1688 }
 0x5d8   : > { %v1166_v7 = vmul.f32 %v1689_v6, %v2003_v25  ;;  %v1691_v9 = vpop.eup %1690 }
 0x5d9   : > { %1576 = vmatmul.msk.f32.vlgmr.msrb.gmra.mxu3 %vm631_vm13, %v1165_v32  ;;  %v1167_v10 = vmul.f32 %v1691_v9, %v2009_v35  ;;  %v1693_v15 = vpop.eup %1692 }
 0x5da   : > { %v996_v18 = vmul.f32 %v1693_v15, %v1999_v13  ;;  %v1344_v15 = vld [vmem:[%s2173_s9 + $0x18] sm:$0xff] }
 0x5e1   : > { %1577 = vmatmul.msk.f32.gmra.mxu3 %vm631_vm13, %v1166_v7 }
 0x5e2   : > { %v1004_v8 = vpop.permute.xlu0 %1003 }
 0x5e3   : > { %1562 = vmatpush.msk.msra.mxu2 %vm683_vm15, %v1004_v8 }
 0x5e9   : > { %v834_v11 = vpop.f32.mrf.mxu2  ;;  %1578 = vmatmul.msk.f32.gmra.mxu3 %vm631_vm13, %v1167_v10 }
 0x5ea   : > { %1550 = vmatmul.msk.f32.vlgmr.msrb.gmra.mxu0 %vm589_vm12, %v834_v11  ;;  %v1631_v14 = vpop.permute.xlu0 %1630 }
 0x5eb   : > { %v1632_v16 = vunpack.i.l.bf16 %v1631_v14  ;;  %v1633_v17 = vunpack.i.h.bf16 %v1631_v14  ;;  %1370 = vmatpush.msrb.mxu0 %v1344_v15 }
 0x5ed   : > { %1032 = vmatpush.msra.mxu2 %v1632_v16  ;;  %v1343_v16 = vld [vmem:[%s2173_s9 + $0x10] sm:$0xff] }
 0x5ee   : > { %1371 = vmatpush.msrb.mxu0 %v1343_v16 }
 0x5ef   : > { %1033 = vmatpush.msra.mxu2 %v1633_v17  ;;  %v1342_v17 = vld [vmem:[%s2173_s9 + $0x8] sm:$0xff] }
 0x5f0   : > { %1563 = vmatmul.msk.f32.vlgmr.msra.gmra.mxu2 %vm631_vm13, %v996_v18  ;;  %v1341_v18 = vld [vmem:[%s2173_s9] sm:$0xff]  ;;  %1372 = vmatpush.msrb.mxu0 %v1342_v17 }
 0x5f1   : > { %v837_v20 = vpop.f32.mrf.mxu2  ;;  %1237 = vmatpush.msrb.mxu2 %v579_v27 }
 0x5f2   : > { %1551 = vmatmul.msk.f32.gmra.mxu0 %vm589_vm12, %v837_v20 }
 0x5f3   : > { %1373 = vmatpush.msrb.mxu0 %v1341_v18 }
 0x5f9   : > { %v840_v21 = vpop.f32.mrf.mxu2 }
 0x5fa   : > { %1552 = vmatmul.msk.f32.gmra.mxu0 %vm589_vm12, %v840_v21 }
 0x615   : > { %v989_v22 = vpop.xlane.xlu0 %988 }
 0x616   : > { %1694 = vrcp.f32 %v989_v22 }
 0x617   : > { %1696 = vrcp.f32 %v992_v23 }
 0x61c   : > { %v1695_v24 = vpop.eup %1694 }
 0x61d   : > { %v997_v25 = vmul.f32 %v1695_v24, %v1685_v61  ;;  %v1697_v26 = vpop.eup %1696 }
 0x61e   : > { %v998_v13 = vmul.f32 %v1697_v26, %v2013_v37 }
 0x61f   : > { %1564 = vmatmul.msk.f32.gmra.mxu2 %vm631_vm13, %v997_v25 }
 0x627   : > { %1565 = vmatmul.msk.f32.gmra.mxu2 %vm631_vm13, %v998_v13 }
 0x65c   : > { %v1204_v29 = vpop.f32.mrf.mxu3 }
 0x65d   : > { %1579 = vmatmul.msk.f32.vlgmr.msrb.gmra.mxu2 %vm589_vm12, %v1204_v29 }
 0x664   : > { %v1207_v30 = vpop.f32.mrf.mxu3 }
 0x665   : > { %1580 = vmatmul.msk.f32.gmra.mxu2 %vm589_vm12, %v1207_v30 }
 0x667   : > { %v869_v36 = vpop.f32.mrf.mxu0 }
 0x668   : > { %v905_v40 = vadd.f32 %v1974_v43, %v869_v36 }
 0x66c   : > { %v1210_v31 = vpop.f32.mrf.mxu3 }
 0x66d   : > { %1581 = vmatmul.msk.f32.gmra.mxu2 %vm589_vm12, %v1210_v31  ;;  %v1639_v31 = vld [vmem:[%s2172_s8] ss:$0 sm:$0xff] }
 0x66f   : > { %v872_v37 = vpop.f32.mrf.mxu0 }
 0x670   : > { %v908_v52 = vadd.f32 %v1976_v44, %v872_v37 }
 0x673   : > { %v1035_v33 = vpop.f32.mrf.mxu2 }
 0x674   : > { %1566 = vmatmul.msk.f32.vlgmr.msra.gmra.mxu0 %vm589_vm12, %v1035_v33 }
 0x677   : > { %v875_v39 = vpop.f32.mrf.mxu0 }
 0x678   : > { %v911_v58 = vadd.f32 %v1978_v45, %v875_v39 }
 0x6a2   : > { %v1038_v34 = vpop.f32.mrf.mxu2 }
 0x6a3   : > { %1567 = vmatmul.msk.f32.gmra.mxu0 %vm589_vm12, %v1038_v34 }
 0x6aa   : > { %v1041_v35 = vpop.f32.mrf.mxu2 }
 0x6ab   : > { %1568 = vmatmul.msk.f32.gmra.mxu0 %vm589_vm12, %v1041_v35 }
 0x6e0   : > { %v1239_v46 = vpop.f32.mrf.mxu2 }
 0x6e8   : > { %v1242_v53 = vpop.f32.mrf.mxu2 }
 0x6f0   : > { %v1245_v61 = vpop.f32.mrf.mxu2 }
 0x6f1   : > { %v1070_v41 = vpop.f32.mrf.mxu0 }
 0x6f2   : > { %v1079_v42 = vadd.f32 %v1070_v41, %v905_v40 }
 0x6f4   : > { %v1248_v47 = vadd.f32 %v1239_v46, %v1079_v42 }
 0x6f6   : > { %v1251_v49 = vadd.f32 %v1248_v47, %v1816_v0 }
 0x6f8   : > { %v2063_v50 = vadd.f32 %v1637_v48, %v1251_v49 }
 0x6fa   : > { %v1263_v51 = vsel %vm446_vm0, %v2063_v50, 0.0 }
 0x6fb   : > { %1264 = vadd.xlane.f32.xlu2 %v1263_v51 }
 0x720   : > { %v1073_v43 = vpop.f32.mrf.mxu0 }
 0x721   : > { %v1080_v54 = vadd.f32 %v1073_v43, %v908_v52 }
 0x723   : > { %v1249_v56 = vadd.f32 %v1242_v53, %v1080_v54 }
 0x725   : > { %v1252_v57 = vadd.f32 %v1249_v56, %v1824_v4 }
 0x727   : > { %v2070_v59 = vadd.f32 %v1637_v48, %v1252_v57 }
 0x728   : > { %v1076_v55 = vpop.f32.mrf.mxu0 }
 0x729   : > { %v1081_v0 = vadd.f32 %v1076_v55, %v911_v58  ;;  %v1266_v60 = vsel %vm446_vm0, %v2070_v59, 0.0 }
 0x72a   : > { %1267 = vadd.xlane.f32.xlu1 %v1266_v60 }
 0x72b   : > { %v1250_v62 = vadd.f32 %v1245_v61, %v1081_v0 }
 0x72d   : > { %v1253_v44 = vadd.f32 %v1250_v62, %v1818_v1 }
 0x72f   : > { %v2075_v19 = vadd.f32 %v1637_v48, %v1253_v44 }
 0x731   : > { %v1269_v63 = vsel %vm453_vm1, %v2075_v19, 0.0 }
 0x732   : > { %1270 = vadd.xlane.f32.xlu2 %v1269_v63  ;;  %v1418_v63 = vld [vmem:[%s2175_s11 + $0x38] sm:$0xff] }
 0x733   : > { %1441 = vmatpush.msrb.mxu1 %v1418_v63 }
 0x76e   : > { %v1265_v4 = vpop.xlane.xlu2 %1264 }
 0x76f   : > { %v1272_v45 = vmul.f32 %v1265_v4, %v1828_v12  ;;  %v1417_v4 = vld [vmem:[%s2175_s11 + $0x30] sm:$0xff] }
 0x770   : > { %1442 = vmatpush.msrb.mxu1 %v1417_v4 }
 0x771   : > { %v1275_v2 = vsub.f32 %v2063_v50, %v1272_v45  ;;  %v1416_v45 = vld [vmem:[%s2175_s11 + $0x28] sm:$0xff] }
 0x772   : > { %1443 = vmatpush.msrb.mxu1 %v1416_v45 }
 0x773   : > { %v1278_v3 = vmul.f32 %v1275_v2, %v1275_v2 }
 0x775   : > { %v1281_v5 = vsel %vm446_vm0, %v1278_v3, 0.0  ;;  %v1414_v3 = vld [vmem:[%s2175_s11 + $0x18] sm:$0xff] }
 0x776   : > { %1282 = vadd.xlane.f32.xlu1 %v1281_v5  ;;  %v1413_v5 = vld [vmem:[%s2175_s11 + $0x10] sm:$0xff] }
 0x79d   : > { %v1268_v32 = vpop.xlane.xlu1 %1267 }
 0x79e   : > { %v1273_v38 = vmul.f32 %v1268_v32, %v1828_v12  ;;  %v1412_v32 = vld [vmem:[%s2175_s11 + $0x8] sm:$0xff] }
 0x7a0   : > { %v1276_v1 = vsub.f32 %v2070_v59, %v1273_v38  ;;  %v1411_v38 = vld [vmem:[%s2175_s11] sm:$0xff] }
 0x7a2   : > { %v1279_v6 = vmul.f32 %v1276_v1, %v1276_v1 }
 0x7a4   : > { %v1284_v7 = vsel %vm446_vm0, %v1279_v6, 0.0 }
 0x7a5   : > { %1285 = vadd.xlane.f32.xlu2 %v1284_v7  ;;  %v1271_v8 = vpop.xlane.xlu2 %1270 }
 0x7a6   : > { %v1274_v9 = vmul.f32 %v1271_v8, %v1828_v12 }
 0x7a8   : > { %v2087_v10 = vsub.f32 %v2075_v19, %v1274_v9 }
 0x7aa   : > { %v1280_v11 = vmul.f32 %v2087_v10, %v2087_v10 }
 0x7ac   : > { %v1287_v14 = vsel %vm453_vm1, %v1280_v11, 0.0 }
 0x7ad   : > { %1288 = vadd.xlane.f32.xlu1 %v1287_v14 }
 0x7e9   : > { %v1283_v20 = vpop.xlane.xlu1 %1282 }
 0x7ea   : > { %v1290_v21 = vmul.f32 %v1283_v20, %v1828_v12 }
 0x7ec   : > { %v1293_v22 = vadd.f32 1e-06, %v1290_v21 }
 0x7ee   : > { %1698 = vrsqrt.f32 %v1293_v22  ;;  %vm1302_vm3 = vweird.f32 %v1293_v22 }
 0x7f4   : > { %v1699_v23 = vpop.eup %1698 }
 0x7f5   : > { %v1297_v24 = vmul.f32 %v1699_v23, %v1293_v22  ;;  %vm1303_vm2 = vweird.f32 %v1699_v23 }
 0x7f6   : > { %vm1304_vm4 = vmor %vm1302_vm3, %vm1303_vm2 }
 0x7f7   : > { %v1298_v25 = vmul.f32 %v1699_v23, %v1297_v24 }
 0x7f9   : > { %v1299_v26 = vmul.f32 0.5, %v1298_v25 }
 0x7fb   : > { %v1300_v13 = vsub.f32 1.5, %v1299_v26 }
 0x7fd   : > { %v1301_v27 = vmul.f32 %v1699_v23, %v1300_v13 }
 0x7ff   : > { %v1305_v29 = vsel %vm1304_vm4, %v1699_v23, %v1301_v27 }
 0x800   : > { %v1326_v30 = vmul.f32 %v1305_v29, %v1275_v2  ;;  %v1415_v2 = vld [vmem:[%s2175_s11 + $0x20] sm:$0xff] }
 0x801   : > { %1444 = vmatpush.msrb.mxu1 %v1415_v2 }
 0x802   : > { %v1332_v33 = vmul.f32 %v1638_v28, %v1326_v30 }
 0x803   : > { %1445 = vmatpush.msrb.mxu1 %v1414_v3 }
 0x804   : > { %v1338_v34 = vadd.f32 %v1639_v31, %v1332_v33 }
 0x805   : > { %1446 = vmatpush.msrb.mxu1 %v1413_v5 }
 0x806   : > { %1582 = vmatmul.msk.f32.vlgmr.msrb.gmra.mxu0 %vm446_vm0, %v1338_v34 }
 0x807   : > { %1447 = vmatpush.msrb.mxu1 %v1412_v32 }
 0x809   : > { %1448 = vmatpush.msrb.mxu1 %v1411_v38 }
 0x818   : > { %v1286_v35 = vpop.xlane.xlu2 %1285 }
 0x819   : > { %v1291_v36 = vmul.f32 %v1286_v35, %v1828_v12 }
 0x81b   : > { %v1294_v37 = vadd.f32 1e-06, %v1291_v36 }
 0x81d   : > { %1700 = vrsqrt.f32 %v1294_v37  ;;  %vm1312_vm6 = vweird.f32 %v1294_v37 }
 0x820   : > { %v1289_v39 = vpop.xlane.xlu1 %1288 }
 0x821   : > { %v1292_v40 = vmul.f32 %v1289_v39, %v1828_v12 }
 0x823   : > { %v1701_v41 = vpop.eup %1700  ;;  %v1295_v42 = vadd.f32 1e-06, %v1292_v40 }
 0x824   : > { %v1307_v46 = vmul.f32 %v1701_v41, %v1294_v37  ;;  %vm1313_vm5 = vweird.f32 %v1701_v41 }
 0x825   : > { %1702 = vrsqrt.f32 %v1295_v42  ;;  %vm1314_vm7 = vmor %vm1312_vm6, %vm1313_vm5  ;;  %vm1322_vm9 = vweird.f32 %v1295_v42 }
 0x826   : > { %v1308_v47 = vmul.f32 %v1701_v41, %v1307_v46  ;;  %v1641_v46 = vld [vmem:[%s2176_s12] ss:$0 sm:$0xff] }
 0x828   : > { %v1309_v48 = vmul.f32 0.5, %v1308_v47 }
 0x82a   : > { %v1310_v49 = vsub.f32 1.5, %v1309_v48 }
 0x82b   : > { %v1703_v51 = vpop.eup %1702 }
 0x82c   : > { %v1311_v52 = vmul.f32 %v1701_v41, %v1310_v49  ;;  %v1317_v53 = vmul.f32 %v1703_v51, %v1295_v42  ;;  %vm1323_vm8 = vweird.f32 %v1703_v51 }
 0x82d   : > { %vm1324_vm10 = vmor %vm1322_vm9, %vm1323_vm8 }
 0x82e   : > { %v1315_v43 = vsel %vm1314_vm7, %v1701_v41, %v1311_v52  ;;  %v1318_v54 = vmul.f32 %v1703_v51, %v1317_v53 }
 0x82f   : > { %v1327_v56 = vmul.f32 %v1315_v43, %v1276_v1  ;;  %v1640_v1 = vld [vmem:[%s2174_s10] ss:$0 sm:$0xff] }
 0x830   : > { %v1319_v57 = vmul.f32 0.5, %v1318_v54 }
 0x831   : > { %v1333_v58 = vmul.f32 %v1638_v28, %v1327_v56 }
 0x832   : > { %v1320_v55 = vsub.f32 1.5, %v1319_v57 }
 0x833   : > { %v1339_v12 = vadd.f32 %v1639_v31, %v1333_v58 }
 0x834   : > { %v1321_v0 = vmul.f32 %v1703_v51, %v1320_v55 }
 0x835   : > { %1583 = vmatmul.msk.f32.gmra.mxu0 %vm446_vm0, %v1339_v12 }
 0x836   : > { %v1325_v60 = vsel %vm1324_vm10, %v1703_v51, %v1321_v0 }
 0x837   : > { %v1328_v61 = vmul.f32 %v1325_v60, %v2087_v10 }
 0x839   : > { %v1334_v62 = vmul.f32 %v1638_v28, %v1328_v61 }
 0x83b   : > { %v1340_v44 = vadd.f32 %v1639_v31, %v1334_v62 }
 0x83d   : > { %1584 = vmatmul.msk.f32.gmra.mxu0 %vm446_vm0, %v1340_v44 }
 0x883   : > { %v1375_v6 = vpop.f32.mrf.mxu0 }
 0x884   : > { %v1376_v7 = vadd.f32 %v1640_v1, %v1375_v6 }
 0x886   : > { %v1387_v8 = vmul.f32 0.044715, %v1376_v7  ;;  %v1384_v16 = vmul.f32 0.5, %v1376_v7 }
 0x888   : > { %v1390_v9 = vmul.f32 %v1387_v8, %v1376_v7 }
 0x88a   : > { %v1393_v10 = vmul.f32 %v1390_v9, %v1376_v7 }
 0x88c   : > { %v1396_v11 = vadd.f32 %v1393_v10, %v1376_v7 }
 0x88e   : > { %v1399_v14 = vmul.f32 0.7978846, %v1396_v11 }
 0x890   : > { %1704 = vtanh.f32 %v1399_v14 }
 0x896   : > { %v1705_v15 = vpop.eup %1704 }
 0x897   : > { %v1405_v17 = vadd.f32 1.0, %v1705_v15 }
 0x899   : > { %v1408_v18 = vmul.f32 %v1405_v17, %v1384_v16 }
 0x89b   : > { %1585 = vmatmul.msk.f32.vlgmr.msrb.gmra.mxu1 %vm1423_vm11, %v1408_v18 }
 0x8b2   : > { %v1378_v20 = vpop.f32.mrf.mxu0 }
 0x8b3   : > { %v1379_v21 = vadd.f32 %v1640_v1, %v1378_v20 }
 0x8b5   : > { %v1388_v22 = vmul.f32 0.044715, %v1379_v21  ;;  %v1385_v35 = vmul.f32 0.5, %v1379_v21 }
 0x8b7   : > { %v1391_v23 = vmul.f32 %v1388_v22, %v1379_v21 }
 0x8b9   : > { %v1394_v24 = vmul.f32 %v1391_v23, %v1379_v21 }
 0x8ba   : > { %v1381_v25 = vpop.f32.mrf.mxu0 }
 0x8bb   : > { %v1382_v26 = vadd.f32 %v1640_v1, %v1381_v25  ;;  %v1397_v13 = vadd.f32 %v1394_v24, %v1379_v21 }
 0x8bd   : > { %v1389_v27 = vmul.f32 0.044715, %v1382_v26  ;;  %v1400_v28 = vmul.f32 0.7978846, %v1397_v13  ;;  %v1386_v40 = vmul.f32 0.5, %v1382_v26 }
 0x8bf   : > { %1706 = vtanh.f32 %v1400_v28  ;;  %v1392_v29 = vmul.f32 %v1389_v27, %v1382_v26 }
 0x8c1   : > { %v1395_v30 = vmul.f32 %v1392_v29, %v1382_v26 }
 0x8c3   : > { %v1398_v31 = vadd.f32 %v1395_v30, %v1382_v26 }
 0x8c5   : > { %v1707_v33 = vpop.eup %1706  ;;  %v1401_v34 = vmul.f32 0.7978846, %v1398_v31 }
 0x8c6   : > { %v1406_v36 = vadd.f32 1.0, %v1707_v33 }
 0x8c7   : > { %1708 = vtanh.f32 %v1401_v34 }
 0x8c8   : > { %v1409_v37 = vmul.f32 %v1406_v36, %v1385_v35 }
 0x8ca   : > { %1586 = vmatmul.msk.f32.gmra.mxu1 %vm1423_vm11, %v1409_v37 }
 0x8cd   : > { %v1709_v39 = vpop.eup %1708 }
 0x8ce   : > { %v1407_v41 = vadd.f32 1.0, %v1709_v39 }
 0x8d0   : > { %v1410_v42 = vmul.f32 %v1407_v41, %v1386_v40 }
 0x8d2   : > { %1587 = vmatmul.msk.f32.gmra.mxu1 %vm1423_vm11, %v1410_v42 }
 0x918   : > { %v1450_v47 = vpop.f32.mrf.mxu1 }
 0x919   : > { %v1451_v48 = vadd.f32 %v1641_v46, %v1450_v47 }
 0x91b   : > { %v1459_v49 = vadd.f32 %v1451_v48, %v2063_v50 }
 0x91d   : > { %1462 = vst.msk [vmem:[%s440_s30] sm:$0xff] %vm446_vm0, %v1459_v49 }
 0x947   : > { %v1453_v51 = vpop.f32.mrf.mxu1 }
 0x948   : > { %v1454_v52 = vadd.f32 %v1641_v46, %v1453_v51 }
 0x94a   : > { %v1460_v53 = vadd.f32 %v1454_v52, %v2070_v59 }
 0x94c   : > { %1463 = vst.msk [vmem:[%s440_s30 + $0x8] sm:$0xff] %vm446_vm0, %v1460_v53 }
 0x94f   : > { %v1456_v43 = vpop.f32.mrf.mxu1 }
 0x950   : > { %v1457_v54 = vadd.f32 %v1641_v46, %v1456_v43 }
 0x952   : > { %v1461_v56 = vadd.f32 %v1457_v54, %v2075_v19 }
 0x954   : > { %1464 = vst.msk [vmem:[%s440_s30 + $0x10] sm:$0x1] %vm453_vm1, %v1461_v56 }
 0x955 PF: > { %s23_s25 = sadd.s32 1, %s1716_s25  }
 0x956   : > { %p20_p4 = scmp.ge.s32.totalorder %s23_s25, 4  }
 0x958   :  { %22 = sbr.rel (!%p20_p4) target bundleno = 1 (0x1), region = 102 }

</bundles_post_ra>
